<compile_context>
chip_gen: v5e
topology: v5e:2x2
jax: 0.10.0
libtpu: 0.0.40
codegen_flags: <defaults>
</compile_context>

<pallas_src>
import jax
import jax.numpy as jnp
from jax.experimental import pallas as pl
from jax.experimental.pallas import tpu as pltpu


def _conv3x3_taps(buf_ref, w_ref, not_left, not_right, H, W, n_out):
    """3x3 conv (stride 1, pad 1) from a height-padded flat VMEM buffer.

    buf_ref: VMEM ref ((H+4)*W, Cin) f32; image rows occupy [2*W, 2*W + H*W),
             the 2*W rows above/below are zero (height padding).
    w_ref  : VMEM ref (9, Cin, n_out) bf16, tap k = dy*3 + dx.

    Each tap is a contiguous first-axis slice at constant offset
    (dy+1)*W + (dx-1); width wrap-around is masked out.  9 bf16 MXU matmuls
    accumulate into an f32 accumulator.
    """
    HW = H * W
    acc = jnp.zeros((HW, n_out), jnp.float32)
    for dy in range(3):
        for dx in range(3):
            off = (dy + 1) * W + (dx - 1)
            patch = buf_ref[pl.ds(off, HW), :]
            if dx == 0:          # reads column x-1 -> invalid at x == 0
                patch = jnp.where(not_left, patch, 0.0)
            elif dx == 2:        # reads column x+1 -> invalid at x == W-1
                patch = jnp.where(not_right, patch, 0.0)
            acc += jnp.dot(patch.astype(jnp.bfloat16), w_ref[dy * 3 + dx],
                           preferred_element_type=jnp.float32)
    return acc


def basic_block_kernel(x_ref, w1_ref, s1_ref, b1_ref, w2_ref, s2_ref, b2_ref,
                       o_ref, buf1, buf2):
    _, H, W, Cin = x_ref.shape
    Cmid = w1_ref.shape[-1]
    Cout = w2_ref.shape[-1]
    HW = H * W

    # Width-boundary masks (per output flat row = y*W + x).
    col = jax.lax.broadcasted_iota(jnp.int32, (HW, 1), 0) % W
    not_left = col != 0
    not_right = col != W - 1

    # Zero the height-padding rows (2*W top, 2*W bottom) every grid step so the
    # kernel is correct however the "parallel" batch axis is split across cores.
    buf1[pl.ds(0, 2 * W), :] = jnp.zeros((2 * W, Cin), buf1.dtype)
    buf1[pl.ds(2 * W + HW, 2 * W), :] = jnp.zeros((2 * W, Cin), buf1.dtype)
    buf2[pl.ds(0, 2 * W), :] = jnp.zeros((2 * W, Cmid), buf2.dtype)
    buf2[pl.ds(2 * W + HW, 2 * W), :] = jnp.zeros((2 * W, Cmid), buf2.dtype)

    # conv1 + bn1 + relu
    x_flat = x_ref[0].reshape(HW, Cin)                 # f32; also the residual
    buf1[pl.ds(2 * W, HW), :] = x_flat
    acc1 = _conv3x3_taps(buf1, w1_ref, not_left, not_right, H, W, Cmid)
    out1 = jnp.maximum(acc1 * s1_ref[0] + b1_ref[0], 0.0)

    # conv2 + bn2 + residual add + relu (intermediate never leaves VMEM)
    buf2[pl.ds(2 * W, HW), :] = out1
    acc2 = _conv3x3_taps(buf2, w2_ref, not_left, not_right, H, W, Cout)
    out2 = acc2 * s2_ref[0] + b2_ref[0] + x_flat
    out2 = jnp.maximum(out2, 0.0)
    o_ref[...] = out2.reshape(1, H, W, Cout).astype(o_ref.dtype)


def _fold_bn(gamma, beta, mean, var, eps=1e-5):
    scale = gamma / jnp.sqrt(var + eps)
    bias = beta - mean * scale
    return scale.astype(jnp.float32), bias.astype(jnp.float32)


def basic_block_forward(x_nchw, params):
    """BasicBlock.forward (stride=1, downsample=None), x in NCHW float32."""
    N, Cin, H, W = x_nchw.shape
    Cmid = params["conv1_w"].shape[0]
    Cout = params["conv2_w"].shape[0]
    assert Cin == Cout, "no-downsample BasicBlock requires inplanes == planes"

    x_nhwc = jnp.transpose(x_nchw, (0, 2, 3, 1)).astype(jnp.float32)

    s1, b1 = _fold_bn(params["bn1_gamma"], params["bn1_beta"],
                      params["bn1_mean"], params["bn1_var"])
    s2, b2 = _fold_bn(params["bn2_gamma"], params["bn2_beta"],
                      params["bn2_mean"], params["bn2_var"])

    # OIHW -> HWIO -> (9, Cin, Cout), bf16 for the MXU.
    w1 = jnp.transpose(params["conv1_w"], (2, 3, 1, 0)).reshape(9, Cin, Cmid)
    w2 = jnp.transpose(params["conv2_w"], (2, 3, 1, 0)).reshape(9, Cmid, Cout)
    w1 = w1.astype(jnp.bfloat16)
    w2 = w2.astype(jnp.bfloat16)

    flat_pad = (H + 4) * W   # H*W interior + 2*W zero rows top and bottom

    out = pl.pallas_call(
        basic_block_kernel,
        out_shape=jax.ShapeDtypeStruct((N, H, W, Cout), jnp.float32),
        grid_spec=pltpu.PrefetchScalarGridSpec(
            num_scalar_prefetch=0,
            grid=(N,),
            in_specs=[
                pl.BlockSpec((1, H, W, Cin), lambda n: (n, 0, 0, 0)),
                pl.BlockSpec((9, Cin, Cmid), lambda n: (0, 0, 0)),
                pl.BlockSpec((1, Cmid), lambda n: (0, 0)),
                pl.BlockSpec((1, Cmid), lambda n: (0, 0)),
                pl.BlockSpec((9, Cmid, Cout), lambda n: (0, 0, 0)),
                pl.BlockSpec((1, Cout), lambda n: (0, 0)),
                pl.BlockSpec((1, Cout), lambda n: (0, 0)),
            ],
            out_specs=pl.BlockSpec((1, H, W, Cout), lambda n: (n, 0, 0, 0)),
            scratch_shapes=[
                pltpu.VMEM((flat_pad, Cin), jnp.float32),   # padded conv1 input
                pltpu.VMEM((flat_pad, Cmid), jnp.float32),  # padded conv2 input
            ],
        ),
        compiler_params=pltpu.CompilerParams(
            dimension_semantics=("parallel",),
            vmem_limit_bytes=32 * 1024 * 1024,
        ),
    )(x_nhwc, w1, s1.reshape(1, Cmid), b1.reshape(1, Cmid),
      w2, s2.reshape(1, Cout), b2.reshape(1, Cout))

    return jnp.transpose(out, (0, 3, 1, 2))  # back to NCHW


def _reference_forward(x, params, eps=1e-5):
    """Pure-JAX NCHW reference, quantization-matched to the kernel:
    conv operands (x, weights, intermediate activation) rounded to bf16,
    f32 accumulation, f32 identity add."""
    q = lambda a: a.astype(jnp.bfloat16).astype(jnp.float32)

    def conv(a, w):
        return jax.lax.conv_general_dilated(
            q(a), q(w), window_strides=(1, 1), padding=((1, 1), (1, 1)),
            dimension_numbers=("NCHW", "OIHW", "NCHW"),
            precision=jax.lax.Precision.HIGHEST)

    def bn(a, g, b, m, v):
        g = g.reshape(1, -1, 1, 1); b = b.reshape(1, -1, 1, 1)
        m = m.reshape(1, -1, 1, 1); v = v.reshape(1, -1, 1, 1)
        return (a - m) / jnp.sqrt(v + eps) * g + b

    out = conv(x, params["conv1_w"])
    out = bn(out, params["bn1_gamma"], params["bn1_beta"],
             params["bn1_mean"], params["bn1_var"])
    out = jnp.maximum(out, 0.0)
    out = conv(out, params["conv2_w"])
    out = bn(out, params["bn2_gamma"], params["bn2_beta"],
             params["bn2_mean"], params["bn2_var"])
    out = out + x
    return jnp.maximum(out, 0.0)


def make_params(key, inplanes, planes):
    ks = jax.random.split(key, 8)
    return {
        "conv1_w": 0.1 * jax.random.normal(ks[0], (planes, inplanes, 3, 3), jnp.float32),
        "conv2_w": 0.1 * jax.random.normal(ks[1], (planes, planes, 3, 3), jnp.float32),
        "bn1_gamma": 1.0 + 0.1 * jax.random.normal(ks[2], (planes,), jnp.float32),
        "bn1_beta": 0.1 * jax.random.normal(ks[3], (planes,), jnp.float32),
        "bn1_mean": 0.05 * jax.random.normal(ks[4], (planes,), jnp.float32),
        "bn1_var": 1.0 + 0.1 * jnp.abs(jax.random.normal(ks[5], (planes,), jnp.float32)),
        "bn2_gamma": 1.0 + 0.1 * jax.random.normal(ks[6], (planes,), jnp.float32),
        "bn2_beta": 0.1 * jax.random.normal(ks[7], (planes,), jnp.float32),
        "bn2_mean": jnp.zeros((planes,), jnp.float32),
        "bn2_var": jnp.ones((planes,), jnp.float32),
    }


if __name__ == "__main__":
    key = jax.random.PRNGKey(0)
    kx, kp = jax.random.split(key)

    N, C, H, W = 2, 8, 16, 16   # inplanes == planes == 8, stride=1, no downsample
    x = jax.random.normal(kx, (N, C, H, W), jnp.float32)
    params = make_params(kp, inplanes=C, planes=C)

    out = jax.block_until_ready(basic_block_forward(x, params))
    ref = jax.block_until_ready(_reference_forward(x, params))

    assert out.shape == ref.shape == (N, C, H, W)
    max_err = jnp.max(jnp.abs(out - ref))
    assert jnp.allclose(out, ref, rtol=2e-3, atol=2e-3), f"max abs err {max_err}"

    print("KERNEL_OK")
</pallas_src>

<mosaic_0001>
module attributes {stable_mosaic.version = 11 : i64} {
  func.func @basic_block_kernel(%arg0: i32, %arg1: memref<1x16x16x8xf32, #tpu.memory_space<vmem>>, %arg2: memref<9x8x8xbf16, #tpu.memory_space<vmem>>, %arg3: memref<1x8xf32, #tpu.memory_space<vmem>>, %arg4: memref<1x8xf32, #tpu.memory_space<vmem>>, %arg5: memref<9x8x8xbf16, #tpu.memory_space<vmem>>, %arg6: memref<1x8xf32, #tpu.memory_space<vmem>>, %arg7: memref<1x8xf32, #tpu.memory_space<vmem>>, %arg8: memref<1x16x16x8xf32, #tpu.memory_space<vmem>>, %arg9: memref<320x8xf32, #tpu.memory_space<vmem>>, %arg10: memref<320x8xf32, #tpu.memory_space<vmem>>) attributes {dimension_semantics = [#tpu.dimension_semantics<parallel>], iteration_bounds = array<i64: 2>, scalar_prefetch = 0 : i64, scratch_operands = 2 : i64, tpu.core_type = #tpu.core_type<tc>, window_params = [{transform_indices = @transform_0, window_bounds = array<i64: 1, 16, 16, 8>}, {pipeline_mode = #tpu.pipeline_mode<synchronous>, transform_indices = @transform_1, window_bounds = array<i64: 9, 8, 8>}, {pipeline_mode = #tpu.pipeline_mode<synchronous>, transform_indices = @transform_2, window_bounds = array<i64: 1, 8>}, {pipeline_mode = #tpu.pipeline_mode<synchronous>, transform_indices = @transform_3, window_bounds = array<i64: 1, 8>}, {pipeline_mode = #tpu.pipeline_mode<synchronous>, transform_indices = @transform_4, window_bounds = array<i64: 9, 8, 8>}, {pipeline_mode = #tpu.pipeline_mode<synchronous>, transform_indices = @transform_5, window_bounds = array<i64: 1, 8>}, {pipeline_mode = #tpu.pipeline_mode<synchronous>, transform_indices = @transform_6, window_bounds = array<i64: 1, 8>}, {transform_indices = @transform_7, window_bounds = array<i64: 1, 16, 16, 8>}]} {
    %0 = tpu.iota {dimensions = array<i32: 0>} : vector<256x1xi32>
    %c16_i32 = arith.constant 16 : i32
    %c0_i32 = arith.constant 0 : i32
    %1 = arith.cmpi eq, %c16_i32, %c0_i32 : i32
    %c1_i32 = arith.constant 1 : i32
    %2 = arith.select %1, %c1_i32, %c16_i32 : i32
    %3 = vector.broadcast %2 : i32 to vector<256x1xi32>
    %4 = arith.remsi %0, %3 : vector<256x1xi32>
    %c0_i32_0 = arith.constant 0 : i32
    %5 = vector.broadcast %c0_i32_0 : i32 to vector<256x1xi32>
    %6 = arith.cmpi ne, %4, %5 : vector<256x1xi32>
    %c0_i32_1 = arith.constant 0 : i32
    %7 = vector.broadcast %c0_i32_1 : i32 to vector<256x1xi32>
    %8 = arith.cmpi slt, %4, %7 : vector<256x1xi32>
    %c0_i32_2 = arith.constant 0 : i32
    %9 = arith.cmpi slt, %2, %c0_i32_2 : i32
    %10 = vector.broadcast %9 : i1 to vector<256x1xi1>
    %11 = vector.broadcast %10 : vector<256x1xi1> to vector<256x1xi1>
    %12 = arith.xori %8, %11 : vector<256x1xi1>
    %13 = arith.andi %12, %6 : vector<256x1xi1>
    %14 = vector.broadcast %2 : i32 to vector<256x1xi32>
    %15 = arith.addi %4, %14 : vector<256x1xi32>
    %16 = arith.select %13, %15, %4 : vector<256x1xi1>, vector<256x1xi32>
    %c0_i32_3 = arith.constant 0 : i32
    %17 = vector.broadcast %c0_i32_3 : i32 to vector<256x1xi32>
    %18 = arith.cmpi ne, %16, %17 : vector<256x1xi32>
    %c15_i32 = arith.constant 15 : i32
    %19 = vector.broadcast %c15_i32 : i32 to vector<256x1xi32>
    %20 = arith.cmpi ne, %16, %19 : vector<256x1xi32>
    %cst = arith.constant 0.000000e+00 : f32
    %21 = vector.broadcast %cst : f32 to vector<32x8xf32>
    %c0 = arith.constant 0 : index
    %c0_4 = arith.constant 0 : index
    %22 = vector.load %arg9[%c0, %c0_4] : memref<320x8xf32, #tpu.memory_space<vmem>>, vector<32x8xf32>
    tpu.vector_store %arg9[%c0, %c0_4], %21 {strides = array<i32>} : memref<320x8xf32, #tpu.memory_space<vmem>>, vector<32x8xf32>,
    %cst_5 = arith.constant 0.000000e+00 : f32
    %23 = vector.broadcast %cst_5 : f32 to vector<32x8xf32>
    %c288 = arith.constant 288 : index
    %c0_6 = arith.constant 0 : index
    %24 = vector.load %arg9[%c288, %c0_6] : memref<320x8xf32, #tpu.memory_space<vmem>>, vector<32x8xf32>
    tpu.vector_store %arg9[%c288, %c0_6], %23 {strides = array<i32>} : memref<320x8xf32, #tpu.memory_space<vmem>>, vector<32x8xf32>,
    %cst_7 = arith.constant 0.000000e+00 : f32
    %25 = vector.broadcast %cst_7 : f32 to vector<32x8xf32>
    %c0_8 = arith.constant 0 : index
    %c0_9 = arith.constant 0 : index
    %26 = vector.load %arg10[%c0_8, %c0_9] : memref<320x8xf32, #tpu.memory_space<vmem>>, vector<32x8xf32>
    tpu.vector_store %arg10[%c0_8, %c0_9], %25 {strides = array<i32>} : memref<320x8xf32, #tpu.memory_space<vmem>>, vector<32x8xf32>,
    %cst_10 = arith.constant 0.000000e+00 : f32
    %27 = vector.broadcast %cst_10 : f32 to vector<32x8xf32>
    %c288_11 = arith.constant 288 : index
    %c0_12 = arith.constant 0 : index
    %28 = vector.load %arg10[%c288_11, %c0_12] : memref<320x8xf32, #tpu.memory_space<vmem>>, vector<32x8xf32>
    tpu.vector_store %arg10[%c288_11, %c0_12], %27 {strides = array<i32>} : memref<320x8xf32, #tpu.memory_space<vmem>>, vector<32x8xf32>,
    %c0_13 = arith.constant 0 : index
    %c0_14 = arith.constant 0 : index
    %c0_15 = arith.constant 0 : index
    %c0_16 = arith.constant 0 : index
    %29 = vector.load %arg1[%c0_13, %c0_14, %c0_15, %c0_16] : memref<1x16x16x8xf32, #tpu.memory_space<vmem>>, vector<1x16x16x8xf32>
    %30 = vector.shape_cast %29 : vector<1x16x16x8xf32> to vector<16x16x8xf32>
    %31 = vector.shape_cast %30 : vector<16x16x8xf32> to vector<256x8xf32>
    %c32 = arith.constant 32 : index
    %c0_17 = arith.constant 0 : index
    %32 = vector.load %arg9[%c32, %c0_17] : memref<320x8xf32, #tpu.memory_space<vmem>>, vector<256x8xf32>
    tpu.vector_store %arg9[%c32, %c0_17], %31 {strides = array<i32>} : memref<320x8xf32, #tpu.memory_space<vmem>>, vector<256x8xf32>,
    %cst_18 = arith.constant 0.000000e+00 : f32
    %33 = vector.broadcast %cst_18 : f32 to vector<256x8xf32>
    %c15 = arith.constant 15 : index
    %c0_19 = arith.constant 0 : index
    %34 = vector.load %arg9[%c15, %c0_19] : memref<320x8xf32, #tpu.memory_space<vmem>>, vector<256x8xf32>
    %cst_20 = arith.constant 0.000000e+00 : f32
    %35 = vector.shape_cast %18 : vector<256x1xi1> to vector<256x1xi1>
    %36 = vector.broadcast %35 : vector<256x1xi1> to vector<256x8xi1>
    %37 = vector.broadcast %cst_20 : f32 to vector<256x8xf32>
    %38 = arith.select %36, %34, %37 : vector<256x8xi1>, vector<256x8xf32>
    %39 = arith.truncf %38 : vector<256x8xf32> to vector<256x8xbf16>
    %c0_21 = arith.constant 0 : index
    %c0_22 = arith.constant 0 : index
    %c0_23 = arith.constant 0 : index
    %40 = vector.load %arg2[%c0_21, %c0_22, %c0_23] : memref<9x8x8xbf16, #tpu.memory_space<vmem>>, vector<1x8x8xbf16>
    %41 = vector.shape_cast %40 : vector<1x8x8xbf16> to vector<8x8xbf16>
    %cst_24 = arith.constant dense<0.000000e+00> : vector<256x8xf32>
    %42 = tpu.matmul %39, %41, %cst_24 {dimension_numbers = #tpu.dot_dimension_numbers<[1], [0], [0], [1], [0, 0, 1, 1], [], []>} : vector<256x8xbf16>, vector<8x8xbf16>, vector<256x8xf32> -> vector<256x8xf32>
    %43 = arith.addf %33, %42 : vector<256x8xf32>
    %c16 = arith.constant 16 : index
    %c0_25 = arith.constant 0 : index
    %44 = vector.load %arg9[%c16, %c0_25] : memref<320x8xf32, #tpu.memory_space<vmem>>, vector<256x8xf32>
    %45 = arith.truncf %44 : vector<256x8xf32> to vector<256x8xbf16>
    %c1 = arith.constant 1 : index
    %c0_26 = arith.constant 0 : index
    %c0_27 = arith.constant 0 : index
    %46 = vector.load %arg2[%c1, %c0_26, %c0_27] : memref<9x8x8xbf16, #tpu.memory_space<vmem>>, vector<1x8x8xbf16>
    %47 = vector.shape_cast %46 : vector<1x8x8xbf16> to vector<8x8xbf16>
    %cst_28 = arith.constant dense<0.000000e+00> : vector<256x8xf32>
    %48 = tpu.matmul %45, %47, %cst_28 {dimension_numbers = #tpu.dot_dimension_numbers<[1], [0], [0], [1], [0, 0, 1, 1], [], []>} : vector<256x8xbf16>, vector<8x8xbf16>, vector<256x8xf32> -> vector<256x8xf32>
    %49 = arith.addf %43, %48 : vector<256x8xf32>
    %c17 = arith.constant 17 : index
    %c0_29 = arith.constant 0 : index
    %50 = vector.load %arg9[%c17, %c0_29] : memref<320x8xf32, #tpu.memory_space<vmem>>, vector<256x8xf32>
    %cst_30 = arith.constant 0.000000e+00 : f32
    %51 = vector.shape_cast %20 : vector<256x1xi1> to vector<256x1xi1>
    %52 = vector.broadcast %51 : vector<256x1xi1> to vector<256x8xi1>
    %53 = vector.broadcast %cst_30 : f32 to vector<256x8xf32>
    %54 = arith.select %52, %50, %53 : vector<256x8xi1>, vector<256x8xf32>
    %55 = arith.truncf %54 : vector<256x8xf32> to vector<256x8xbf16>
    %c2 = arith.constant 2 : index
    %c0_31 = arith.constant 0 : index
    %c0_32 = arith.constant 0 : index
    %56 = vector.load %arg2[%c2, %c0_31, %c0_32] : memref<9x8x8xbf16, #tpu.memory_space<vmem>>, vector<1x8x8xbf16>
    %57 = vector.shape_cast %56 : vector<1x8x8xbf16> to vector<8x8xbf16>
    %cst_33 = arith.constant dense<0.000000e+00> : vector<256x8xf32>
    %58 = tpu.matmul %55, %57, %cst_33 {dimension_numbers = #tpu.dot_dimension_numbers<[1], [0], [0], [1], [0, 0, 1, 1], [], []>} : vector<256x8xbf16>, vector<8x8xbf16>, vector<256x8xf32> -> vector<256x8xf32>
    %59 = arith.addf %49, %58 : vector<256x8xf32>
    %c31 = arith.constant 31 : index
    %c0_34 = arith.constant 0 : index
    %60 = vector.load %arg9[%c31, %c0_34] : memref<320x8xf32, #tpu.memory_space<vmem>>, vector<256x8xf32>
    %cst_35 = arith.constant 0.000000e+00 : f32
    %61 = vector.shape_cast %18 : vector<256x1xi1> to vector<256x1xi1>
    %62 = vector.broadcast %61 : vector<256x1xi1> to vector<256x8xi1>
    %63 = vector.broadcast %cst_35 : f32 to vector<256x8xf32>
    %64 = arith.select %62, %60, %63 : vector<256x8xi1>, vector<256x8xf32>
    %65 = arith.truncf %64 : vector<256x8xf32> to vector<256x8xbf16>
    %c3 = arith.constant 3 : index
    %c0_36 = arith.constant 0 : index
    %c0_37 = arith.constant 0 : index
    %66 = vector.load %arg2[%c3, %c0_36, %c0_37] : memref<9x8x8xbf16, #tpu.memory_space<vmem>>, vector<1x8x8xbf16>
    %67 = vector.shape_cast %66 : vector<1x8x8xbf16> to vector<8x8xbf16>
    %cst_38 = arith.constant dense<0.000000e+00> : vector<256x8xf32>
    %68 = tpu.matmul %65, %67, %cst_38 {dimension_numbers = #tpu.dot_dimension_numbers<[1], [0], [0], [1], [0, 0, 1, 1], [], []>} : vector<256x8xbf16>, vector<8x8xbf16>, vector<256x8xf32> -> vector<256x8xf32>
    %69 = arith.addf %59, %68 : vector<256x8xf32>
    %c32_39 = arith.constant 32 : index
    %c0_40 = arith.constant 0 : index
    %70 = vector.load %arg9[%c32_39, %c0_40] : memref<320x8xf32, #tpu.memory_space<vmem>>, vector<256x8xf32>
    %71 = arith.truncf %70 : vector<256x8xf32> to vector<256x8xbf16>
    %c4 = arith.constant 4 : index
    %c0_41 = arith.constant 0 : index
    %c0_42 = arith.constant 0 : index
    %72 = vector.load %arg2[%c4, %c0_41, %c0_42] : memref<9x8x8xbf16, #tpu.memory_space<vmem>>, vector<1x8x8xbf16>
    %73 = vector.shape_cast %72 : vector<1x8x8xbf16> to vector<8x8xbf16>
    %cst_43 = arith.constant dense<0.000000e+00> : vector<256x8xf32>
    %74 = tpu.matmul %71, %73, %cst_43 {dimension_numbers = #tpu.dot_dimension_numbers<[1], [0], [0], [1], [0, 0, 1, 1], [], []>} : vector<256x8xbf16>, vector<8x8xbf16>, vector<256x8xf32> -> vector<256x8xf32>
    %75 = arith.addf %69, %74 : vector<256x8xf32>
    %c33 = arith.constant 33 : index
    %c0_44 = arith.constant 0 : index
    %76 = vector.load %arg9[%c33, %c0_44] : memref<320x8xf32, #tpu.memory_space<vmem>>, vector<256x8xf32>
    %cst_45 = arith.constant 0.000000e+00 : f32
    %77 = vector.shape_cast %20 : vector<256x1xi1> to vector<256x1xi1>
    %78 = vector.broadcast %77 : vector<256x1xi1> to vector<256x8xi1>
    %79 = vector.broadcast %cst_45 : f32 to vector<256x8xf32>
    %80 = arith.select %78, %76, %79 : vector<256x8xi1>, vector<256x8xf32>
    %81 = arith.truncf %80 : vector<256x8xf32> to vector<256x8xbf16>
    %c5 = arith.constant 5 : index
    %c0_46 = arith.constant 0 : index
    %c0_47 = arith.constant 0 : index
    %82 = vector.load %arg2[%c5, %c0_46, %c0_47] : memref<9x8x8xbf16, #tpu.memory_space<vmem>>, vector<1x8x8xbf16>
    %83 = vector.shape_cast %82 : vector<1x8x8xbf16> to vector<8x8xbf16>
    %cst_48 = arith.constant dense<0.000000e+00> : vector<256x8xf32>
    %84 = tpu.matmul %81, %83, %cst_48 {dimension_numbers = #tpu.dot_dimension_numbers<[1], [0], [0], [1], [0, 0, 1, 1], [], []>} : vector<256x8xbf16>, vector<8x8xbf16>, vector<256x8xf32> -> vector<256x8xf32>
    %85 = arith.addf %75, %84 : vector<256x8xf32>
    %c47 = arith.constant 47 : index
    %c0_49 = arith.constant 0 : index
    %86 = vector.load %arg9[%c47, %c0_49] : memref<320x8xf32, #tpu.memory_space<vmem>>, vector<256x8xf32>
    %cst_50 = arith.constant 0.000000e+00 : f32
    %87 = vector.shape_cast %18 : vector<256x1xi1> to vector<256x1xi1>
    %88 = vector.broadcast %87 : vector<256x1xi1> to vector<256x8xi1>
    %89 = vector.broadcast %cst_50 : f32 to vector<256x8xf32>
    %90 = arith.select %88, %86, %89 : vector<256x8xi1>, vector<256x8xf32>
    %91 = arith.truncf %90 : vector<256x8xf32> to vector<256x8xbf16>
    %c6 = arith.constant 6 : index
    %c0_51 = arith.constant 0 : index
    %c0_52 = arith.constant 0 : index
    %92 = vector.load %arg2[%c6, %c0_51, %c0_52] : memref<9x8x8xbf16, #tpu.memory_space<vmem>>, vector<1x8x8xbf16>
    %93 = vector.shape_cast %92 : vector<1x8x8xbf16> to vector<8x8xbf16>
    %cst_53 = arith.constant dense<0.000000e+00> : vector<256x8xf32>
    %94 = tpu.matmul %91, %93, %cst_53 {dimension_numbers = #tpu.dot_dimension_numbers<[1], [0], [0], [1], [0, 0, 1, 1], [], []>} : vector<256x8xbf16>, vector<8x8xbf16>, vector<256x8xf32> -> vector<256x8xf32>
    %95 = arith.addf %85, %94 : vector<256x8xf32>
    %c48 = arith.constant 48 : index
    %c0_54 = arith.constant 0 : index
    %96 = vector.load %arg9[%c48, %c0_54] : memref<320x8xf32, #tpu.memory_space<vmem>>, vector<256x8xf32>
    %97 = arith.truncf %96 : vector<256x8xf32> to vector<256x8xbf16>
    %c7 = arith.constant 7 : index
    %c0_55 = arith.constant 0 : index
    %c0_56 = arith.constant 0 : index
    %98 = vector.load %arg2[%c7, %c0_55, %c0_56] : memref<9x8x8xbf16, #tpu.memory_space<vmem>>, vector<1x8x8xbf16>
    %99 = vector.shape_cast %98 : vector<1x8x8xbf16> to vector<8x8xbf16>
    %cst_57 = arith.constant dense<0.000000e+00> : vector<256x8xf32>
    %100 = tpu.matmul %97, %99, %cst_57 {dimension_numbers = #tpu.dot_dimension_numbers<[1], [0], [0], [1], [0, 0, 1, 1], [], []>} : vector<256x8xbf16>, vector<8x8xbf16>, vector<256x8xf32> -> vector<256x8xf32>
    %101 = arith.addf %95, %100 : vector<256x8xf32>
    %c49 = arith.constant 49 : index
    %c0_58 = arith.constant 0 : index
    %102 = vector.load %arg9[%c49, %c0_58] : memref<320x8xf32, #tpu.memory_space<vmem>>, vector<256x8xf32>
    %cst_59 = arith.constant 0.000000e+00 : f32
    %103 = vector.shape_cast %20 : vector<256x1xi1> to vector<256x1xi1>
    %104 = vector.broadcast %103 : vector<256x1xi1> to vector<256x8xi1>
    %105 = vector.broadcast %cst_59 : f32 to vector<256x8xf32>
    %106 = arith.select %104, %102, %105 : vector<256x8xi1>, vector<256x8xf32>
    %107 = arith.truncf %106 : vector<256x8xf32> to vector<256x8xbf16>
    %c8 = arith.constant 8 : index
    %c0_60 = arith.constant 0 : index
    %c0_61 = arith.constant 0 : index
    %108 = vector.load %arg2[%c8, %c0_60, %c0_61] : memref<9x8x8xbf16, #tpu.memory_space<vmem>>, vector<1x8x8xbf16>
    %109 = vector.shape_cast %108 : vector<1x8x8xbf16> to vector<8x8xbf16>
    %cst_62 = arith.constant dense<0.000000e+00> : vector<256x8xf32>
    %110 = tpu.matmul %107, %109, %cst_62 {dimension_numbers = #tpu.dot_dimension_numbers<[1], [0], [0], [1], [0, 0, 1, 1], [], []>} : vector<256x8xbf16>, vector<8x8xbf16>, vector<256x8xf32> -> vector<256x8xf32>
    %111 = arith.addf %101, %110 : vector<256x8xf32>
    %c0_63 = arith.constant 0 : index
    %c0_64 = arith.constant 0 : index
    %112 = vector.load %arg3[%c0_63, %c0_64] : memref<1x8xf32, #tpu.memory_space<vmem>>, vector<1x8xf32>
    %113 = vector.shape_cast %112 : vector<1x8xf32> to vector<8xf32>
    %114 = vector.shape_cast %113 : vector<8xf32> to vector<1x8xf32>
    %115 = vector.broadcast %114 : vector<1x8xf32> to vector<256x8xf32>
    %116 = arith.mulf %111, %115 : vector<256x8xf32>
    %c0_65 = arith.constant 0 : index
    %c0_66 = arith.constant 0 : index
    %117 = vector.load %arg4[%c0_65, %c0_66] : memref<1x8xf32, #tpu.memory_space<vmem>>, vector<1x8xf32>
    %118 = vector.shape_cast %117 : vector<1x8xf32> to vector<8xf32>
    %119 = vector.shape_cast %118 : vector<8xf32> to vector<1x8xf32>
    %120 = vector.broadcast %119 : vector<1x8xf32> to vector<256x8xf32>
    %121 = arith.addf %116, %120 : vector<256x8xf32>
    %cst_67 = arith.constant 0.000000e+00 : f32
    %122 = vector.broadcast %cst_67 : f32 to vector<256x8xf32>
    %123 = arith.maximumf %121, %122 : vector<256x8xf32>
    %c32_68 = arith.constant 32 : index
    %c0_69 = arith.constant 0 : index
    %124 = vector.load %arg10[%c32_68, %c0_69] : memref<320x8xf32, #tpu.memory_space<vmem>>, vector<256x8xf32>
    tpu.vector_store %arg10[%c32_68, %c0_69], %123 {strides = array<i32>} : memref<320x8xf32, #tpu.memory_space<vmem>>, vector<256x8xf32>,
    %cst_70 = arith.constant 0.000000e+00 : f32
    %125 = vector.broadcast %cst_70 : f32 to vector<256x8xf32>
    %c15_71 = arith.constant 15 : index
    %c0_72 = arith.constant 0 : index
    %126 = vector.load %arg10[%c15_71, %c0_72] : memref<320x8xf32, #tpu.memory_space<vmem>>, vector<256x8xf32>
    %cst_73 = arith.constant 0.000000e+00 : f32
    %127 = vector.shape_cast %18 : vector<256x1xi1> to vector<256x1xi1>
    %128 = vector.broadcast %127 : vector<256x1xi1> to vector<256x8xi1>
    %129 = vector.broadcast %cst_73 : f32 to vector<256x8xf32>
    %130 = arith.select %128, %126, %129 : vector<256x8xi1>, vector<256x8xf32>
    %131 = arith.truncf %130 : vector<256x8xf32> to vector<256x8xbf16>
    %c0_74 = arith.constant 0 : index
    %c0_75 = arith.constant 0 : index
    %c0_76 = arith.constant 0 : index
    %132 = vector.load %arg5[%c0_74, %c0_75, %c0_76] : memref<9x8x8xbf16, #tpu.memory_space<vmem>>, vector<1x8x8xbf16>
    %133 = vector.shape_cast %132 : vector<1x8x8xbf16> to vector<8x8xbf16>
    %cst_77 = arith.constant dense<0.000000e+00> : vector<256x8xf32>
    %134 = tpu.matmul %131, %133, %cst_77 {dimension_numbers = #tpu.dot_dimension_numbers<[1], [0], [0], [1], [0, 0, 1, 1], [], []>} : vector<256x8xbf16>, vector<8x8xbf16>, vector<256x8xf32> -> vector<256x8xf32>
    %135 = arith.addf %125, %134 : vector<256x8xf32>
    %c16_78 = arith.constant 16 : index
    %c0_79 = arith.constant 0 : index
    %136 = vector.load %arg10[%c16_78, %c0_79] : memref<320x8xf32, #tpu.memory_space<vmem>>, vector<256x8xf32>
    %137 = arith.truncf %136 : vector<256x8xf32> to vector<256x8xbf16>
    %c1_80 = arith.constant 1 : index
    %c0_81 = arith.constant 0 : index
    %c0_82 = arith.constant 0 : index
    %138 = vector.load %arg5[%c1_80, %c0_81, %c0_82] : memref<9x8x8xbf16, #tpu.memory_space<vmem>>, vector<1x8x8xbf16>
    %139 = vector.shape_cast %138 : vector<1x8x8xbf16> to vector<8x8xbf16>
    %cst_83 = arith.constant dense<0.000000e+00> : vector<256x8xf32>
    %140 = tpu.matmul %137, %139, %cst_83 {dimension_numbers = #tpu.dot_dimension_numbers<[1], [0], [0], [1], [0, 0, 1, 1], [], []>} : vector<256x8xbf16>, vector<8x8xbf16>, vector<256x8xf32> -> vector<256x8xf32>
    %141 = arith.addf %135, %140 : vector<256x8xf32>
    %c17_84 = arith.constant 17 : index
    %c0_85 = arith.constant 0 : index
    %142 = vector.load %arg10[%c17_84, %c0_85] : memref<320x8xf32, #tpu.memory_space<vmem>>, vector<256x8xf32>
    %cst_86 = arith.constant 0.000000e+00 : f32
    %143 = vector.shape_cast %20 : vector<256x1xi1> to vector<256x1xi1>
    %144 = vector.broadcast %143 : vector<256x1xi1> to vector<256x8xi1>
    %145 = vector.broadcast %cst_86 : f32 to vector<256x8xf32>
    %146 = arith.select %144, %142, %145 : vector<256x8xi1>, vector<256x8xf32>
    %147 = arith.truncf %146 : vector<256x8xf32> to vector<256x8xbf16>
    %c2_87 = arith.constant 2 : index
    %c0_88 = arith.constant 0 : index
    %c0_89 = arith.constant 0 : index
    %148 = vector.load %arg5[%c2_87, %c0_88, %c0_89] : memref<9x8x8xbf16, #tpu.memory_space<vmem>>, vector<1x8x8xbf16>
    %149 = vector.shape_cast %148 : vector<1x8x8xbf16> to vector<8x8xbf16>
    %cst_90 = arith.constant dense<0.000000e+00> : vector<256x8xf32>
    %150 = tpu.matmul %147, %149, %cst_90 {dimension_numbers = #tpu.dot_dimension_numbers<[1], [0], [0], [1], [0, 0, 1, 1], [], []>} : vector<256x8xbf16>, vector<8x8xbf16>, vector<256x8xf32> -> vector<256x8xf32>
    %151 = arith.addf %141, %150 : vector<256x8xf32>
    %c31_91 = arith.constant 31 : index
    %c0_92 = arith.constant 0 : index
    %152 = vector.load %arg10[%c31_91, %c0_92] : memref<320x8xf32, #tpu.memory_space<vmem>>, vector<256x8xf32>
    %cst_93 = arith.constant 0.000000e+00 : f32
    %153 = vector.shape_cast %18 : vector<256x1xi1> to vector<256x1xi1>
    %154 = vector.broadcast %153 : vector<256x1xi1> to vector<256x8xi1>
    %155 = vector.broadcast %cst_93 : f32 to vector<256x8xf32>
    %156 = arith.select %154, %152, %155 : vector<256x8xi1>, vector<256x8xf32>
    %157 = arith.truncf %156 : vector<256x8xf32> to vector<256x8xbf16>
    %c3_94 = arith.constant 3 : index
    %c0_95 = arith.constant 0 : index
    %c0_96 = arith.constant 0 : index
    %158 = vector.load %arg5[%c3_94, %c0_95, %c0_96] : memref<9x8x8xbf16, #tpu.memory_space<vmem>>, vector<1x8x8xbf16>
    %159 = vector.shape_cast %158 : vector<1x8x8xbf16> to vector<8x8xbf16>
    %cst_97 = arith.constant dense<0.000000e+00> : vector<256x8xf32>
    %160 = tpu.matmul %157, %159, %cst_97 {dimension_numbers = #tpu.dot_dimension_numbers<[1], [0], [0], [1], [0, 0, 1, 1], [], []>} : vector<256x8xbf16>, vector<8x8xbf16>, vector<256x8xf32> -> vector<256x8xf32>
    %161 = arith.addf %151, %160 : vector<256x8xf32>
    %c32_98 = arith.constant 32 : index
    %c0_99 = arith.constant 0 : index
    %162 = vector.load %arg10[%c32_98, %c0_99] : memref<320x8xf32, #tpu.memory_space<vmem>>, vector<256x8xf32>
    %163 = arith.truncf %162 : vector<256x8xf32> to vector<256x8xbf16>
    %c4_100 = arith.constant 4 : index
    %c0_101 = arith.constant 0 : index
    %c0_102 = arith.constant 0 : index
    %164 = vector.load %arg5[%c4_100, %c0_101, %c0_102] : memref<9x8x8xbf16, #tpu.memory_space<vmem>>, vector<1x8x8xbf16>
    %165 = vector.shape_cast %164 : vector<1x8x8xbf16> to vector<8x8xbf16>
    %cst_103 = arith.constant dense<0.000000e+00> : vector<256x8xf32>
    %166 = tpu.matmul %163, %165, %cst_103 {dimension_numbers = #tpu.dot_dimension_numbers<[1], [0], [0], [1], [0, 0, 1, 1], [], []>} : vector<256x8xbf16>, vector<8x8xbf16>, vector<256x8xf32> -> vector<256x8xf32>
    %167 = arith.addf %161, %166 : vector<256x8xf32>
    %c33_104 = arith.constant 33 : index
    %c0_105 = arith.constant 0 : index
    %168 = vector.load %arg10[%c33_104, %c0_105] : memref<320x8xf32, #tpu.memory_space<vmem>>, vector<256x8xf32>
    %cst_106 = arith.constant 0.000000e+00 : f32
    %169 = vector.shape_cast %20 : vector<256x1xi1> to vector<256x1xi1>
    %170 = vector.broadcast %169 : vector<256x1xi1> to vector<256x8xi1>
    %171 = vector.broadcast %cst_106 : f32 to vector<256x8xf32>
    %172 = arith.select %170, %168, %171 : vector<256x8xi1>, vector<256x8xf32>
    %173 = arith.truncf %172 : vector<256x8xf32> to vector<256x8xbf16>
    %c5_107 = arith.constant 5 : index
    %c0_108 = arith.constant 0 : index
    %c0_109 = arith.constant 0 : index
    %174 = vector.load %arg5[%c5_107, %c0_108, %c0_109] : memref<9x8x8xbf16, #tpu.memory_space<vmem>>, vector<1x8x8xbf16>
    %175 = vector.shape_cast %174 : vector<1x8x8xbf16> to vector<8x8xbf16>
    %cst_110 = arith.constant dense<0.000000e+00> : vector<256x8xf32>
    %176 = tpu.matmul %173, %175, %cst_110 {dimension_numbers = #tpu.dot_dimension_numbers<[1], [0], [0], [1], [0, 0, 1, 1], [], []>} : vector<256x8xbf16>, vector<8x8xbf16>, vector<256x8xf32> -> vector<256x8xf32>
    %177 = arith.addf %167, %176 : vector<256x8xf32>
    %c47_111 = arith.constant 47 : index
    %c0_112 = arith.constant 0 : index
    %178 = vector.load %arg10[%c47_111, %c0_112] : memref<320x8xf32, #tpu.memory_space<vmem>>, vector<256x8xf32>
    %cst_113 = arith.constant 0.000000e+00 : f32
    %179 = vector.shape_cast %18 : vector<256x1xi1> to vector<256x1xi1>
    %180 = vector.broadcast %179 : vector<256x1xi1> to vector<256x8xi1>
    %181 = vector.broadcast %cst_113 : f32 to vector<256x8xf32>
    %182 = arith.select %180, %178, %181 : vector<256x8xi1>, vector<256x8xf32>
    %183 = arith.truncf %182 : vector<256x8xf32> to vector<256x8xbf16>
    %c6_114 = arith.constant 6 : index
    %c0_115 = arith.constant 0 : index
    %c0_116 = arith.constant 0 : index
    %184 = vector.load %arg5[%c6_114, %c0_115, %c0_116] : memref<9x8x8xbf16, #tpu.memory_space<vmem>>, vector<1x8x8xbf16>
    %185 = vector.shape_cast %184 : vector<1x8x8xbf16> to vector<8x8xbf16>
    %cst_117 = arith.constant dense<0.000000e+00> : vector<256x8xf32>
    %186 = tpu.matmul %183, %185, %cst_117 {dimension_numbers = #tpu.dot_dimension_numbers<[1], [0], [0], [1], [0, 0, 1, 1], [], []>} : vector<256x8xbf16>, vector<8x8xbf16>, vector<256x8xf32> -> vector<256x8xf32>
    %187 = arith.addf %177, %186 : vector<256x8xf32>
    %c48_118 = arith.constant 48 : index
    %c0_119 = arith.constant 0 : index
    %188 = vector.load %arg10[%c48_118, %c0_119] : memref<320x8xf32, #tpu.memory_space<vmem>>, vector<256x8xf32>
    %189 = arith.truncf %188 : vector<256x8xf32> to vector<256x8xbf16>
    %c7_120 = arith.constant 7 : index
    %c0_121 = arith.constant 0 : index
    %c0_122 = arith.constant 0 : index
    %190 = vector.load %arg5[%c7_120, %c0_121, %c0_122] : memref<9x8x8xbf16, #tpu.memory_space<vmem>>, vector<1x8x8xbf16>
    %191 = vector.shape_cast %190 : vector<1x8x8xbf16> to vector<8x8xbf16>
    %cst_123 = arith.constant dense<0.000000e+00> : vector<256x8xf32>
    %192 = tpu.matmul %189, %191, %cst_123 {dimension_numbers = #tpu.dot_dimension_numbers<[1], [0], [0], [1], [0, 0, 1, 1], [], []>} : vector<256x8xbf16>, vector<8x8xbf16>, vector<256x8xf32> -> vector<256x8xf32>
    %193 = arith.addf %187, %192 : vector<256x8xf32>
    %c49_124 = arith.constant 49 : index
    %c0_125 = arith.constant 0 : index
    %194 = vector.load %arg10[%c49_124, %c0_125] : memref<320x8xf32, #tpu.memory_space<vmem>>, vector<256x8xf32>
    %cst_126 = arith.constant 0.000000e+00 : f32
    %195 = vector.shape_cast %20 : vector<256x1xi1> to vector<256x1xi1>
    %196 = vector.broadcast %195 : vector<256x1xi1> to vector<256x8xi1>
    %197 = vector.broadcast %cst_126 : f32 to vector<256x8xf32>
    %198 = arith.select %196, %194, %197 : vector<256x8xi1>, vector<256x8xf32>
    %199 = arith.truncf %198 : vector<256x8xf32> to vector<256x8xbf16>
    %c8_127 = arith.constant 8 : index
    %c0_128 = arith.constant 0 : index
    %c0_129 = arith.constant 0 : index
    %200 = vector.load %arg5[%c8_127, %c0_128, %c0_129] : memref<9x8x8xbf16, #tpu.memory_space<vmem>>, vector<1x8x8xbf16>
    %201 = vector.shape_cast %200 : vector<1x8x8xbf16> to vector<8x8xbf16>
    %cst_130 = arith.constant dense<0.000000e+00> : vector<256x8xf32>
    %202 = tpu.matmul %199, %201, %cst_130 {dimension_numbers = #tpu.dot_dimension_numbers<[1], [0], [0], [1], [0, 0, 1, 1], [], []>} : vector<256x8xbf16>, vector<8x8xbf16>, vector<256x8xf32> -> vector<256x8xf32>
    %203 = arith.addf %193, %202 : vector<256x8xf32>
    %c0_131 = arith.constant 0 : index
    %c0_132 = arith.constant 0 : index
    %204 = vector.load %arg6[%c0_131, %c0_132] : memref<1x8xf32, #tpu.memory_space<vmem>>, vector<1x8xf32>
    %205 = vector.shape_cast %204 : vector<1x8xf32> to vector<8xf32>
    %206 = vector.shape_cast %205 : vector<8xf32> to vector<1x8xf32>
    %207 = vector.broadcast %206 : vector<1x8xf32> to vector<256x8xf32>
    %208 = arith.mulf %203, %207 : vector<256x8xf32>
    %c0_133 = arith.constant 0 : index
    %c0_134 = arith.constant 0 : index
    %209 = vector.load %arg7[%c0_133, %c0_134] : memref<1x8xf32, #tpu.memory_space<vmem>>, vector<1x8xf32>
    %210 = vector.shape_cast %209 : vector<1x8xf32> to vector<8xf32>
    %211 = vector.shape_cast %210 : vector<8xf32> to vector<1x8xf32>
    %212 = vector.broadcast %211 : vector<1x8xf32> to vector<256x8xf32>
    %213 = arith.addf %208, %212 : vector<256x8xf32>
    %214 = arith.addf %213, %31 : vector<256x8xf32>
    %cst_135 = arith.constant 0.000000e+00 : f32
    %215 = vector.broadcast %cst_135 : f32 to vector<256x8xf32>
    %216 = arith.maximumf %214, %215 : vector<256x8xf32>
    %217 = vector.shape_cast %216 : vector<256x8xf32> to vector<1x16x16x8xf32>
    %c0_136 = arith.constant 0 : index
    %c0_137 = arith.constant 0 : index
    %c0_138 = arith.constant 0 : index
    %c0_139 = arith.constant 0 : index
    %218 = vector.load %arg8[%c0_136, %c0_137, %c0_138, %c0_139] : memref<1x16x16x8xf32, #tpu.memory_space<vmem>>, vector<1x16x16x8xf32>
    tpu.vector_store %arg8[%c0_136, %c0_137, %c0_138, %c0_139], %217 {strides = array<i32>} : memref<1x16x16x8xf32, #tpu.memory_space<vmem>>, vector<1x16x16x8xf32>,
    return
  }
  func.func @transform_0(%arg0: i32) -> (i32, i32, i32, i32) {
    %c0_i32 = arith.constant 0 : i32
    %c0_i32_0 = arith.constant 0 : i32
    %c0_i32_1 = arith.constant 0 : i32
    %c0_i32_2 = arith.constant 0 : i32
    return %arg0, %c0_i32, %c0_i32_0, %c0_i32_1 : i32, i32, i32, i32
  }
  func.func @transform_1(%arg0: i32) -> (i32, i32, i32) {
    %c0_i32 = arith.constant 0 : i32
    %c0_i32_0 = arith.constant 0 : i32
    %c0_i32_1 = arith.constant 0 : i32
    %c0_i32_2 = arith.constant 0 : i32
    return %c0_i32, %c0_i32_0, %c0_i32_1 : i32, i32, i32
  }
  func.func @transform_2(%arg0: i32) -> (i32, i32) {
    %c0_i32 = arith.constant 0 : i32
    %c0_i32_0 = arith.constant 0 : i32
    %c0_i32_1 = arith.constant 0 : i32
    return %c0_i32, %c0_i32_0 : i32, i32
  }
  func.func @transform_3(%arg0: i32) -> (i32, i32) {
    %c0_i32 = arith.constant 0 : i32
    %c0_i32_0 = arith.constant 0 : i32
    %c0_i32_1 = arith.constant 0 : i32
    return %c0_i32, %c0_i32_0 : i32, i32
  }
  func.func @transform_4(%arg0: i32) -> (i32, i32, i32) {
    %c0_i32 = arith.constant 0 : i32
    %c0_i32_0 = arith.constant 0 : i32
    %c0_i32_1 = arith.constant 0 : i32
    %c0_i32_2 = arith.constant 0 : i32
    return %c0_i32, %c0_i32_0, %c0_i32_1 : i32, i32, i32
  }
  func.func @transform_5(%arg0: i32) -> (i32, i32) {
    %c0_i32 = arith.constant 0 : i32
    %c0_i32_0 = arith.constant 0 : i32
    %c0_i32_1 = arith.constant 0 : i32
    return %c0_i32, %c0_i32_0 : i32, i32
  }
  func.func @transform_6(%arg0: i32) -> (i32, i32) {
    %c0_i32 = arith.constant 0 : i32
    %c0_i32_0 = arith.constant 0 : i32
    %c0_i32_1 = arith.constant 0 : i32
    return %c0_i32, %c0_i32_0 : i32, i32
  }
  func.func @transform_7(%arg0: i32) -> (i32, i32, i32, i32) {
    %c0_i32 = arith.constant 0 : i32
    %c0_i32_0 = arith.constant 0 : i32
    %c0_i32_1 = arith.constant 0 : i32
    %c0_i32_2 = arith.constant 0 : i32
    return %arg0, %c0_i32, %c0_i32_0, %c0_i32_1 : i32, i32, i32, i32
  }
}

</mosaic_0001>

<bundles_post_ra>
// kernel: tpu_custom_call.1
= control target key start
LH: loop header
LB: loop body
LE: loop exit
PB: predicated region body
PF: predicated region fallthrough
CT: control target
= control target key end

     0   :  { %s5971_s24 = smov 0   ;;  %s8604_s0 = inlined_call_operand.vmem [shape: f32[2,16,16,8], index: 0, kind: input, shape index: {}]   ;;  %s8605_s1 = inlined_call_operand.vmem [shape: bf16[9,8,8], index: 1, kind: input, shape index: {}]   ;;  %s8606_s2 = inlined_call_operand.vmem [shape: f32[1,8], index: 2, kind: input, shape index: {}]   ;;  %s8607_s3 = inlined_call_operand.vmem [shape: f32[1,8], index: 3, kind: input, shape index: {}]   ;;  %s8608_s4 = inlined_call_operand.vmem [shape: bf16[9,8,8], index: 4, kind: input, shape index: {}]   ;;  %s8609_s5 = inlined_call_operand.vmem [shape: f32[1,8], index: 5, kind: input, shape index: {}]   ;;  %s8610_s6 = inlined_call_operand.vmem [shape: f32[1,8], index: 6, kind: input, shape index: {}]   ;;  %s8611_s7 = inlined_call_operand.vmem [shape: f32[2,16,16,8], index: 7, kind: output, shape index: {}]  }
   0x1 LB: > { %s5580_s25 = sadd.s32 4294967295, %s5928_s24   ;;  %p5584_p0 = scmp.ge.s32.totalorder %s5928_s24, 1  ;;  %s5928_s24 = sphi %s5971_s24, %s17_s24  }
   0x2   : > { %p237_p1 = scmp.lt.s32.totalorder %s5928_s24, 3 }
   0x4   : > { %p238_p2 = pnand %p5584_p0, %p237_p1 }
   0x6   : > { %241 = sbr.rel (%p238_p2) target bundleno = 1469 (0x5bd), region = 48 }
   0xb   : > { %v5589_v0 = vld [vmem:[%s8605_s1 + $0x4] sm:$0xf]  ;;  %vm8636_vm0 = vcmask 1043456   ;;  %vm8661_vm1 = vcmask 64512   ;;  %p5982_p3 = scmp.lt.s32.totalorder %s5580_s25, 1  ;;  %v5930_v4 = vmov 0.0   ;;  %v280_v7 = vlaneseq }
   0xc   : > { %v1087_v1 = vsel %vm8636_vm0, %v5589_v0, 0  ;;  %v986_v2 = vld [vmem:[%s8605_s1] sm:$0xf]  ;;  %v5622_v3 = vld [vmem:[%s8605_s1 + $0x8] sm:$0xf]  ;;  %764 = vst.msk [vmem:[#allocation2 + $0x10] sm:$0xff] %vm8661_vm1, %v5930_v4 }
   0xd   : > { %1096 = vmatpush.bf16.msra.mxu0 %v1087_v1  ;;  %5897 = vmatpush.bf16.msra.mxu2 %v1087_v1  ;;  %v1227_v5 = vsel %vm8636_vm0, %v986_v2, 0  ;;  %v1513_v6 = vsel %vm8636_vm0, %v5622_v3, 0  ;;  %765 = vst.msk [vmem:[#allocation2 + $0x18] sm:$0xff] %vm8661_vm1, %v5930_v4  ;;  %v5639_v8 = vld [vmem:[%s8605_s1 + $0xc] sm:$0xf]  ;;  %s9483_s25 = smov (!%p5982_p3, %s5580_s25), 1 }
   0xe   : > { %5898 = vmatpush.bf16.msra.mxu3 %v1227_v5  ;;  %1236 = vmatpush.bf16.msra.mxu1 %v1227_v5  ;;  %v5656_v9 = vld [vmem:[%s8605_s1 + $0x10] sm:$0xf]  ;;  %v1767_v10 = vsel %vm8636_vm0, %v5639_v8, 0  ;;  %v6009_v12 = vshrl.u32 %v280_v7, 7  ;;  %763 = vst.msk [vmem:[#allocation2 + $0x8] sm:$0xff] %vm8661_vm1, %v5930_v4  ;;  %s5895_s14 = sshll.u32 %s9483_s25, 8 }
   0xf   : > { %v1989_v11 = vsel %vm8636_vm0, %v5656_v9, 0  ;;  %766 = vst.msk [vmem:[#allocation2 + $0x120] sm:$0xff] %vm8661_vm1, %v5930_v4  ;;  %s6023_s17 = scalar_lea.vmem %s8604_s0, %s5895_s14  ;;  %v8794_v17 = vmov 0  ;;  %v8807_v37 = vmov 0  ;;  %v8811_v41 = vmov 0  ;;  %s8333_s18 = scalar_lea.vmem %s8611_s7, %s5895_s14 }
  0x10   : > { %v317_v13 = vand.u32 15, %v6009_v12  ;;  %767 = vst.msk [vmem:[#allocation2 + $0x128] sm:$0xff] %vm8661_vm1, %v5930_v4  ;;  %v6034_v19 = vld [vmem:[%s6023_s17 + $0x70] sm:$0xff]  ;;  %v6038_v21 = vld [vmem:[%s6023_s17 + $0x78] sm:$0xff]  ;;  %v297_v23 = vadd.s32 128, %v6009_v12  ;;  %v6045_v24 = vld [vmem:[%s6023_s17 + $0x68] sm:$0xff] }
  0x11   : > { %1522 = vmatpush.bf16.msrb.mxu2 %v1513_v6  ;;  %1998 = vmatpush.bf16.msrb.mxu0 %v1989_v11  ;;  %768 = vst.msk [vmem:[#allocation2 + $0x130] sm:$0xff] %vm8661_vm1, %v5930_v4  ;;  %v6050_v26 = vld [vmem:[%s6023_s17] sm:$0xff]  ;;  %v283_v27 = vadd.s32 16, %v6009_v12  ;;  %v6057_v28 = vld [vmem:[%s6023_s17 + $0x8] sm:$0xff]  ;;  %v6072_v33 = vld [vmem:[%s6023_s17 + $0x10] sm:$0xff]  ;;  %v299_v49 = vadd.s32 144, %v6009_v12 }
  0x12   : > { %1776 = vmatpush.bf16.msrb.mxu3 %v1767_v10  ;;  %771 = vst.msk [vmem:[#allocation3 + $0x8] sm:$0xff] %vm8661_vm1, %v5930_v4  ;;  %vm6026_vm2 = vcmp.ne.s32.totalorder %v317_v13, 0  ;;  %v6062_v29 = vld [vmem:[%s6023_s17 + $0x80] sm:$0xff]  ;;  %v429_v30 = vand.u32 15, %v297_v23  ;;  %v6067_v31 = vld [vmem:[%s6023_s17 + $0x88] sm:$0xff]  ;;  %v6077_v34 = vld [vmem:[%s6023_s17 + $0x18] sm:$0xff] }
  0x13   : > { %v987_v14 = vld [vmem:[#allocation2 + $0x10] sm:$0xff]  ;;  %772 = vst.msk [vmem:[#allocation3 + $0x10] sm:$0xff] %vm8661_vm1, %v5930_v4  ;;  %v8795_v17 = vsel %vm6026_vm2, 4294967295, %v8794_v17  ;;  %v331_v32 = vand.u32 15, %v283_v27  ;;  %v6091_v38 = vld [vmem:[%s6023_s17 + $0x98] sm:$0xff]  ;;  %v6124_v52 = vld [vmem:[%s6023_s17 + $0x20] sm:$0xff] }
  0x14   : > { %v988_v15 = vld [vmem:[#allocation2 + $0x18] sm:$0xff]  ;;  %8796 = vst [vmem:[#allocation4_spill] sm:$0xff] %v8795_v17  ;;  %v6082_v35 = vld [vmem:[%s6023_s17 + $0x90] sm:$0xff]  ;;  %vm6084_vm3 = vcmp.ne.s32.totalorder %v429_v30, 0  ;;  %v6129_v54 = vld [vmem:[%s6023_s17 + $0x28] sm:$0xff]  ;;  %v443_v57 = vand.u32 15, %v299_v49 }
  0x15   : > { %v1019_v16 = vpack.c.bf16 %v988_v15, %v987_v14  ;;  %773 = vst.msk [vmem:[#allocation3 + $0x18] sm:$0xff] %vm8661_vm1, %v5930_v4  ;;  %v843_v18 = vld [vmem:[#allocation2 + $0x17] sm:$0xff]  ;;  %v842_v20 = vld [vmem:[#allocation2 + $0xf] sm:$0xff]  ;;  %v8808_v37 = vsel %vm6084_vm3, 4294967295, %v8807_v37  ;;  %vm6095_vm4 = vcmp.ne.s32.totalorder %v331_v32, 0  ;;  %v6140_v56 = vld [vmem:[%s6023_s17 + $0xa0] sm:$0xff] }
  0x16   : > { %774 = vst.msk [vmem:[#allocation3 + $0x120] sm:$0xff] %vm8661_vm1, %v5930_v4  ;;  %v938_v22 = vsel %vm6026_vm2, %v842_v20, 0.0  ;;  %v8812_v41 = vsel %vm6095_vm4, 4294967295, %v8811_v41  ;;  %v285_v58 = vadd.s32 32, %v6009_v12  ;;  %v6144_v59 = vld [vmem:[%s6023_s17 + $0xa8] sm:$0xff]  ;;  %vm6151_vm5 = vcmp.ne.s32.totalorder %v443_v57, 0 }
  0x17   : > { %5590 = vmatmul.msk.bf16.vlgmr.msra.gmra.mxu0 %vm8661_vm1, %v1019_v16  ;;  %8797 = vst [vmem:[#allocation5_spill] sm:$0xff] %v6034_v19  ;;  %v970_v25 = vpack.c.bf16 %v843_v18, %v938_v22  ;;  %v8818_v60 = vmov 0  ;;  %v8821_v6 = vmov 0  ;;  %v301_v13 = vadd.s32 160, %v6009_v12  ;;  %v6182_v14 = vld [vmem:[%s6023_s17 + $0x30] sm:$0xff]  ;;  %v6185_v15 = vld [vmem:[%s6023_s17 + $0x38] sm:$0xff] }
  0x18   : > { %775 = vst.msk [vmem:[#allocation3 + $0x128] sm:$0xff] %vm8661_vm1, %v5930_v4  ;;  %v8819_v60 = vsel %vm6151_vm5, 4294967295, %v8818_v60  ;;  %v345_v62 = vand.u32 15, %v285_v58  ;;  %v6196_v18 = vld [vmem:[%s6023_s17 + $0xb0] sm:$0xff]  ;;  %v6199_v20 = vld [vmem:[%s6023_s17 + $0xb8] sm:$0xff]  ;;  %v287_v23 = vadd.s32 48, %v6009_v12 }
  0x19   : > { %8798 = vst [vmem:[#allocation6_spill] sm:$0xff] %v6038_v21  ;;  %5606 = vmatmul.msk.bf16.vlgmr.msra.gmra.mxu1 %vm8661_vm1, %v970_v25  ;;  %v457_v22 = vand.u32 15, %v301_v13  ;;  %v8828_v25 = vmov 0  ;;  %v8830_v49 = vmov 0  ;;  %v289_v13 = vadd.s32 64, %v6009_v12 }
  0x1a   : > { %776 = vst.msk [vmem:[#allocation3 + $0x130] sm:$0xff] %vm8661_vm1, %v5930_v4  ;;  %vm6164_vm6 = vcmp.ne.s32.totalorder %v345_v62, 0  ;;  %v359_v30 = vand.u32 15, %v287_v23 }
  0x1b   : > { %8799 = vst [vmem:[#allocation7_spill] sm:$0xff] %v6045_v24  ;;  %v8822_v6 = vsel %vm6164_vm6, 4294967295, %v8821_v6  ;;  %vm6207_vm7 = vcmp.ne.s32.totalorder %v457_v22, 0  ;;  %v373_v23 = vand.u32 15, %v289_v13 }
  0x1c   : > { %824 = vst.msk [vmem:[#allocation2 + $0x90] sm:$0xff] %vm8661_vm1, %v6034_v19  ;;  %v8829_v25 = vsel %vm6207_vm7, 4294967295, %v8828_v25  ;;  %vm6220_vm8 = vcmp.ne.s32.totalorder %v359_v30, 0 }
  0x1d   : > { %8800 = vst [vmem:[#allocation8_spill] sm:$0xff] %v6050_v26  ;;  %v8831_v49 = vsel %vm6220_vm8, 4294967295, %v8830_v49  ;;  %vm6271_vm10 = vcmp.ne.s32.totalorder %v373_v23, 0  ;;  %v305_v23 = vadd.s32 192, %v6009_v12 }
  0x1e   : > { %825 = vst.msk [vmem:[#allocation2 + $0x98] sm:$0xff] %vm8661_vm1, %v6038_v21 }
  0x1f   : > { %8801 = vst [vmem:[#allocation9_spill] sm:$0xff] %v6057_v28 }
  0x20   : > { %823 = vst.msk [vmem:[#allocation2 + $0x88] sm:$0xff] %vm8661_vm1, %v6045_v24 }
  0x21   : > { %8802 = vst [vmem:[#allocation10_spill] sm:$0xff] %v6062_v29 }
  0x22   : > { %810 = vst.msk [vmem:[#allocation2 + $0x20] sm:$0xff] %vm8661_vm1, %v6050_v26 }
  0x23   : > { %8803 = vst [vmem:[#allocation11_spill] sm:$0xff] %v6067_v31  ;;  %v1003_v36 = vld [vmem:[#allocation2 + $0x90] sm:$0xff] }
  0x24   : > { %811 = vst.msk [vmem:[#allocation2 + $0x28] sm:$0xff] %vm8661_vm1, %v6057_v28 }
  0x25   : > { %8804 = vst [vmem:[#allocation12_spill] sm:$0xff] %v6072_v33  ;;  %v1004_v39 = vld [vmem:[#allocation2 + $0x98] sm:$0xff] }
  0x26   : > { %826 = vst.msk [vmem:[#allocation2 + $0xa0] sm:$0xff] %vm8661_vm1, %v6062_v29  ;;  %v6093_v40 = vld [vmem:[#allocation2 + $0x97] sm:$0xff]  ;;  %v6101_v42 = vpack.c.bf16 %v1004_v39, %v1003_v36 }
  0x27   : > { %8805 = vst [vmem:[#allocation13_spill] sm:$0xff] %v6077_v34  ;;  %v6103_v43 = vld [vmem:[#allocation2 + $0x8f] sm:$0xff] }
  0x28   : > { %827 = vst.msk [vmem:[#allocation2 + $0xa8] sm:$0xff] %vm8661_vm1, %v6067_v31  ;;  %v954_v44 = vsel %vm6084_vm3, %v6103_v43, 0.0  ;;  %5598 = vmatmul.msk.bf16.vlgmr.msra.gmra.mxu2 %vm8661_vm1, %v6101_v42 }
  0x29   : > { %8806 = vst [vmem:[#allocation14_spill] sm:$0xff] %v6082_v35  ;;  %v989_v45 = vld [vmem:[#allocation2 + $0x20] sm:$0xff]  ;;  %v978_v47 = vpack.c.bf16 %v6093_v40, %v954_v44 }
  0x2a   : > { %8809 = vst [vmem:[#allocation15_spill] sm:$0xff] %v8808_v37  ;;  %v6110_v46 = vld [vmem:[#allocation2 + $0x1f] sm:$0xff]  ;;  %v302_v37 = vadd.s32 168, %v6009_v12 }
  0x2b   : > { %812 = vst.msk [vmem:[#allocation2 + $0x30] sm:$0xff] %vm8661_vm1, %v6072_v33  ;;  %v990_v48 = vld [vmem:[#allocation2 + $0x28] sm:$0xff]  ;;  %v940_v51 = vsel %vm6095_vm4, %v6110_v46, 0.0  ;;  %5614 = vmatmul.msk.bf16.vlgmr.msra.gmra.mxu3 %vm8661_vm1, %v978_v47 }
  0x2c   : > { %8810 = vst [vmem:[#allocation16_spill] sm:$0xff] %v6091_v38  ;;  %v6118_v50 = vld [vmem:[#allocation2 + $0x27] sm:$0xff]  ;;  %v6126_v53 = vpack.c.bf16 %v990_v48, %v989_v45 }
  0x2d   : > { %8813 = vst [vmem:[#allocation17_spill] sm:$0xff] %v8812_v41  ;;  %v971_v55 = vpack.c.bf16 %v6118_v50, %v940_v51  ;;  %v6155_v61 = vld [vmem:[#allocation2 + $0x9f] sm:$0xff] }
  0x2e   : > { %813 = vst.msk [vmem:[#allocation2 + $0x38] sm:$0xff] %vm8661_vm1, %v6077_v34  ;;  %5591 = vmatmul.msk.bf16.gmra.mxu0 %vm8661_vm1, %v6126_v53  ;;  %v1005_v63 = vld [vmem:[#allocation2 + $0xa0] sm:$0xff]  ;;  %v956_v2 = vsel %vm6151_vm5, %v6155_v61, 0.0 }
  0x2f   : > { %828 = vst.msk [vmem:[#allocation2 + $0xb0] sm:$0xff] %vm8661_vm1, %v6082_v35  ;;  %5607 = vmatmul.msk.bf16.gmra.mxu1 %vm8661_vm1, %v971_v55  ;;  %v1006_v0 = vld [vmem:[#allocation2 + $0xa8] sm:$0xff] }
  0x30   : > { %829 = vst.msk [vmem:[#allocation2 + $0xb8] sm:$0xff] %vm8661_vm1, %v6091_v38  ;;  %v6157_v1 = vld [vmem:[#allocation2 + $0xa7] sm:$0xff]  ;;  %v6162_v3 = vpack.c.bf16 %v1006_v0, %v1005_v63  ;;  %v303_v63 = vadd.s32 176, %v6009_v12 }
  0x31   : > { %8814 = vst [vmem:[#allocation18_spill] sm:$0xff] %v6124_v52  ;;  %v979_v8 = vpack.c.bf16 %v6157_v1, %v956_v2  ;;  %v6238_v0 = vld [vmem:[%s6023_s17 + $0x40] sm:$0xff]  ;;  %v6241_v2 = vld [vmem:[%s6023_s17 + $0x48] sm:$0xff] }
  0x32   : > { %8815 = vst [vmem:[#allocation19_spill] sm:$0xff] %v6129_v54  ;;  %v991_v4 = vld [vmem:[#allocation2 + $0x30] sm:$0xff] }
  0x33   : > { %814 = vst.msk [vmem:[#allocation2 + $0x40] sm:$0xff] %vm8661_vm1, %v6124_v52  ;;  %v6168_v7 = vld [vmem:[#allocation2 + $0x2f] sm:$0xff] }
  0x34   : > { %815 = vst.msk [vmem:[#allocation2 + $0x48] sm:$0xff] %vm8661_vm1, %v6129_v54  ;;  %v942_v11 = vsel %vm6164_vm6, %v6168_v7, 0.0  ;;  %v2113_v26 = vld [vmem:[#allocation2 + $0x29] sm:$0xff] }
  0x35   : > { %8816 = vst [vmem:[#allocation20_spill] sm:$0xff] %v6140_v56  ;;  %v992_v5 = vld [vmem:[#allocation2 + $0x38] sm:$0xff] }
  0x36   : > { %8817 = vst [vmem:[#allocation21_spill] sm:$0xff] %v6144_v59  ;;  %v6171_v9 = vpack.c.bf16 %v992_v5, %v991_v4  ;;  %v6173_v10 = vld [vmem:[#allocation2 + $0x37] sm:$0xff]  ;;  %v6211_v27 = vld [vmem:[#allocation2 + $0xaf] sm:$0xff]  ;;  %v6252_v5 = vld [vmem:[%s6023_s17 + $0xc0] sm:$0xff] }
  0x37   : > { %830 = vst.msk [vmem:[#allocation2 + $0xc0] sm:$0xff] %vm8661_vm1, %v6140_v56  ;;  %v972_v16 = vpack.c.bf16 %v6173_v10, %v942_v11  ;;  %v1007_v32 = vld [vmem:[#allocation2 + $0xb0] sm:$0xff]  ;;  %v1008_v36 = vld [vmem:[#allocation2 + $0xb8] sm:$0xff]  ;;  %v958_v44 = vsel %vm6207_vm7, %v6211_v27, 0.0  ;;  %v471_v11 = vand.u32 15, %v303_v63 }
  0x38   : > { %831 = vst.msk [vmem:[#allocation2 + $0xc8] sm:$0xff] %vm8661_vm1, %v6144_v59  ;;  %5599 = vmatmul.msk.bf16.gmra.mxu2 %vm8661_vm1, %v6162_v3  ;;  %v6213_v39 = vld [vmem:[#allocation2 + $0xb7] sm:$0xff]  ;;  %v6218_v45 = vpack.c.bf16 %v1008_v36, %v1007_v32 }
  0x39   : > { %8820 = vst [vmem:[#allocation22_spill] sm:$0xff] %v8819_v60  ;;  %v980_v55 = vpack.c.bf16 %v6213_v39, %v958_v44  ;;  %vm6263_vm9 = vcmp.ne.s32.totalorder %v471_v11, 0 }
  0x3a   : > { %8823 = vst [vmem:[#allocation23_spill] sm:$0xff] %v8822_v6  ;;  %v993_v47 = vld [vmem:[#allocation2 + $0x40] sm:$0xff] }
  0x3b   : > { %8824 = vst [vmem:[#allocation24_spill] sm:$0xff] %v6182_v14  ;;  %5615 = vmatmul.msk.bf16.gmra.mxu3 %vm8661_vm1, %v979_v8  ;;  %v994_v48 = vld [vmem:[#allocation2 + $0x48] sm:$0xff]  ;;  %v6224_v51 = vld [vmem:[#allocation2 + $0x3f] sm:$0xff] }
  0x3c   : > { %8825 = vst [vmem:[#allocation25_spill] sm:$0xff] %v6185_v15  ;;  %v6227_v57 = vpack.c.bf16 %v994_v48, %v993_v47  ;;  %v6229_v58 = vld [vmem:[#allocation2 + $0x47] sm:$0xff]  ;;  %v944_v62 = vsel %vm6220_vm8, %v6224_v51, 0.0 }
  0x3d   : > { %816 = vst.msk [vmem:[#allocation2 + $0x50] sm:$0xff] %vm8661_vm1, %v6182_v14  ;;  %v973_v4 = vpack.c.bf16 %v6229_v58, %v944_v62  ;;  %v6255_v8 = vld [vmem:[%s6023_s17 + $0xc8] sm:$0xff]  ;;  %v8839_v62 = vmov 0 }
  0x3e   : > { %817 = vst.msk [vmem:[#allocation2 + $0x58] sm:$0xff] %vm8661_vm1, %v6185_v15  ;;  %5592 = vmatmul.msk.bf16.gmra.mxu0 %vm8661_vm1, %v6171_v9  ;;  %v864_v22 = vld [vmem:[#allocation2 + $0xbf] sm:$0xff]  ;;  %v8840_v62 = vsel %vm6271_vm10, 4294967295, %v8839_v62  ;;  %v1002_v14 = vld [vmem:[#allocation2 + $0x88] sm:$0xff] }
  0x3f   : > { %8826 = vst [vmem:[#allocation26_spill] sm:$0xff] %v6196_v18  ;;  %5608 = vmatmul.msk.bf16.gmra.mxu1 %vm8661_vm1, %v972_v16  ;;  %v8837_v16 = vmov 0  ;;  %v1009_v30 = vld [vmem:[#allocation2 + $0xc0] sm:$0xff]  ;;  %v1010_v32 = vld [vmem:[#allocation2 + $0xc8] sm:$0xff]  ;;  %v960_v44 = vsel %vm6263_vm9, %v864_v22, 0.0 }
  0x40   : > { %8827 = vst [vmem:[#allocation27_spill] sm:$0xff] %v6199_v20  ;;  %v8838_v16 = vsel %vm6263_vm9, 4294967295, %v8837_v16  ;;  %v865_v36 = vld [vmem:[#allocation2 + $0xc7] sm:$0xff]  ;;  %v6269_v47 = vpack.c.bf16 %v1010_v32, %v1009_v30  ;;  %v6288_v30 = vld [vmem:[%s6023_s17 + $0x50] sm:$0xff]  ;;  %v6291_v32 = vld [vmem:[%s6023_s17 + $0x58] sm:$0xff] }
  0x41   : > { %832 = vst.msk [vmem:[#allocation2 + $0xd0] sm:$0xff] %vm8661_vm1, %v6196_v18 }
  0x42   : > { %833 = vst.msk [vmem:[#allocation2 + $0xd8] sm:$0xff] %vm8661_vm1, %v6199_v20 }
  0x43   : > { %8832 = vst [vmem:[#allocation28_spill] sm:$0xff] %v8831_v49 }
  0x44   : > { %8833 = vst [vmem:[#allocation29_spill] sm:$0xff] %v6238_v0  ;;  %v995_v48 = vld [vmem:[#allocation2 + $0x50] sm:$0xff] }
  0x45   : > { %8834 = vst [vmem:[#allocation30_spill] sm:$0xff] %v6241_v2  ;;  %v6275_v63 = vld [vmem:[#allocation2 + $0x4f] sm:$0xff]  ;;  %v6279_v13 = vld [vmem:[#allocation2 + $0x57] sm:$0xff] }
  0x46   : > { %818 = vst.msk [vmem:[#allocation2 + $0x60] sm:$0xff] %vm8661_vm1, %v6238_v0  ;;  %v946_v22 = vsel %vm6271_vm10, %v6275_v63, 0.0 }
  0x47   : > { %819 = vst.msk [vmem:[#allocation2 + $0x68] sm:$0xff] %vm8661_vm1, %v6241_v2 }
  0x48   : > { %5600 = vmatmul.msk.bf16.gmra.mxu2 %vm8661_vm1, %v6218_v45  ;;  %8835 = vst [vmem:[#allocation31_spill] sm:$0xff] %v6252_v5  ;;  %v1011_v20 = vld [vmem:[#allocation2 + $0xd0] sm:$0xff] }
  0x49   : > { %8836 = vst [vmem:[#allocation32_spill] sm:$0xff] %v6255_v8  ;;  %v1012_v18 = vld [vmem:[#allocation2 + $0xd8] sm:$0xff] }
  0x4a   : > { %834 = vst.msk [vmem:[#allocation2 + $0xe0] sm:$0xff] %vm8661_vm1, %v6252_v5  ;;  %v6319_v56 = vpack.c.bf16 %v1012_v18, %v1011_v20  ;;  %v307_v20 = vadd.s32 208, %v6009_v12 }
  0x4b   : > { %5616 = vmatmul.msk.bf16.gmra.mxu3 %vm8661_vm1, %v980_v55  ;;  %835 = vst.msk [vmem:[#allocation2 + $0xe8] sm:$0xff] %vm8661_vm1, %v6255_v8  ;;  %v996_v55 = vld [vmem:[#allocation2 + $0x58] sm:$0xff]  ;;  %v291_v8 = vadd.s32 80, %v6009_v12 }
  0x4c   : > { %8841 = vst [vmem:[#allocation33_spill] sm:$0xff] %v8840_v62  ;;  %v6277_v11 = vpack.c.bf16 %v996_v55, %v995_v48  ;;  %v6305_v48 = vld [vmem:[%s6023_s17 + $0xd8] sm:$0xff]  ;;  %v485_v55 = vand.u32 15, %v305_v23 }
  0x4d   : > { %8842 = vst [vmem:[#allocation34_spill] sm:$0xff] %v6288_v30  ;;  %v387_v5 = vand.u32 15, %v291_v8  ;;  %v867_v23 = vld [vmem:[#allocation2 + $0xd7] sm:$0xff] }
  0x4e   : > { %5593 = vmatmul.msk.bf16.gmra.mxu0 %vm8661_vm1, %v6227_v57  ;;  %8843 = vst [vmem:[#allocation35_spill] sm:$0xff] %v6291_v32  ;;  %vm6313_vm11 = vcmp.ne.s32.totalorder %v485_v55, 0  ;;  %v6325_v55 = vld [vmem:[#allocation2 + $0x5f] sm:$0xff]  ;;  %v6329_v35 = vld [vmem:[#allocation2 + $0x67] sm:$0xff] }
  0x4f   : > { %5609 = vmatmul.msk.bf16.gmra.mxu1 %vm8661_vm1, %v973_v4  ;;  %v981_v4 = vpack.c.bf16 %v865_v36, %v960_v44  ;;  %820 = vst.msk [vmem:[#allocation2 + $0x70] sm:$0xff] %vm8661_vm1, %v6288_v30  ;;  %v974_v36 = vpack.c.bf16 %v6279_v13, %v946_v22  ;;  %v6302_v44 = vld [vmem:[%s6023_s17 + $0xd0] sm:$0xff]  ;;  %vm6321_vm12 = vcmp.ne.s32.totalorder %v387_v5, 0  ;;  %v6338_v5 = vld [vmem:[%s6023_s17 + $0x60] sm:$0xff] }
  0x50   : > { %821 = vst.msk [vmem:[#allocation2 + $0x78] sm:$0xff] %vm8661_vm1, %v6291_v32  ;;  %v866_v22 = vld [vmem:[#allocation2 + $0xcf] sm:$0xff]  ;;  %v948_v18 = vsel %vm6321_vm12, %v6325_v55, 0.0 }
  0x51   : > { %8844 = vst [vmem:[#allocation36_spill] sm:$0xff] %v6302_v44  ;;  %v962_v59 = vsel %vm6313_vm11, %v866_v22, 0.0  ;;  %v499_v22 = vand.u32 15, %v307_v20  ;;  %v1013_v29 = vld [vmem:[#allocation2 + $0xe0] sm:$0xff] }
  0x52   : > { %8845 = vst [vmem:[#allocation37_spill] sm:$0xff] %v6305_v48  ;;  %v982_v8 = vpack.c.bf16 %v867_v23, %v962_v59  ;;  %v975_v59 = vpack.c.bf16 %v6329_v35, %v948_v18  ;;  %v293_v23 = vadd.s32 96, %v6009_v12  ;;  %v868_v18 = vld [vmem:[#allocation2 + $0xdf] sm:$0xff]  ;;  %v1014_v21 = vld [vmem:[#allocation2 + $0xe8] sm:$0xff] }
  0x53   : > { %836 = vst.msk [vmem:[#allocation2 + $0xf0] sm:$0xff] %vm8661_vm1, %v6302_v44  ;;  %v997_v44 = vld [vmem:[#allocation2 + $0x60] sm:$0xff]  ;;  %vm6358_vm13 = vcmp.ne.s32.totalorder %v499_v22, 0  ;;  %v6364_v24 = vpack.c.bf16 %v1014_v21, %v1013_v29  ;;  %v309_v21 = vadd.s32 224, %v6009_v12 }
  0x54   : > { %837 = vst.msk [vmem:[#allocation2 + $0xf8] sm:$0xff] %vm8661_vm1, %v6305_v48  ;;  %v998_v48 = vld [vmem:[#allocation2 + $0x68] sm:$0xff]  ;;  %v401_v31 = vand.u32 15, %v293_v23  ;;  %v964_v20 = vsel %vm6358_vm13, %v868_v18, 0.0 }
  0x55   : > { %v6327_v38 = vpack.c.bf16 %v998_v48, %v997_v44  ;;  %8852 = vst [vmem:[#allocation40_spill] sm:$0xff] %v6338_v5  ;;  %v6347_v44 = vld [vmem:[%s6023_s17 + $0xe0] sm:$0xff]  ;;  %v6350_v48 = vld [vmem:[%s6023_s17 + $0xe8] sm:$0xff] }
  0x56   : > { %822 = vst.msk [vmem:[#allocation2 + $0x80] sm:$0xff] %vm8661_vm1, %v6338_v5  ;;  %v869_v19 = vld [vmem:[#allocation2 + $0xe7] sm:$0xff]  ;;  %vm6366_vm14 = vcmp.ne.s32.totalorder %v401_v31, 0  ;;  %v295_v31 = vadd.s32 112, %v6009_v12 }
  0x57   : > { %8853 = vst [vmem:[#allocation41_spill] sm:$0xff] %v6347_v44  ;;  %v1000_v5 = vld [vmem:[#allocation2 + $0x78] sm:$0xff]  ;;  %v983_v22 = vpack.c.bf16 %v869_v19, %v964_v20  ;;  %v513_v19 = vand.u32 15, %v309_v21  ;;  %v8864_v21 = vmov 0 }
  0x58   : > { %5601 = vmatmul.msk.bf16.gmra.mxu2 %vm8661_vm1, %v6269_v47  ;;  %8854 = vst [vmem:[#allocation42_spill] sm:$0xff] %v6350_v48  ;;  %v6374_v23 = vld [vmem:[#allocation2 + $0x77] sm:$0xff]  ;;  %v415_v18 = vand.u32 15, %v295_v31 }
  0x59   : > { %838 = vst.msk [vmem:[#allocation2 + $0x100] sm:$0xff] %vm8661_vm1, %v6347_v44  ;;  %v999_v44 = vld [vmem:[#allocation2 + $0x70] sm:$0xff]  ;;  %vm6388_vm15 = vcmp.ne.s32.totalorder %v513_v19, 0 }
  0x5a   : > { %839 = vst.msk [vmem:[#allocation2 + $0x108] sm:$0xff] %vm8661_vm1, %v6350_v48  ;;  %v8858_v48 = vmov 0  ;;  %v6372_v32 = vpack.c.bf16 %v1000_v5, %v999_v44  ;;  %v8861_v5 = vmov 0  ;;  %v870_v44 = vld [vmem:[#allocation2 + $0xef] sm:$0xff]  ;;  %vm6394_vm0 = vcmp.ne.s32.totalorder %v415_v18, 0 }
  0x5b   : > { %5617 = vmatmul.msk.bf16.gmra.mxu3 %vm8661_vm1, %v981_v4  ;;  %v8846_v4 = vmov 0  ;;  %v8859_v48 = vsel %vm6366_vm14, 4294967295, %v8858_v48  ;;  %v8862_v5 = vsel %vm6388_vm15, 4294967295, %v8861_v5  ;;  %v1015_v20 = vld [vmem:[#allocation2 + $0xf0] sm:$0xff]  ;;  %v1016_v2 = vld [vmem:[#allocation2 + $0xf8] sm:$0xff]  ;;  %v8865_v21 = vsel %vm6394_vm0, 4294967295, %v8864_v21 }
  0x5c   : > { %v8847_v4 = vsel %vm6313_vm11, 4294967295, %v8846_v4  ;;  %8860 = vst [vmem:[#allocation44_spill] sm:$0xff] %v8859_v48  ;;  %v871_v0 = vld [vmem:[#allocation2 + $0xf7] sm:$0xff] }
  0x5d   : > { %8848 = vst [vmem:[#allocation38_spill] sm:$0xff] %v8847_v4  ;;  %v1001_v15 = vld [vmem:[#allocation2 + $0x80] sm:$0xff] }
  0x5e   : > { %5594 = vmatmul.msk.bf16.gmra.mxu0 %vm8661_vm1, %v6277_v11  ;;  %8863 = vst [vmem:[#allocation45_spill] sm:$0xff] %v8862_v5  ;;  %v6400_v54 = vpack.c.bf16 %v1002_v14, %v1001_v15  ;;  %v6402_v52 = vld [vmem:[#allocation2 + $0x87] sm:$0xff]  ;;  %v5707_v15 = vld [vmem:[%s8605_s1 + $0x1c] sm:$0xf] }
  0x5f   : > { %5610 = vmatmul.msk.bf16.gmra.mxu1 %vm8661_vm1, %v974_v36  ;;  %v8849_v36 = vmov 0  ;;  %8866 = vst [vmem:[#allocation46_spill] sm:$0xff] %v8865_v21 }
  0x60   : > { %v8850_v36 = vsel %vm6321_vm12, 4294967295, %v8849_v36 }
  0x61   : > { %8851 = vst [vmem:[#allocation39_spill] sm:$0xff] %v8850_v36  ;;  %v873_v34 = vld [vmem:[#allocation2 + $0x107] sm:$0xff] }
  0x68   : > { %5602 = vmatmul.msk.bf16.gmra.mxu2 %vm8661_vm1, %v6319_v56 }
  0x6b   : > { %5618 = vmatmul.msk.bf16.gmra.mxu3 %vm8661_vm1, %v982_v8  ;;  %v8855_v8 = vmov 0 }
  0x6c   : > { %v8856_v8 = vsel %vm6358_vm13, 4294967295, %v8855_v8 }
  0x6d   : > { %8857 = vst [vmem:[#allocation43_spill] sm:$0xff] %v8856_v8  ;;  %v6465_v8 = vld [vmem:[#allocation2 + $0x31] sm:$0xff] }
  0x6e   : > { %5595 = vmatmul.msk.bf16.gmra.mxu0 %vm8661_vm1, %v6327_v38 }
  0x6f   : > { %5611 = vmatmul.msk.bf16.gmra.mxu1 %vm8661_vm1, %v975_v59  ;;  %v6370_v59 = vld [vmem:[#allocation2 + $0x6f] sm:$0xff] }
  0x70   : > { %v950_v30 = vsel %vm6366_vm14, %v6370_v59, 0.0 }
  0x71   : > { %v976_v29 = vpack.c.bf16 %v6374_v23, %v950_v30  ;;  %v966_v30 = vsel %vm6388_vm15, %v870_v44, 0.0  ;;  %v5690_v44 = vld [vmem:[%s8605_s1 + $0x18] sm:$0xf]  ;;  %vm8867_vm15 = vcmask 1043456  }
  0x72   : > { %v984_v19 = vpack.c.bf16 %v871_v0, %v966_v30  ;;  %v2497_v18 = vsel %vm8867_vm15, %v5690_v44, 0  ;;  %vm8868_vm13 = vmmov %vm8867_vm15  ;;  %v282_v30 = vadd.s32 8, %v6009_v12 }
  0x73   : > { %2506 = vmatpush.bf16.msra.mxu2 %v2497_v18  ;;  %v2719_v0 = vsel %vm8868_vm13, %v5707_v15, 0  ;;  %vm8869_vm15 = vmmov %vm8868_vm13  ;;  %v8871_v18 = vmov 0  ;;  %v1018_v15 = vld [vmem:[#allocation2 + $0x108] sm:$0xff] }
  0x74   : > { %2728 = vmatpush.bf16.msra.mxu3 %v2719_v0  ;;  %vm8870_vm11 = vmmov %vm8868_vm13  ;;  %v324_v0 = vand.u32 15, %v282_v30 }
  0x76   : > { %vm6437_vm13 = vcmp.ne.s32.totalorder %v324_v0, 15 }
  0x78   : > { %5603 = vmatmul.msk.bf16.gmra.mxu2 %vm8661_vm1, %v6364_v24 }
  0x7b   : > { %5619 = vmatmul.msk.bf16.gmra.mxu3 %vm8661_vm1, %v983_v22  ;;  %v1033_v22 = vpack.c.bf16 %v1016_v2, %v1015_v20  ;;  %v311_v2 = vadd.s32 240, %v6009_v12 }
  0x7d   : > { %v527_v20 = vand.u32 15, %v311_v2  ;;  %v872_v2 = vld [vmem:[#allocation2 + $0xff] sm:$0xff] }
  0x7e   : > { %5596 = vmatmul.msk.bf16.gmra.mxu0 %vm8661_vm1, %v6372_v32 }
  0x7f   : > { %5612 = vmatmul.msk.bf16.gmra.mxu1 %vm8661_vm1, %v976_v29  ;;  %v6398_v29 = vld [vmem:[#allocation2 + $0x7f] sm:$0xff]  ;;  %vm6431_vm9 = vcmp.ne.s32.totalorder %v527_v20, 0 }
  0x80   : > { %v952_v31 = vsel %vm6394_vm0, %v6398_v29, 0.0  ;;  %v8872_v18 = vsel %vm6431_vm9, 4294967295, %v8871_v18  ;;  %v968_v33 = vsel %vm6431_vm9, %v872_v2, 0.0  ;;  %v2112_v20 = vld [vmem:[#allocation2 + $0x21] sm:$0xff] }
  0x81   : > { %v977_v14 = vpack.c.bf16 %v6402_v52, %v952_v31  ;;  %8873 = vst [vmem:[#allocation47_spill] sm:$0xff] %v8872_v18  ;;  %v985_v5 = vpack.c.bf16 %v873_v34, %v968_v33  ;;  %v1319_v34 = vld [vmem:[#allocation2 + $0x19] sm:$0xff] }
  0x82   : > { %v1415_v0 = vsel %vm6437_vm13, %v1319_v34, 0.0 }
  0x88   : > { %5604 = vmatmul.msk.bf16.gmra.mxu2 %vm8661_vm1, %v1033_v22  ;;  %v5673_v22 = vld [vmem:[%s8605_s1 + $0x14] sm:$0xf] }
  0x89   : > { %v2243_v31 = vsel %vm8869_vm15, %v5673_v22, 0 }
  0x8a   : > { %2252 = vmatpush.bf16.msrb.mxu1 %v2243_v31  ;;  %v2145_v31 = vsel %vm6437_vm13, %v2113_v26, 0.0 }
  0x8b   : > { %5620 = vmatmul.msk.bf16.gmra.mxu3 %vm8661_vm1, %v984_v19  ;;  %v5724_v19 = vld [vmem:[%s8605_s1 + $0x20] sm:$0xf]  ;;  %v2176_v30 = vpack.c.bf16 %v2145_v31, %v2112_v20 }
  0x8c   : > { %v2973_v44 = vsel %vm8870_vm11, %v5724_v19, 0  ;;  %v8874_v19 = vmov 0 }
  0x8d   : > { %2982 = vmatpush.bf16.msra.mxu0 %v2973_v44  ;;  %v8875_v19 = vsel %vm6437_vm13, 4294967295, %v8874_v19 }
  0x8e   : > { %5597 = vmatmul.msk.bf16.gmra.mxu0 %vm8661_vm1, %v6400_v54  ;;  %8876 = vst [vmem:[#allocation48_spill] sm:$0xff] %v8875_v19 }
  0x8f   : > { %5613 = vmatmul.msk.bf16.gmra.mxu1 %vm8661_vm1, %v977_v14  ;;  %v1017_v14 = vld [vmem:[#allocation2 + $0x100] sm:$0xff] }
  0x90   : > { %v1034_v28 = vpack.c.bf16 %v1018_v15, %v1017_v14  ;;  %v284_v14 = vadd.s32 24, %v6009_v12  ;;  %v1318_v15 = vld [vmem:[#allocation2 + $0x11] sm:$0xff] }
  0x94   : > { %v1098_v22 = vpop.f32.mrf.mxu0 }
  0x96   : > { %v1238_v44 = vpop.f32.mrf.mxu1 }
  0x97   : > { %v6447_v2 = vadd.f32 %v1238_v44, %v1098_v22  ;;  %v6458_v22 = vld [vmem:[#allocation2 + $0x39] sm:$0xff] }
  0x98   : > { %5605 = vmatmul.msk.bf16.gmra.mxu2 %vm8661_vm1, %v1034_v28  ;;  %v338_v28 = vand.u32 15, %v284_v14 }
  0x9a   : > { %vm6461_vm11 = vcmp.ne.s32.totalorder %v338_v28, 15 }
  0x9b   : > { %5621 = vmatmul.msk.bf16.gmra.mxu3 %vm8661_vm1, %v985_v5  ;;  %v1668_v5 = vsel %vm6026_vm2, %v6110_v46, 0.0  ;;  %v2147_v34 = vsel %vm6461_vm11, %v6458_v22, 0.0 }
  0x9c   : > { %v1100_v33 = vpop.f32.mrf.mxu0  ;;  %v1700_v44 = vpack.c.bf16 %v6118_v50, %v1668_v5  ;;  %v286_v5 = vadd.s32 40, %v6009_v12 }
  0x9e   : > { %5657 = vmatmul.msk.bf16.vlgmr.msrb.gmra.mxu0 %vm8661_vm1, %v6126_v53  ;;  %v1240_v31 = vpop.f32.mrf.mxu1  ;;  %v1446_v53 = vpack.c.bf16 %v1415_v0, %v1318_v15 }
  0x9f   : > { %5674 = vmatmul.msk.bf16.vlgmr.msrb.gmra.mxu1 %vm8661_vm1, %v2176_v30  ;;  %v6456_v18 = vadd.f32 %v1240_v31, %v1100_v33  ;;  %v8877_v30 = vmov 0  ;;  %v2177_v33 = vpack.c.bf16 %v2147_v34, %v6465_v8 }
  0xa0   : > { %v8878_v30 = vsel %vm6461_vm11, 4294967295, %v8877_v30 }
  0xa1   : > { %8879 = vst [vmem:[#allocation49_spill] sm:$0xff] %v8878_v30  ;;  %v8881_v30 = vmov 0 }
  0xa8   : > { %5623 = vmatmul.msk.bf16.vlgmr.msrb.gmra.mxu2 %vm8661_vm1, %v1446_v53  ;;  %v1417_v53 = vsel %vm6461_vm11, %v2113_v26, 0.0  ;;  %v6497_v26 = vld [vmem:[#allocation2 + $0x41] sm:$0xff] }
  0xab   : > { %v1103_v46 = vpop.f32.mrf.mxu0  ;;  %5640 = vmatmul.msk.bf16.vlgmr.msrb.gmra.mxu3 %vm8661_vm1, %v1700_v44  ;;  %v1138_v14 = vpop.f32.mrf.mxu2  ;;  %v352_v44 = vand.u32 15, %v286_v5 }
  0xac   : > { %v1243_v50 = vpop.f32.mrf.mxu1 }
  0xad   : > { %v6475_v15 = vadd.f32 %v1243_v50, %v1103_v46  ;;  %v1447_v46 = vpack.c.bf16 %v1417_v53, %v2112_v20  ;;  %vm6493_vm15 = vcmp.ne.s32.totalorder %v352_v44, 15 }
  0xae   : > { %5658 = vmatmul.msk.bf16.gmra.mxu0 %vm8661_vm1, %v6171_v9  ;;  %v1278_v0 = vpop.f32.mrf.mxu3  ;;  %v1670_v9 = vsel %vm6095_vm4, %v6168_v7, 0.0  ;;  %v8882_v30 = vsel %vm6493_vm15, 4294967295, %v8881_v30 }
  0xaf   : > { %v6477_v28 = vadd.f32 %v1278_v0, %v1138_v14  ;;  %5675 = vmatmul.msk.bf16.gmra.mxu1 %vm8661_vm1, %v2177_v33  ;;  %v6488_v14 = vld [vmem:[#allocation2 + $0x49] sm:$0xff]  ;;  %8883 = vst [vmem:[#allocation51_spill] sm:$0xff] %v8882_v30  ;;  %v8886_v30 = vmov 0 }
  0xb0   : > { %v2149_v7 = vsel %vm6493_vm15, %v6488_v14, 0.0 }
  0xb1   : > { %8880 = vst [vmem:[#allocation50_spill] sm:$0xff] %v6477_v28  ;;  %v1701_v28 = vpack.c.bf16 %v6173_v10, %v1670_v9  ;;  %v2178_v20 = vpack.c.bf16 %v2149_v7, %v6497_v26 }
  0xb3   : > { %v1105_v31 = vpop.f32.mrf.mxu0  ;;  %v1140_v34 = vpop.f32.mrf.mxu2 }
  0xb4   : > { %v1245_v17 = vpop.f32.mrf.mxu1 }
  0xb5   : > { %v6486_v50 = vadd.f32 %v1245_v17, %v1105_v31 }
  0xb6   : > { %v1280_v0 = vpop.f32.mrf.mxu3 }
  0xb7   : > { %v6490_v33 = vadd.f32 %v1280_v0, %v1140_v34  ;;  %v288_v34 = vadd.s32 56, %v6009_v12 }
  0xb8   : > { %5624 = vmatmul.msk.bf16.gmra.mxu2 %vm8661_vm1, %v1447_v46 }
  0xb9   : > { %v366_v46 = vand.u32 15, %v288_v34  ;;  %v6531_v34 = vld [vmem:[#allocation2 + $0x51] sm:$0xff] }
  0xbb   : > { %v1108_v17 = vpop.f32.mrf.mxu0  ;;  %5641 = vmatmul.msk.bf16.gmra.mxu3 %vm8661_vm1, %v1701_v28  ;;  %v1143_v5 = vpop.f32.mrf.mxu2  ;;  %v1419_v28 = vsel %vm6493_vm15, %v6458_v22, 0.0 }
  0xbc   : > { %v1248_v10 = vpop.f32.mrf.mxu1 }
  0xbd   : > { %v6507_v31 = vadd.f32 %v1248_v10, %v1108_v17  ;;  %v1448_v17 = vpack.c.bf16 %v1419_v28, %v6465_v8  ;;  %v6522_v10 = vld [vmem:[#allocation2 + $0x59] sm:$0xff] }
  0xbe   : > { %5659 = vmatmul.msk.bf16.gmra.mxu0 %vm8661_vm1, %v6227_v57  ;;  %v1283_v53 = vpop.f32.mrf.mxu3  ;;  %v1672_v57 = vsel %vm6164_vm6, %v6224_v51, 0.0  ;;  %vm8889_vm6 = vcmask 64512  }
  0xbf   : > { %v6509_v44 = vadd.f32 %v1283_v53, %v1143_v5  ;;  %5676 = vmatmul.msk.bf16.gmra.mxu1 %vm8661_vm1, %v2178_v20  ;;  %vm6527_vm1 = vcmp.ne.s32.totalorder %v366_v46, 15  ;;  %vm8890_vm15 = vmmov %vm8889_vm6 }
  0xc0   : > { %v8887_v30 = vsel %vm6527_vm1, 4294967295, %v8886_v30  ;;  %v2151_v51 = vsel %vm6527_vm1, %v6522_v10, 0.0  ;;  %vm8891_vm4 = vmmov %vm8889_vm6 }
  0xc1   : > { %8884 = vst [vmem:[#allocation52_spill] sm:$0xff] %v6509_v44  ;;  %v1702_v44 = vpack.c.bf16 %v6229_v58, %v1672_v57  ;;  %v2179_v28 = vpack.c.bf16 %v2151_v51, %v6531_v34  ;;  %vm8893_vm11 = vmmov %vm8891_vm4 }
  0xc2   : > { %8888 = vst [vmem:[#allocation54_spill] sm:$0xff] %v8887_v30  ;;  %v8895_v30 = vmov 0 }
  0xc3   : > { %v1110_v9 = vpop.f32.mrf.mxu0  ;;  %v1145_v0 = vpop.f32.mrf.mxu2 }
  0xc4   : > { %v1250_v7 = vpop.f32.mrf.mxu1 }
  0xc5   : > { %v6520_v5 = vadd.f32 %v1250_v7, %v1110_v9 }
  0xc6   : > { %v1285_v20 = vpop.f32.mrf.mxu3 }
  0xc7   : > { %v6524_v53 = vadd.f32 %v1285_v20, %v1145_v0  ;;  %v290_v20 = vadd.s32 72, %v6009_v12 }
  0xc8   : > { %5625 = vmatmul.msk.bf16.gmra.mxu2 %vm8889_vm6, %v1448_v17 }
  0xc9   : > { %8885 = vst [vmem:[#allocation53_spill] sm:$0xff] %v6524_v53  ;;  %v380_v51 = vand.u32 15, %v290_v20  ;;  %v6565_v20 = vld [vmem:[#allocation2 + $0x61] sm:$0xff] }
  0xcb   : > { %v1113_v9 = vpop.f32.mrf.mxu0  ;;  %5642 = vmatmul.msk.bf16.gmra.mxu3 %vm8890_vm15, %v1702_v44  ;;  %v1148_v0 = vpop.f32.mrf.mxu2  ;;  %v1421_v44 = vsel %vm6527_vm1, %v6488_v14, 0.0  ;;  %vm8899_vm15 = vmmov %vm8889_vm6 }
  0xcc   : > { %v1253_v58 = vpop.f32.mrf.mxu1 }
  0xcd   : > { %v6541_v46 = vadd.f32 %v1253_v58, %v1113_v9  ;;  %v1449_v58 = vpack.c.bf16 %v1421_v44, %v6497_v26 }
  0xce   : > { %5660 = vmatmul.msk.bf16.gmra.mxu0 %vm8891_vm4, %v6277_v11  ;;  %v1288_v57 = vpop.f32.mrf.mxu3  ;;  %v1674_v11 = vsel %vm6220_vm8, %v6275_v63, 0.0  ;;  %vm6561_vm4 = vcmp.ne.s32.totalorder %v380_v51, 15  ;;  %vm8901_vm8 = vmmov %vm8889_vm6 }
  0xcf   : > { %v6543_v7 = vadd.f32 %v1288_v57, %v1148_v0  ;;  %5677 = vmatmul.msk.bf16.gmra.mxu1 %vm8893_vm11, %v2179_v28  ;;  %v6556_v57 = vld [vmem:[#allocation2 + $0x69] sm:$0xff]  ;;  %v1703_v6 = vpack.c.bf16 %v6279_v13, %v1674_v11  ;;  %v8896_v30 = vsel %vm6561_vm4, 4294967295, %v8895_v30  ;;  %vm8898_vm11 = vmmov %vm8889_vm6 }
  0xd0   : > { %8897 = vst [vmem:[#allocation57_spill] sm:$0xff] %v8896_v30  ;;  %v2153_v63 = vsel %vm6561_vm4, %v6556_v57, 0.0  ;;  %v8903_v30 = vmov 0 }
  0xd1   : > { %8892 = vst [vmem:[#allocation55_spill] sm:$0xff] %v6543_v7 }
  0xd3   : > { %v1115_v17 = vpop.f32.mrf.mxu0  ;;  %v1150_v53 = vpop.f32.mrf.mxu2 }
  0xd4   : > { %v1255_v9 = vpop.f32.mrf.mxu1 }
  0xd5   : > { %v6554_v0 = vadd.f32 %v1255_v9, %v1115_v17 }
  0xd6   : > { %v1290_v28 = vpop.f32.mrf.mxu3 }
  0xd7   : > { %v6558_v7 = vadd.f32 %v1290_v28, %v1150_v53  ;;  %v2180_v53 = vpack.c.bf16 %v2153_v63, %v6565_v20  ;;  %v292_v28 = vadd.s32 88, %v6009_v12 }
  0xd8   : > { %5626 = vmatmul.msk.bf16.gmra.mxu2 %vm8889_vm6, %v1449_v58 }
  0xd9   : > { %8894 = vst [vmem:[#allocation56_spill] sm:$0xff] %v6558_v7  ;;  %v394_v63 = vand.u32 15, %v292_v28  ;;  %v6599_v28 = vld [vmem:[#allocation2 + $0x71] sm:$0xff] }
  0xdb   : > { %v1118_v17 = vpop.f32.mrf.mxu0  ;;  %5643 = vmatmul.msk.bf16.gmra.mxu3 %vm8898_vm11, %v1703_v6  ;;  %v1153_v44 = vpop.f32.mrf.mxu2  ;;  %v1423_v6 = vsel %vm6561_vm4, %v6522_v10, 0.0  ;;  %vm8906_vm11 = vmmov %vm8889_vm6 }
  0xdc   : > { %v1258_v13 = vpop.f32.mrf.mxu1 }
  0xdd   : > { %v6575_v51 = vadd.f32 %v1258_v13, %v1118_v17  ;;  %v1450_v13 = vpack.c.bf16 %v1423_v6, %v6531_v34 }
  0xde   : > { %5661 = vmatmul.msk.bf16.gmra.mxu0 %vm8899_vm15, %v6327_v38  ;;  %v1293_v11 = vpop.f32.mrf.mxu3  ;;  %v1676_v38 = vsel %vm6271_vm10, %v6325_v55, 0.0  ;;  %vm8907_vm15 = vmmov %vm8889_vm6 }
  0xdf   : > { %v6577_v9 = vadd.f32 %v1293_v11, %v1153_v44  ;;  %5678 = vmatmul.msk.bf16.gmra.mxu1 %vm8901_vm8, %v2180_v53  ;;  %v6590_v11 = vld [vmem:[#allocation2 + $0x79] sm:$0xff]  ;;  %v1704_v49 = vpack.c.bf16 %v6329_v35, %v1676_v38  ;;  %vm6595_vm8 = vcmp.ne.s32.totalorder %v394_v63, 15  ;;  %vm8909_vm10 = vmmov %vm8889_vm6 }
  0xe0   : > { %v8904_v30 = vsel %vm6595_vm8, 4294967295, %v8903_v30  ;;  %v2155_v55 = vsel %vm6595_vm8, %v6590_v11, 0.0 }
  0xe1   : > { %8900 = vst [vmem:[#allocation58_spill] sm:$0xff] %v6577_v9 }
  0xe2   : > { %8905 = vst [vmem:[#allocation60_spill] sm:$0xff] %v8904_v30  ;;  %v8911_v30 = vmov 0 }
  0xe3   : > { %v1120_v58 = vpop.f32.mrf.mxu0  ;;  %v1155_v7 = vpop.f32.mrf.mxu2 }
  0xe4   : > { %v1260_v17 = vpop.f32.mrf.mxu1 }
  0xe5   : > { %v6588_v44 = vadd.f32 %v1260_v17, %v1120_v58 }
  0xe6   : > { %v1295_v53 = vpop.f32.mrf.mxu3 }
  0xe7   : > { %v6592_v9 = vadd.f32 %v1295_v53, %v1155_v7  ;;  %v2181_v7 = vpack.c.bf16 %v2155_v55, %v6599_v28  ;;  %v294_v53 = vadd.s32 104, %v6009_v12 }
  0xe8   : > { %5627 = vmatmul.msk.bf16.gmra.mxu2 %vm8889_vm6, %v1450_v13 }
  0xe9   : > { %8902 = vst [vmem:[#allocation59_spill] sm:$0xff] %v6592_v9  ;;  %v408_v55 = vand.u32 15, %v294_v53  ;;  %v6633_v53 = vld [vmem:[#allocation2 + $0x81] sm:$0xff] }
  0xea   : > { %8914 = vst [vmem:[#allocation64_spill] sm:$0xff] %v6633_v53 }
  0xeb   : > { %v1123_v58 = vpop.f32.mrf.mxu0  ;;  %5644 = vmatmul.msk.bf16.gmra.mxu3 %vm8906_vm11, %v1704_v49  ;;  %v1158_v6 = vpop.f32.mrf.mxu2  ;;  %v1425_v49 = vsel %vm6595_vm8, %v6556_v57, 0.0  ;;  %vm8915_vm11 = vmmov %vm8889_vm6 }
  0xec   : > { %v1263_v35 = vpop.f32.mrf.mxu1 }
  0xed   : > { %v6609_v63 = vadd.f32 %v1263_v35, %v1123_v58  ;;  %v1451_v35 = vpack.c.bf16 %v1425_v49, %v6565_v20 }
  0xee   : > { %5662 = vmatmul.msk.bf16.gmra.mxu0 %vm8907_vm15, %v6372_v32  ;;  %v1298_v38 = vpop.f32.mrf.mxu3  ;;  %v1678_v32 = vsel %vm6321_vm12, %v6370_v59, 0.0  ;;  %vm8916_vm15 = vmmov %vm8889_vm6 }
  0xef   : > { %v6611_v17 = vadd.f32 %v1298_v38, %v1158_v6  ;;  %5679 = vmatmul.msk.bf16.gmra.mxu1 %vm8909_vm10, %v2181_v7  ;;  %v6624_v38 = vld [vmem:[#allocation2 + $0x89] sm:$0xff]  ;;  %v1705_v62 = vpack.c.bf16 %v6374_v23, %v1678_v32  ;;  %vm6629_vm10 = vcmp.ne.s32.totalorder %v408_v55, 15  ;;  %vm8918_vm12 = vmmov %vm8889_vm6 }
  0xf0   : > { %v8912_v30 = vsel %vm6629_vm10, 4294967295, %v8911_v30  ;;  %v2157_v59 = vsel %vm6629_vm10, %v6624_v38, 0.0 }
  0xf1   : > { %8908 = vst [vmem:[#allocation61_spill] sm:$0xff] %v6611_v17 }
  0xf2   : > { %8913 = vst [vmem:[#allocation63_spill] sm:$0xff] %v8912_v30  ;;  %v8921_v30 = vmov 0 }
  0xf3   : > { %v1125_v13 = vpop.f32.mrf.mxu0  ;;  %v1160_v9 = vpop.f32.mrf.mxu2 }
  0xf4   : > { %v1265_v58 = vpop.f32.mrf.mxu1 }
  0xf5   : > { %v6622_v6 = vadd.f32 %v1265_v58, %v1125_v13 }
  0xf6   : > { %v1300_v7 = vpop.f32.mrf.mxu3 }
  0xf7   : > { %v6626_v17 = vadd.f32 %v1300_v7, %v1160_v9  ;;  %v2182_v9 = vpack.c.bf16 %v2157_v59, %v6633_v53  ;;  %v296_v7 = vadd.s32 120, %v6009_v12 }
  0xf8   : > { %5628 = vmatmul.msk.bf16.gmra.mxu2 %vm8889_vm6, %v1451_v35 }
  0xf9   : > { %8910 = vst [vmem:[#allocation62_spill] sm:$0xff] %v6626_v17  ;;  %v422_v59 = vand.u32 15, %v296_v7  ;;  %v6667_v7 = vld [vmem:[#allocation2 + $0x91] sm:$0xff] }
  0xfa   : > { %8924 = vst [vmem:[#allocation69_spill] sm:$0xff] %v6667_v7 }
  0xfb   : > { %v1128_v13 = vpop.f32.mrf.mxu0  ;;  %5645 = vmatmul.msk.bf16.gmra.mxu3 %vm8915_vm11, %v1705_v62  ;;  %v1163_v49 = vpop.f32.mrf.mxu2  ;;  %v1427_v62 = vsel %vm6629_vm10, %v6590_v11, 0.0  ;;  %vm8925_vm11 = vmmov %vm8889_vm6 }
  0xfc   : > { %v1268_v23 = vpop.f32.mrf.mxu1 }
  0xfd   : > { %v6643_v55 = vadd.f32 %v1268_v23, %v1128_v13  ;;  %v1452_v23 = vpack.c.bf16 %v1427_v62, %v6599_v28 }
  0xfe   : > { %5663 = vmatmul.msk.bf16.gmra.mxu0 %vm8916_vm15, %v6400_v54  ;;  %v1303_v32 = vpop.f32.mrf.mxu3  ;;  %v1680_v54 = vsel %vm6366_vm14, %v6398_v29, 0.0  ;;  %vm8926_vm15 = vmmov %vm8889_vm6 }
  0xff   : > { %v6645_v58 = vadd.f32 %v1303_v32, %v1163_v49  ;;  %5680 = vmatmul.msk.bf16.gmra.mxu1 %vm8918_vm12, %v2182_v9  ;;  %v6658_v32 = vld [vmem:[#allocation2 + $0x99] sm:$0xff]  ;;  %v1706_v36 = vpack.c.bf16 %v6402_v52, %v1680_v54  ;;  %vm6663_vm12 = vcmp.ne.s32.totalorder %v422_v59, 15  ;;  %vm8928_vm14 = vmmov %vm8889_vm6 }
 0x100   : > { %8919 = vst [vmem:[#allocation66_spill] sm:$0xff] %v6658_v32  ;;  %v8922_v30 = vsel %vm6663_vm12, 4294967295, %v8921_v30  ;;  %v2159_v29 = vsel %vm6663_vm12, %v6658_v32, 0.0 }
 0x101   : > { %8917 = vst [vmem:[#allocation65_spill] sm:$0xff] %v6645_v58 }
 0x102   : > { %8923 = vst [vmem:[#allocation68_spill] sm:$0xff] %v8922_v30  ;;  %v8930_v30 = vmov 0 }
 0x103   : > { %v1130_v35 = vpop.f32.mrf.mxu0  ;;  %v1165_v17 = vpop.f32.mrf.mxu2 }
 0x104   : > { %v1270_v13 = vpop.f32.mrf.mxu1 }
 0x105   : > { %v6656_v49 = vadd.f32 %v1270_v13, %v1130_v35 }
 0x106   : > { %v1305_v9 = vpop.f32.mrf.mxu3 }
 0x107   : > { %v6660_v58 = vadd.f32 %v1305_v9, %v1165_v17  ;;  %v2183_v17 = vpack.c.bf16 %v2159_v29, %v6667_v7  ;;  %v298_v9 = vadd.s32 136, %v6009_v12 }
 0x108   : > { %5629 = vmatmul.msk.bf16.gmra.mxu2 %vm8889_vm6, %v1452_v23 }
 0x109   : > { %8920 = vst [vmem:[#allocation67_spill] sm:$0xff] %v6660_v58  ;;  %v436_v29 = vand.u32 15, %v298_v9  ;;  %v6701_v9 = vld [vmem:[#allocation2 + $0xa1] sm:$0xff] }
 0x10b   : > { %v1133_v35 = vpop.f32.mrf.mxu0  ;;  %5646 = vmatmul.msk.bf16.gmra.mxu3 %vm8925_vm11, %v1706_v36  ;;  %v1168_v62 = vpop.f32.mrf.mxu2  ;;  %v1429_v36 = vsel %vm6663_vm12, %v6624_v38, 0.0  ;;  %vm8933_vm11 = vmmov %vm8889_vm6 }
 0x10c   : > { %v1273_v52 = vpop.f32.mrf.mxu1 }
 0x10d   : > { %v6677_v59 = vadd.f32 %v1273_v52, %v1133_v35  ;;  %v1453_v52 = vpack.c.bf16 %v1429_v36, %v6633_v53  ;;  %v8938_v53 = vmov 0 }
 0x10e   : > { %5664 = vmatmul.msk.bf16.gmra.mxu0 %vm8926_vm15, %v6101_v42  ;;  %v1308_v54 = vpop.f32.mrf.mxu3  ;;  %v1682_v42 = vsel %vm6394_vm0, %v6103_v43, 0.0  ;;  %vm8934_vm15 = vmmov %vm8889_vm6  ;;  %vm8935_vm0 = vcmask 1043456  }
 0x10f   : > { %v6679_v13 = vadd.f32 %v1308_v54, %v1168_v62  ;;  %5681 = vmatmul.msk.bf16.gmra.mxu1 %vm8928_vm14, %v2183_v17  ;;  %v6692_v54 = vld [vmem:[#allocation2 + $0xa9] sm:$0xff]  ;;  %v1707_v48 = vpack.c.bf16 %v6093_v40, %v1682_v42  ;;  %vm6697_vm14 = vcmp.ne.s32.totalorder %v436_v29, 15  ;;  %v5741_v40 = vld [vmem:[%s8608_s4 + $0x4] sm:$0xf] }
 0x110   : > { %v8931_v30 = vsel %vm6697_vm14, 4294967295, %v8930_v30  ;;  %v2161_v43 = vsel %vm6697_vm14, %v6692_v54, 0.0  ;;  %v3412_v42 = vsel %vm8935_vm0, %v5741_v40, 0 }
 0x111   : > { %8927 = vst [vmem:[#allocation70_spill] sm:$0xff] %v6679_v13  ;;  %3421 = vmatpush.bf16.msra.mxu1 %v3412_v42 }
 0x112   : > { %8932 = vst [vmem:[#allocation72_spill] sm:$0xff] %v8931_v30 }
 0x113   : > { %v1135_v23 = vpop.f32.mrf.mxu0  ;;  %v1170_v58 = vpop.f32.mrf.mxu2 }
 0x114   : > { %v1275_v35 = vpop.f32.mrf.mxu1 }
 0x115   : > { %v6690_v62 = vadd.f32 %v1275_v35, %v1135_v23 }
 0x116   : > { %v1310_v17 = vpop.f32.mrf.mxu3 }
 0x117   : > { %v6694_v13 = vadd.f32 %v1310_v17, %v1170_v58  ;;  %v2184_v58 = vpack.c.bf16 %v2161_v43, %v6701_v9  ;;  %v1431_v43 = vsel %vm6697_vm14, %v6658_v32, 0.0 }
 0x118   : > { %5630 = vmatmul.msk.bf16.gmra.mxu2 %vm8889_vm6, %v1453_v52  ;;  %v1454_v42 = vpack.c.bf16 %v1431_v43, %v6667_v7  ;;  %v464_v7 = vand.u32 15, %v302_v37  ;;  %v6765_v37 = vld [vmem:[#allocation2 + $0xc1] sm:$0xff] }
 0x119   : > { %8929 = vst [vmem:[#allocation71_spill] sm:$0xff] %v6694_v13 }
 0x11b   : > { %v2000_v23 = vpop.f32.mrf.mxu0  ;;  %5647 = vmatmul.msk.bf16.gmra.mxu3 %vm8933_vm11, %v1707_v48  ;;  %v1173_v36 = vpop.f32.mrf.mxu2  ;;  %v300_v48 = vadd.s32 152, %v6009_v12  ;;  %vm8941_vm11 = vmmov %vm8889_vm6 }
 0x11c   : > { %v2254_v29 = vpop.f32.mrf.mxu1 }
 0x11d   : > { %v450_v13 = vand.u32 15, %v300_v48  ;;  %v6735_v48 = vld [vmem:[#allocation2 + $0xb1] sm:$0xff] }
 0x11e   : > { %5665 = vmatmul.msk.bf16.gmra.mxu0 %vm8934_vm15, %v6162_v3  ;;  %v1313_v35 = vpop.f32.mrf.mxu3  ;;  %v1684_v3 = vsel %vm6084_vm3, %v6155_v61, 0.0  ;;  %vm8942_vm15 = vmmov %vm8889_vm6 }
 0x11f   : > { %v6715_v17 = vadd.f32 %v1313_v35, %v1173_v36  ;;  %5682 = vmatmul.msk.bf16.gmra.mxu1 %vm8889_vm6, %v2184_v58  ;;  %v6726_v36 = vld [vmem:[#allocation2 + $0xb9] sm:$0xff]  ;;  %vm6731_vm0 = vcmp.ne.s32.totalorder %v450_v13, 15  ;;  %vm8943_vm3 = vmmov %vm8889_vm6 }
 0x120   : > { %v8939_v53 = vsel %vm6731_vm0, 4294967295, %v8938_v53  ;;  %v2163_v61 = vsel %vm6731_vm0, %v6726_v36, 0.0 }
 0x121   : > { %8936 = vst [vmem:[#allocation73_spill] sm:$0xff] %v6715_v17  ;;  %v1708_v17 = vpack.c.bf16 %v6157_v1, %v1684_v3 }
 0x122   : > { %8940 = vst [vmem:[#allocation75_spill] sm:$0xff] %v8939_v53 }
 0x123   : > { %v2002_v52 = vpop.f32.mrf.mxu0  ;;  %v1175_v21 = vpop.f32.mrf.mxu2 }
 0x124   : > { %v2256_v40 = vpop.f32.mrf.mxu1 }
 0x126   : > { %v1315_v35 = vpop.f32.mrf.mxu3 }
 0x127   : > { %v6728_v58 = vadd.f32 %v1315_v35, %v1175_v21  ;;  %v2185_v21 = vpack.c.bf16 %v2163_v61, %v6735_v48 }
 0x128   : > { %5631 = vmatmul.msk.bf16.gmra.mxu2 %vm8941_vm11, %v1454_v42  ;;  %vm8947_vm11 = vmmov %vm8889_vm6 }
 0x129   : > { %8937 = vst [vmem:[#allocation74_spill] sm:$0xff] %v6728_v58 }
 0x12b   : > { %v2005_v43 = vpop.f32.mrf.mxu0  ;;  %5648 = vmatmul.msk.bf16.gmra.mxu3 %vm8942_vm15, %v1708_v17  ;;  %v1524_v35 = vpop.f32.mrf.mxu2  ;;  %v1433_v17 = vsel %vm6731_vm0, %v6692_v54, 0.0  ;;  %vm8948_vm15 = vmmov %vm8889_vm6 }
 0x12c   : > { %v2259_v1 = vpop.f32.mrf.mxu1  ;;  %v1604_v13 = vadd.f32 %v1524_v35, %v6447_v2 }
 0x12e   : > { %5666 = vmatmul.msk.bf16.gmra.mxu0 %vm8889_vm6, %v6218_v45  ;;  %v1778_v3 = vpop.f32.mrf.mxu3  ;;  %v1686_v45 = vsel %vm6151_vm5, %v6211_v27, 0.0  ;;  %vm8950_vm5 = vmmov %vm8889_vm6 }
 0x12f   : > { %v1858_v58 = vadd.f32 %v1778_v3, %v1604_v13  ;;  %5683 = vmatmul.msk.bf16.gmra.mxu1 %vm8943_vm3, %v2185_v21  ;;  %v1455_v21 = vpack.c.bf16 %v1433_v17, %v6701_v9  ;;  %v6758_v13 = vld [vmem:[#allocation2 + $0xc9] sm:$0xff]  ;;  %v1709_v3 = vpack.c.bf16 %v6213_v39, %v1686_v45  ;;  %vm6761_vm3 = vcmp.ne.s32.totalorder %v464_v7, 15 }
 0x130   : > { %v2165_v27 = vsel %vm6761_vm3, %v6758_v13, 0.0 }
 0x131   : > { %v2080_v30 = vadd.f32 %v2000_v23, %v1858_v58  ;;  %v2186_v39 = vpack.c.bf16 %v2165_v27, %v6765_v37 }
 0x133   : > { %v2007_v42 = vpop.f32.mrf.mxu0  ;;  %v6751_v61 = vadd.f32 %v2254_v29, %v2080_v30  ;;  %v1526_v32 = vpop.f32.mrf.mxu2  ;;  %v8944_v30 = vmov 0 }
 0x134   : > { %v2261_v2 = vpop.f32.mrf.mxu1  ;;  %v1605_v35 = vadd.f32 %v1526_v32, %v6456_v18  ;;  %v8945_v30 = vsel %vm6761_vm3, 4294967295, %v8944_v30 }
 0x135   : > { %8946 = vst [vmem:[#allocation76_spill] sm:$0xff] %v8945_v30  ;;  %v8951_v30 = vmov 0 }
 0x136   : > { %v1780_v23 = vpop.f32.mrf.mxu3 }
 0x137   : > { %v1859_v58 = vadd.f32 %v1780_v23, %v1605_v35 }
 0x138   : > { %5632 = vmatmul.msk.bf16.gmra.mxu2 %vm8947_vm11, %v1455_v21  ;;  %vm8954_vm11 = vmmov %vm8889_vm6 }
 0x139   : > { %v2081_v18 = vadd.f32 %v2002_v52, %v1859_v58  ;;  %v304_v52 = vadd.s32 184, %v6009_v12 }
 0x13b   : > { %v2010_v32 = vpop.f32.mrf.mxu0  ;;  %5649 = vmatmul.msk.bf16.gmra.mxu3 %vm8948_vm15, %v1709_v3  ;;  %v6772_v29 = vadd.f32 %v2256_v40, %v2081_v18  ;;  %v1529_v7 = vpop.f32.mrf.mxu2  ;;  %v1656_v3 = vld [vmem:[#allocation2 + $0xbf] sm:$0xff]  ;;  %v1435_v40 = vsel %vm6761_vm3, %v6726_v36, 0.0  ;;  %v478_v18 = vand.u32 15, %v304_v52  ;;  %vm8955_vm15 = vmmov %vm8889_vm6 }
 0x13c   : > { %v2264_v17 = vpop.f32.mrf.mxu1  ;;  %v1606_v45 = vadd.f32 %v1529_v7, %v6475_v15  ;;  %v1688_v15 = vsel %vm6207_vm7, %v1656_v3, 0.0  ;;  %vm8957_vm7 = vmmov %vm8889_vm6 }
 0x13d   : > { %8949 = vst [vmem:[#allocation77_spill] sm:$0xff] %v6772_v29  ;;  %v1657_v29 = vld [vmem:[#allocation2 + $0xc7] sm:$0xff]  ;;  %vm8978_vm3 = vmmov %vm8889_vm6 }
 0x13e   : > { %5667 = vmatmul.msk.bf16.gmra.mxu0 %vm8889_vm6, %v6269_v47  ;;  %v1783_v35 = vpop.f32.mrf.mxu3  ;;  %v1710_v60 = vpack.c.bf16 %v1657_v29, %v1688_v15 }
 0x13f   : > { %v1860_v23 = vadd.f32 %v1783_v35, %v1606_v45  ;;  %5684 = vmatmul.msk.bf16.gmra.mxu1 %vm8950_vm5, %v2186_v39  ;;  %v1456_v45 = vpack.c.bf16 %v1435_v40, %v6735_v48  ;;  %vm6791_vm5 = vcmp.ne.s32.totalorder %v478_v18, 15 }
 0x140   : > { %v8952_v30 = vsel %vm6791_vm5, 4294967295, %v8951_v30 }
 0x141   : > { %v2082_v21 = vadd.f32 %v2005_v43, %v1860_v23  ;;  %v6789_v43 = vld [vmem:[#allocation2 + $0xd9] sm:$0xff]  ;;  %8953 = vst [vmem:[#allocation78_spill] sm:$0xff] %v8952_v30  ;;  %v8959_v30 = vmov 0 }
 0x142   : > { %v2167_v52 = vsel %vm6791_vm5, %v6789_v43, 0.0 }
 0x143   : > { %v2012_v58 = vpop.f32.mrf.mxu0  ;;  %v6783_v27 = vadd.f32 %v2259_v1, %v2082_v21  ;;  %v1531_v47 = vpop.f32.mrf.mxu2  ;;  %v6795_v1 = vld [vmem:[#allocation2 + $0xd1] sm:$0xff] }
 0x144   : > { %v2266_v7 = vpop.f32.mrf.mxu1  ;;  %v1607_v39 = vadd.f32 %v1531_v47, %v6486_v50  ;;  %v2187_v29 = vpack.c.bf16 %v2167_v52, %v6795_v1 }
 0x146   : > { %v1785_v35 = vpop.f32.mrf.mxu3 }
 0x147   : > { %v1861_v23 = vadd.f32 %v1785_v35, %v1607_v39 }
 0x148   : > { %5633 = vmatmul.msk.bf16.gmra.mxu2 %vm8954_vm11, %v1456_v45  ;;  %vm8958_vm11 = vnez %v8838_v16 }
 0x149   : > { %v2083_v50 = vadd.f32 %v2007_v42, %v1861_v23  ;;  %v306_v42 = vadd.s32 200, %v6009_v12 }
 0x14b   : > { %v2015_v21 = vpop.f32.mrf.mxu0  ;;  %5650 = vmatmul.msk.bf16.gmra.mxu3 %vm8955_vm15, %v1710_v60  ;;  %v6802_v3 = vadd.f32 %v2261_v2, %v2083_v50  ;;  %v1534_v40 = vpop.f32.mrf.mxu2  ;;  %v1658_v60 = vld [vmem:[#allocation2 + $0xcf] sm:$0xff]  ;;  %v1437_v2 = vsel %vm6791_vm5, %v6758_v13, 0.0  ;;  %v492_v52 = vand.u32 15, %v306_v42  ;;  %v1659_v50 = vld [vmem:[#allocation2 + $0xd7] sm:$0xff]  ;;  %vm8962_vm15 = vmmov %vm8889_vm6 }
 0x14c   : > { %v2269_v18 = vpop.f32.mrf.mxu1  ;;  %v1608_v47 = vadd.f32 %v1534_v40, %v6507_v31  ;;  %v1690_v31 = vsel %vm8958_vm11, %v1658_v60, 0.0  ;;  %vm8963_vm11 = vmmov %vm8889_vm6 }
 0x14d   : > { %8956 = vst [vmem:[#allocation79_spill] sm:$0xff] %v6802_v3  ;;  %v1711_v3 = vpack.c.bf16 %v1659_v50, %v1690_v31  ;;  %vm8964_vm5 = vmmov %vm8889_vm6 }
 0x14e   : > { %5668 = vmatmul.msk.bf16.gmra.mxu0 %vm8889_vm6, %v6319_v56  ;;  %v1788_v15 = vpop.f32.mrf.mxu3 }
 0x14f   : > { %v1862_v39 = vadd.f32 %v1788_v15, %v1608_v47  ;;  %5685 = vmatmul.msk.bf16.gmra.mxu1 %vm8957_vm7, %v2187_v29  ;;  %v1457_v47 = vpack.c.bf16 %v1437_v2, %v6765_v37  ;;  %vm6821_vm7 = vcmp.ne.s32.totalorder %v492_v52, 15 }
 0x150   : > { %v8960_v30 = vsel %vm6821_vm7, 4294967295, %v8959_v30 }
 0x151   : > { %v2084_v45 = vadd.f32 %v2010_v32, %v1862_v39  ;;  %v6819_v32 = vld [vmem:[#allocation2 + $0xe9] sm:$0xff]  ;;  %8961 = vst [vmem:[#allocation80_spill] sm:$0xff] %v8960_v30  ;;  %v6867_v30 = vld [vmem:[%s6023_s17 + $0xf8] sm:$0xff] }
 0x152   : > { %v2169_v42 = vsel %vm6821_vm7, %v6819_v32, 0.0  ;;  %8973 = vst [vmem:[#allocation85_spill] sm:$0xff] %v6867_v30 }
 0x153   : > { %v2017_v35 = vpop.f32.mrf.mxu0  ;;  %v6813_v23 = vadd.f32 %v2264_v17, %v2084_v45  ;;  %v1536_v56 = vpop.f32.mrf.mxu2  ;;  %v6825_v17 = vld [vmem:[#allocation2 + $0xe1] sm:$0xff] }
 0x154   : > { %v2271_v40 = vpop.f32.mrf.mxu1  ;;  %v1609_v29 = vadd.f32 %v1536_v56, %v6520_v5  ;;  %v2188_v2 = vpack.c.bf16 %v2169_v42, %v6825_v17 }
 0x156   : > { %v1790_v15 = vpop.f32.mrf.mxu3 }
 0x157   : > { %v1863_v39 = vadd.f32 %v1790_v15, %v1609_v29 }
 0x158   : > { %5634 = vmatmul.msk.bf16.gmra.mxu2 %vm8962_vm15, %v1457_v47  ;;  %vm8971_vm15 = vmmov %vm8889_vm6 }
 0x159   : > { %v2085_v5 = vadd.f32 %v2012_v58, %v1863_v39  ;;  %v308_v58 = vadd.s32 216, %v6009_v12 }
 0x15b   : > { %v2020_v45 = vpop.f32.mrf.mxu0  ;;  %5651 = vmatmul.msk.bf16.gmra.mxu3 %vm8889_vm6, %v1711_v3  ;;  %v6832_v60 = vadd.f32 %v2266_v7, %v2085_v5  ;;  %v1539_v52 = vpop.f32.mrf.mxu2  ;;  %v1660_v3 = vld [vmem:[#allocation2 + $0xdf] sm:$0xff]  ;;  %v1439_v7 = vsel %vm6821_vm7, %v6789_v43, 0.0  ;;  %v506_v42 = vand.u32 15, %v308_v58  ;;  %v1661_v5 = vld [vmem:[#allocation2 + $0xe7] sm:$0xff]  ;;  %vm8976_vm7 = vmmov %vm8889_vm6 }
 0x15c   : > { %v2274_v56 = vpop.f32.mrf.mxu1  ;;  %v1610_v50 = vadd.f32 %v1539_v52, %v6541_v46  ;;  %841 = vst.msk [vmem:[#allocation2 + $0x118] sm:$0xff] %vm8976_vm7, %v6867_v30  ;;  %v1663_v30 = vld [vmem:[#allocation2 + $0xf7] sm:$0xff] }
 0x15e   : > { %5669 = vmatmul.msk.bf16.gmra.mxu0 %vm8963_vm11, %v6364_v24  ;;  %v1793_v31 = vpop.f32.mrf.mxu3  ;;  %vm8966_vm11 = vnez %v8847_v4  ;;  %v6857_v4 = vld [vmem:[#allocation2 + $0xf1] sm:$0xff] }
 0x15f   : > { %v1864_v29 = vadd.f32 %v1793_v31, %v1610_v50  ;;  %5686 = vmatmul.msk.bf16.gmra.mxu1 %vm8964_vm5, %v2188_v2  ;;  %v1692_v46 = vsel %vm8966_vm11, %v1660_v3, 0.0  ;;  %v1916_v50 = vld [vmem:[#allocation2 + $0xf0] sm:$0xff]  ;;  %v1917_v31 = vld [vmem:[#allocation2 + $0xf8] sm:$0xff]  ;;  %vm6853_vm5 = vcmp.ne.s32.totalorder %v506_v42, 15  ;;  %vm8974_vm11 = vmmov %vm8889_vm6 }
 0x160   : > { %v1712_v58 = vpack.c.bf16 %v1661_v5, %v1692_v46  ;;  %v1935_v3 = vpack.c.bf16 %v1917_v31, %v1916_v50  ;;  %v310_v31 = vadd.s32 232, %v6009_v12 }
 0x161   : > { %v2086_v47 = vadd.f32 %v2015_v21, %v1864_v29  ;;  %v1458_v21 = vpack.c.bf16 %v1439_v7, %v6795_v1  ;;  %v6851_v29 = vld [vmem:[#allocation2 + $0xf9] sm:$0xff] }
 0x163   : > { %v2022_v15 = vpop.f32.mrf.mxu0  ;;  %v6843_v39 = vadd.f32 %v2269_v18, %v2086_v47  ;;  %v1541_v24 = vpop.f32.mrf.mxu2 }
 0x164   : > { %v6847_v52 = vpop.f32.mrf.mxu1  ;;  %v1611_v2 = vadd.f32 %v1541_v24, %v6554_v0  ;;  %v2171_v0 = vsel %vm6853_vm5, %v6851_v29, 0.0 }
 0x165   : > { %8965 = vst [vmem:[#allocation81_spill] sm:$0xff] %v6843_v39  ;;  %v8968_v39 = vmov 0  ;;  %v2189_v5 = vpack.c.bf16 %v2171_v0, %v6857_v4 }
 0x166   : > { %8967 = vst [vmem:[#allocation82_spill] sm:$0xff] %v6847_v52  ;;  %v1795_v18 = vpop.f32.mrf.mxu3  ;;  %v8969_v39 = vsel %vm6853_vm5, 4294967295, %v8968_v39  ;;  %v6864_v52 = vld [vmem:[%s6023_s17 + $0xf0] sm:$0xff] }
 0x167   : > { %v1865_v47 = vadd.f32 %v1795_v18, %v1611_v2  ;;  %8970 = vst [vmem:[#allocation83_spill] sm:$0xff] %v8969_v39 }
 0x168   : > { %5635 = vmatmul.msk.bf16.gmra.mxu2 %vm8971_vm15, %v1458_v21  ;;  %8972 = vst [vmem:[#allocation84_spill] sm:$0xff] %v6864_v52  ;;  %vm8977_vm15 = vmmov %vm8889_vm6 }
 0x169   : > { %v2087_v7 = vadd.f32 %v2017_v35, %v1865_v47  ;;  %840 = vst.msk [vmem:[#allocation2 + $0x110] sm:$0xff] %vm8889_vm6, %v6864_v52  ;;  %v1662_v47 = vld [vmem:[#allocation2 + $0xef] sm:$0xff]  ;;  %v8979_v52 = vld [vmem:[#allocation43_spill] sm:$0xff] }
 0x16a   : > { %vm8980_vm7 = vnez %v8979_v52  ;;  %v6898_v52 = vld [vmem:[#allocation2 + $0x101] sm:$0xff] }
 0x16b   : > { %v2025_v24 = vpop.f32.mrf.mxu0  ;;  %5652 = vmatmul.msk.bf16.gmra.mxu3 %vm8974_vm11, %v1712_v58  ;;  %v6872_v42 = vadd.f32 %v2271_v40, %v2087_v7  ;;  %v1544_v46 = vpop.f32.mrf.mxu2  ;;  %v1441_v58 = vsel %vm6853_vm5, %v6819_v32, 0.0  ;;  %v520_v7 = vand.u32 15, %v310_v31  ;;  %v8982_v31 = vmov 0  ;;  %vm8985_vm11 = vmmov %vm8889_vm6 }
 0x16c   : > { %v2279_v35 = vpop.f32.mrf.mxu1  ;;  %v1612_v2 = vadd.f32 %v1544_v46, %v6575_v51  ;;  %v1694_v51 = vsel %vm8980_vm7, %v1662_v47, 0.0  ;;  %vm8988_vm7 = vmmov %vm8889_vm6 }
 0x16d   : > { %8975 = vst [vmem:[#allocation86_spill] sm:$0xff] %v6872_v42 }
 0x16e   : > { %5670 = vmatmul.msk.bf16.gmra.mxu0 %vm8977_vm15, %v1935_v3  ;;  %v1798_v21 = vpop.f32.mrf.mxu3  ;;  %vm8987_vm15 = vmmov %vm8889_vm6 }
 0x16f   : > { %v1866_v50 = vadd.f32 %v1798_v21, %v1612_v2  ;;  %5687 = vmatmul.msk.bf16.gmra.mxu1 %vm8978_vm3, %v2189_v5  ;;  %v1918_v2 = vld [vmem:[#allocation2 + $0x100] sm:$0xff]  ;;  %v1919_v21 = vld [vmem:[#allocation2 + $0x108] sm:$0xff]  ;;  %vm6894_vm3 = vcmp.ne.s32.totalorder %v520_v7, 15 }
 0x170   : > { %v8983_v31 = vsel %vm6894_vm3, 4294967295, %v8982_v31 }
 0x171   : > { %v2088_v18 = vadd.f32 %v2020_v45, %v1866_v50  ;;  %v1459_v45 = vpack.c.bf16 %v1441_v58, %v6825_v17  ;;  %v6892_v50 = vld [vmem:[#allocation2 + $0x109] sm:$0xff]  ;;  %8984 = vst [vmem:[#allocation88_spill] sm:$0xff] %v8983_v31 }
 0x173   : > { %v2027_v40 = vpop.f32.mrf.mxu0  ;;  %v6884_v0 = vadd.f32 %v2274_v56, %v2088_v18  ;;  %v1546_v3 = vpop.f32.mrf.mxu2  ;;  %v1713_v56 = vpack.c.bf16 %v1663_v30, %v1694_v51  ;;  %v1936_v18 = vpack.c.bf16 %v1919_v21, %v1918_v2  ;;  %v312_v2 = vadd.s32 248, %v6009_v12 }
 0x174   : > { %v6888_v46 = vpop.f32.mrf.mxu1  ;;  %v1613_v5 = vadd.f32 %v1546_v3, %v6588_v44  ;;  %v2173_v44 = vsel %vm6894_vm3, %v6892_v50, 0.0  ;;  %v1443_v21 = vsel %vm6894_vm3, %v6851_v29, 0.0  ;;  %vm8998_vm3 = vmmov %vm8889_vm6 }
 0x175   : > { %8981 = vst [vmem:[#allocation87_spill] sm:$0xff] %v6888_v46  ;;  %v2190_v30 = vpack.c.bf16 %v2173_v44, %v6898_v52  ;;  %v534_v44 = vand.u32 15, %v312_v2  ;;  %v1665_v46 = vld [vmem:[#allocation2 + $0x107] sm:$0xff]  ;;  %v1460_v12 = vpack.c.bf16 %v1443_v21, %v6857_v4  ;;  %v8992_v2 = vmov 0 }
 0x176   : > { %v1800_v39 = vpop.f32.mrf.mxu3 }
 0x177   : > { %v1867_v42 = vadd.f32 %v1800_v39, %v1613_v5 }
 0x178   : > { %5636 = vmatmul.msk.bf16.gmra.mxu2 %vm8985_vm11, %v1459_v45 }
 0x179   : > { %v6904_v47 = vadd.f32 %v2022_v15, %v1867_v42  ;;  %v1664_v42 = vld [vmem:[#allocation2 + $0xff] sm:$0xff] }
 0x17b   : > { %8986 = vst [vmem:[#allocation89_spill] sm:$0xff] %v6904_v47  ;;  %v2030_v58 = vpop.f32.mrf.mxu0  ;;  %5653 = vmatmul.msk.bf16.gmra.mxu3 %vm8889_vm6, %v1713_v56  ;;  %v1549_v39 = vpop.f32.mrf.mxu2  ;;  %v8989_v47 = vld [vmem:[#allocation45_spill] sm:$0xff] }
 0x17c   : > { %v2284_v7 = vpop.f32.mrf.mxu1  ;;  %v1614_v3 = vadd.f32 %v1549_v39, %v6609_v63  ;;  %vm8990_vm11 = vnez %v8989_v47  ;;  %v6929_v47 = vld [vmem:[#allocation2 + $0x111] sm:$0xff] }
 0x17d   : > { %v1696_v63 = vsel %vm8990_vm11, %v1664_v42, 0.0  ;;  %vm8997_vm11 = vmmov %vm8889_vm6 }
 0x17e   : > { %5671 = vmatmul.msk.bf16.gmra.mxu0 %vm8987_vm15, %v1936_v18  ;;  %v1803_v51 = vpop.f32.mrf.mxu3  ;;  %vm8996_vm15 = vmmov %vm8889_vm6 }
 0x17f   : > { %v1868_v5 = vadd.f32 %v1803_v51, %v1614_v3  ;;  %5688 = vmatmul.msk.bf16.gmra.mxu1 %vm8988_vm7, %v2190_v30  ;;  %v1921_v3 = vld [vmem:[#allocation2 + $0x118] sm:$0xff]  ;;  %vm6925_vm7 = vcmp.ne.s32.totalorder %v534_v44, 15 }
 0x180   : > { %v6923_v51 = vld [vmem:[#allocation2 + $0x119] sm:$0xff]  ;;  %v8993_v2 = vsel %vm6925_vm7, 4294967295, %v8992_v2 }
 0x181   : > { %v2090_v45 = vadd.f32 %v2025_v24, %v1868_v5  ;;  %v1920_v24 = vld [vmem:[#allocation2 + $0x110] sm:$0xff]  ;;  %8994 = vst [vmem:[#allocation91_spill] sm:$0xff] %v8993_v2 }
 0x183   : > { %v2032_v15 = vpop.f32.mrf.mxu0  ;;  %v6915_v56 = vadd.f32 %v2279_v35, %v2090_v45  ;;  %v1551_v18 = vpop.f32.mrf.mxu2  ;;  %v1714_v35 = vpack.c.bf16 %v1665_v46, %v1696_v63  ;;  %v1937_v45 = vpack.c.bf16 %v1921_v3, %v1920_v24 }
 0x184   : > { %v6919_v39 = vpop.f32.mrf.mxu1  ;;  %v1615_v30 = vadd.f32 %v1551_v18, %v6622_v6  ;;  %v2175_v6 = vsel %vm6925_vm7, %v6923_v51, 0.0 }
 0x185   : > { %8991 = vst [vmem:[#allocation90_spill] sm:$0xff] %v6919_v39  ;;  %v2191_v46 = vpack.c.bf16 %v2175_v6, %v6929_v47  ;;  %v1667_v6 = vld [vmem:[#allocation2 + $0x117] sm:$0xff] }
 0x186   : > { %v1805_v5 = vpop.f32.mrf.mxu3  ;;  %v8999_v39 = vld [vmem:[#allocation47_spill] sm:$0xff] }
 0x187   : > { %v1869_v31 = vadd.f32 %v1805_v5, %v1615_v30 }
 0x188   : > { %5637 = vmatmul.msk.bf16.gmra.mxu2 %vm8889_vm6, %v1460_v12  ;;  %v1666_v12 = vld [vmem:[#allocation2 + $0x10f] sm:$0xff]  ;;  %vm9003_vm6 = vmmov %vm8998_vm3 }
 0x189   : > { %v6935_v42 = vadd.f32 %v2027_v40, %v1869_v31  ;;  %v1445_v40 = vsel %vm6925_vm7, %v6892_v50, 0.0 }
 0x18b   : > { %8995 = vst [vmem:[#allocation92_spill] sm:$0xff] %v6935_v42  ;;  %v2035_v21 = vpop.f32.mrf.mxu0  ;;  %5654 = vmatmul.msk.bf16.gmra.mxu3 %vm8996_vm15, %v1714_v35  ;;  %v1554_v44 = vpop.f32.mrf.mxu2 }
 0x18c   : > { %v2289_v18 = vpop.f32.mrf.mxu1  ;;  %v1616_v63 = vadd.f32 %v1554_v44, %v6643_v55 }
 0x18e   : > { %5672 = vmatmul.msk.bf16.gmra.mxu0 %vm8997_vm11, %v1937_v45  ;;  %v1808_v30 = vpop.f32.mrf.mxu3  ;;  %v1698_v45 = vsel %vm6431_vm9, %v1666_v12, 0.0  ;;  %vm9002_vm11 = vmmov %vm8998_vm3 }
 0x18f   : > { %v1870_v24 = vadd.f32 %v1808_v30, %v1616_v63  ;;  %5689 = vmatmul.msk.bf16.gmra.mxu1 %vm8998_vm3, %v2191_v46  ;;  %v1461_v46 = vpack.c.bf16 %v1445_v40, %v6898_v52  ;;  %v1715_v30 = vpack.c.bf16 %v1667_v6, %v1698_v45  ;;  %v2367_v45 = vld [vmem:[#allocation2 + $0x37] sm:$0xff] }
 0x191   : > { %v2092_v3 = vadd.f32 %v2030_v58, %v1870_v24  ;;  %v2875_v58 = vsel %vm6437_vm13, %v6458_v22, 0.0 }
 0x193   : > { %v2037_v5 = vpop.f32.mrf.mxu0  ;;  %v6945_v31 = vadd.f32 %v2284_v7, %v2092_v3  ;;  %v1556_v35 = vpop.f32.mrf.mxu2  ;;  %v2906_v7 = vpack.c.bf16 %v2875_v58, %v6465_v8  ;;  %v9004_v8 = vld [vmem:[#allocation4_spill] sm:$0xff] }
 0x194   : > { %v6949_v42 = vpop.f32.mrf.mxu1  ;;  %v1617_v55 = vadd.f32 %v1556_v35, %v6656_v49 }
 0x195   : > { %9000 = vst [vmem:[#allocation93_spill] sm:$0xff] %v6949_v42  ;;  %v2366_v42 = vld [vmem:[#allocation2 + $0x2f] sm:$0xff] }
 0x196   : > { %v1810_v44 = vpop.f32.mrf.mxu3 }
 0x197   : > { %v1871_v63 = vadd.f32 %v1810_v44, %v1617_v55  ;;  %v2620_v44 = vld [vmem:[#allocation2 + $0x30] sm:$0xff] }
 0x198   : > { %5638 = vmatmul.msk.bf16.gmra.mxu2 %vm8998_vm3, %v1461_v46  ;;  %v2398_v46 = vsel %vm6026_vm2, %v2366_v42, 0.0  ;;  %vm9011_vm2 = vnez %v8812_v41 }
 0x199   : > { %v6958_v24 = vadd.f32 %v2032_v15, %v1871_v63  ;;  %v2621_v63 = vld [vmem:[#allocation2 + $0x38] sm:$0xff] }
 0x19b   : > { %9001 = vst [vmem:[#allocation94_spill] sm:$0xff] %v6958_v24  ;;  %v2040_v3 = vpop.f32.mrf.mxu0  ;;  %5655 = vmatmul.msk.bf16.gmra.mxu3 %vm9002_vm11, %v1715_v30  ;;  %v1559_v12 = vpop.f32.mrf.mxu2  ;;  %v2430_v24 = vpack.c.bf16 %v2367_v45, %v2398_v46  ;;  %vm9008_vm11 = vmmov %vm8998_vm3  ;;  %v9010_v45 = vld [vmem:[#allocation50_spill] sm:$0xff] }
 0x19c   : > { %v2294_v49 = vpop.f32.mrf.mxu1  ;;  %v1618_v40 = vadd.f32 %v1559_v12, %v6677_v59  ;;  %v9006_v59 = vld [vmem:[#allocation49_spill] sm:$0xff] }
 0x19d   : > { %vm9007_vm15 = vnez %v9006_v59 }
 0x19e   : > { %5725 = vmatmul.msk.bf16.vlgmr.msra.gmra.mxu0 %vm9003_vm6, %v2906_v7  ;;  %v1813_v35 = vpop.f32.mrf.mxu3  ;;  %v2877_v12 = vsel %vm9007_vm15, %v6488_v14, 0.0  ;;  %vm9009_vm6 = vmmov %vm8998_vm3 }
 0x19f   : > { %v1872_v22 = vadd.f32 %v1813_v35, %v1618_v40  ;;  %v2652_v35 = vpack.c.bf16 %v2621_v63, %v2620_v44  ;;  %v2369_v63 = vld [vmem:[#allocation2 + $0x47] sm:$0xff] }
 0x1a1   : > { %v2094_v55 = vadd.f32 %v2035_v21, %v1872_v22  ;;  %v2907_v22 = vpack.c.bf16 %v2877_v12, %v6497_v26  ;;  %v2622_v12 = vld [vmem:[#allocation2 + $0x40] sm:$0xff] }
 0x1a3   : > { %v2042_v6 = vpop.f32.mrf.mxu0  ;;  %v6965_v15 = vadd.f32 %v2289_v18, %v2094_v55  ;;  %v1561_v58 = vpop.f32.mrf.mxu2 }
 0x1a4   : > { %v6967_v30 = vpop.f32.mrf.mxu1  ;;  %v1619_v7 = vadd.f32 %v1561_v58, %v6690_v62 }
 0x1a5   : > { %9005 = vst [vmem:[#allocation95_spill] sm:$0xff] %v6967_v30  ;;  %v2368_v30 = vld [vmem:[#allocation2 + $0x3f] sm:$0xff] }
 0x1a6   : > { %v1815_v21 = vpop.f32.mrf.mxu3  ;;  %v2400_v26 = vsel %vm9011_vm2, %v2368_v30, 0.0  ;;  %vm9018_vm2 = vmmov %vm9009_vm6 }
 0x1a7   : > { %v1873_v40 = vadd.f32 %v1815_v21, %v1619_v7  ;;  %v2623_v21 = vld [vmem:[#allocation2 + $0x48] sm:$0xff] }
 0x1a8   : > { %5691 = vmatmul.msk.bf16.vlgmr.msra.gmra.mxu2 %vm8998_vm3, %v2430_v24 }
 0x1a9   : > { %v6975_v42 = vadd.f32 %v2037_v5, %v1873_v40 }
 0x1ab   : > { %v2045_v18 = vpop.f32.mrf.mxu0  ;;  %5708 = vmatmul.msk.bf16.vlgmr.msra.gmra.mxu3 %vm9008_vm11, %v2652_v35  ;;  %v1564_v55 = vpop.f32.mrf.mxu2  ;;  %vm9016_vm11 = vmmov %vm9009_vm6 }
 0x1ac   : > { %v2299_v62 = vpop.f32.mrf.mxu1  ;;  %v1620_v46 = vadd.f32 %v1564_v55, %v9010_v45  ;;  %v9014_v55 = vld [vmem:[#allocation51_spill] sm:$0xff] }
 0x1ad   : > { %vm9015_vm3 = vnez %v9014_v55 }
 0x1ae   : > { %5726 = vmatmul.msk.bf16.gmra.mxu0 %vm9009_vm6, %v2907_v22  ;;  %v1818_v58 = vpop.f32.mrf.mxu3  ;;  %v2431_v22 = vpack.c.bf16 %v2369_v63, %v2400_v26  ;;  %v2879_v45 = vsel %vm9015_vm3, %v6522_v10, 0.0  ;;  %v9019_v63 = vld [vmem:[#allocation52_spill] sm:$0xff] }
 0x1af   : > { %v1874_v14 = vadd.f32 %v1818_v58, %v1620_v46  ;;  %v2653_v58 = vpack.c.bf16 %v2623_v21, %v2622_v12  ;;  %v2371_v21 = vld [vmem:[#allocation2 + $0x57] sm:$0xff] }
 0x1b1   : > { %v2096_v7 = vadd.f32 %v2040_v3, %v1874_v14  ;;  %v2908_v14 = vpack.c.bf16 %v2879_v45, %v6531_v34  ;;  %v9020_v34 = vld [vmem:[#allocation23_spill] sm:$0xff] }
 0x1b2   : > { %vm9021_vm9 = vnez %v9020_v34 }
 0x1b3   : > { %v2047_v44 = vpop.f32.mrf.mxu0  ;;  %v6982_v5 = vadd.f32 %v2294_v49, %v2096_v7  ;;  %v1566_v24 = vpop.f32.mrf.mxu2 }
 0x1b4   : > { %v6984_v40 = vpop.f32.mrf.mxu1  ;;  %v1621_v35 = vadd.f32 %v1566_v24, %v6490_v33 }
 0x1b5   : > { %9012 = vst [vmem:[#allocation50_spill] sm:$0xff] %v6982_v5 }
 0x1b6   : > { %9013 = vst [vmem:[#allocation96_spill] sm:$0xff] %v6984_v40  ;;  %v1820_v3 = vpop.f32.mrf.mxu3  ;;  %v2370_v40 = vld [vmem:[#allocation2 + $0x4f] sm:$0xff] }
 0x1b7   : > { %v1875_v46 = vadd.f32 %v1820_v3, %v1621_v35  ;;  %v2624_v3 = vld [vmem:[#allocation2 + $0x50] sm:$0xff] }
 0x1b8   : > { %5692 = vmatmul.msk.bf16.gmra.mxu2 %vm9016_vm11, %v2431_v22  ;;  %v2402_v22 = vsel %vm9021_vm9, %v2370_v40, 0.0  ;;  %vm9026_vm11 = vmmov %vm9018_vm2 }
 0x1b9   : > { %v6992_v49 = vadd.f32 %v2042_v6, %v1875_v46  ;;  %v2625_v46 = vld [vmem:[#allocation2 + $0x58] sm:$0xff] }
 0x1bb   : > { %9017 = vst [vmem:[#allocation97_spill] sm:$0xff] %v6992_v49  ;;  %v2050_v30 = vpop.f32.mrf.mxu0  ;;  %5709 = vmatmul.msk.bf16.gmra.mxu3 %vm9009_vm6, %v2653_v58  ;;  %v1569_v7 = vpop.f32.mrf.mxu2  ;;  %v9022_v58 = vld [vmem:[#allocation53_spill] sm:$0xff]  ;;  %vm9027_vm6 = vmmov %vm9018_vm2 }
 0x1bc   : > { %v2304_v33 = vpop.f32.mrf.mxu1  ;;  %v1622_v26 = vadd.f32 %v1569_v7, %v9019_v63  ;;  %v2881_v7 = vsel %vm6527_vm1, %v6556_v57, 0.0 }
 0x1be   : > { %5727 = vmatmul.msk.bf16.gmra.mxu0 %vm9018_vm2, %v2908_v14  ;;  %v1823_v24 = vpop.f32.mrf.mxu3  ;;  %v2432_v14 = vpack.c.bf16 %v2371_v21, %v2402_v22  ;;  %v9028_v21 = vld [vmem:[#allocation55_spill] sm:$0xff] }
 0x1bf   : > { %v1876_v10 = vadd.f32 %v1823_v24, %v1622_v26  ;;  %v2654_v24 = vpack.c.bf16 %v2625_v46, %v2624_v3  ;;  %v2373_v46 = vld [vmem:[#allocation2 + $0x67] sm:$0xff] }
 0x1c1   : > { %v2098_v35 = vadd.f32 %v2045_v18, %v1876_v10  ;;  %v2909_v10 = vpack.c.bf16 %v2881_v7, %v6565_v20  ;;  %v9029_v20 = vld [vmem:[#allocation28_spill] sm:$0xff] }
 0x1c2   : > { %vm9030_vm1 = vnez %v9029_v20 }
 0x1c3   : > { %v2052_v12 = vpop.f32.mrf.mxu0  ;;  %v6999_v6 = vadd.f32 %v2299_v62, %v2098_v35  ;;  %v1571_v45 = vpop.f32.mrf.mxu2 }
 0x1c4   : > { %v1623_v49 = vadd.f32 %v1571_v45, %v9022_v58  ;;  %v7005_v26 = vpop.f32.mrf.mxu1  ;;  %v2372_v58 = vld [vmem:[#allocation2 + $0x5f] sm:$0xff] }
 0x1c5   : > { %9024 = vst [vmem:[#allocation52_spill] sm:$0xff] %v7005_v26 }
 0x1c6   : > { %v1825_v63 = vpop.f32.mrf.mxu3 }
 0x1c7   : > { %v1877_v18 = vadd.f32 %v1825_v63, %v1623_v49  ;;  %v2626_v63 = vld [vmem:[#allocation2 + $0x60] sm:$0xff] }
 0x1c8   : > { %5693 = vmatmul.msk.bf16.gmra.mxu2 %vm9018_vm2, %v2432_v14  ;;  %v2404_v14 = vsel %vm9030_vm1, %v2372_v58, 0.0 }
 0x1c9   : > { %v7009_v62 = vadd.f32 %v2047_v44, %v1877_v18  ;;  %v2627_v18 = vld [vmem:[#allocation2 + $0x68] sm:$0xff] }
 0x1cb   : > { %9025 = vst [vmem:[#allocation53_spill] sm:$0xff] %v7009_v62  ;;  %v2055_v40 = vpop.f32.mrf.mxu0  ;;  %5710 = vmatmul.msk.bf16.gmra.mxu3 %vm9026_vm11, %v2654_v24  ;;  %v1574_v35 = vpop.f32.mrf.mxu2  ;;  %v9032_v24 = vld [vmem:[#allocation56_spill] sm:$0xff]  ;;  %vm9036_vm11 = vmmov %vm9018_vm2 }
 0x1cc   : > { %v1624_v22 = vadd.f32 %v1574_v35, %v9028_v21  ;;  %v2309_v5 = vpop.f32.mrf.mxu1  ;;  %v2883_v21 = vsel %vm6561_vm4, %v6590_v11, 0.0 }
 0x1ce   : > { %5728 = vmatmul.msk.bf16.gmra.mxu0 %vm9027_vm6, %v2909_v10  ;;  %v1828_v57 = vpop.f32.mrf.mxu3  ;;  %v2433_v10 = vpack.c.bf16 %v2373_v46, %v2404_v14  ;;  %vm9037_vm6 = vmmov %vm9018_vm2  ;;  %v9038_v46 = vld [vmem:[#allocation58_spill] sm:$0xff] }
 0x1cf   : > { %v1878_v45 = vadd.f32 %v1828_v57, %v1624_v22 }
 0x1d1   : > { %v2100_v49 = vadd.f32 %v2050_v30, %v1878_v45  ;;  %v2655_v30 = vpack.c.bf16 %v2627_v18, %v2626_v63  ;;  %v2910_v45 = vpack.c.bf16 %v2883_v21, %v6599_v28  ;;  %v2375_v28 = vld [vmem:[#allocation2 + $0x77] sm:$0xff]  ;;  %v9039_v21 = vld [vmem:[#allocation33_spill] sm:$0xff] }
 0x1d3   : > { %v2057_v3 = vpop.f32.mrf.mxu0  ;;  %v7016_v44 = vadd.f32 %v2304_v33, %v2100_v49  ;;  %v1576_v7 = vpop.f32.mrf.mxu2 }
 0x1d4   : > { %v1625_v26 = vadd.f32 %v1576_v7, %v9032_v24  ;;  %v7026_v49 = vpop.f32.mrf.mxu1 }
 0x1d5   : > { %9031 = vst [vmem:[#allocation55_spill] sm:$0xff] %v7016_v44 }
 0x1d6   : > { %v1830_v22 = vpop.f32.mrf.mxu3  ;;  %9035 = vst [vmem:[#allocation98_spill] sm:$0xff] %v7026_v49  ;;  %v2629_v49 = vld [vmem:[#allocation2 + $0x78] sm:$0xff] }
 0x1d7   : > { %v1879_v57 = vadd.f32 %v1830_v22, %v1625_v26  ;;  %v2374_v26 = vld [vmem:[#allocation2 + $0x6f] sm:$0xff] }
 0x1d8   : > { %5694 = vmatmul.msk.bf16.gmra.mxu2 %vm9018_vm2, %v2433_v10  ;;  %vm9040_vm2 = vnez %v9039_v21  ;;  %v9056_v21 = vld [vmem:[#allocation69_spill] sm:$0xff] }
 0x1d9   : > { %v7024_v58 = vadd.f32 %v2052_v12, %v1879_v57  ;;  %v2406_v12 = vsel %vm9040_vm2, %v2374_v26, 0.0  ;;  %v2628_v57 = vld [vmem:[#allocation2 + $0x70] sm:$0xff]  ;;  %vm9047_vm2 = vmmov %vm9037_vm6 }
 0x1db   : > { %9034 = vst [vmem:[#allocation56_spill] sm:$0xff] %v7024_v58  ;;  %v2060_v33 = vpop.f32.mrf.mxu0  ;;  %5711 = vmatmul.msk.bf16.gmra.mxu3 %vm9036_vm11, %v2655_v30  ;;  %v1579_v7 = vpop.f32.mrf.mxu2  ;;  %v9042_v58 = vld [vmem:[#allocation59_spill] sm:$0xff]  ;;  %vm9045_vm11 = vmmov %vm9037_vm6 }
 0x1dc   : > { %v1626_v14 = vadd.f32 %v1579_v7, %v9038_v46  ;;  %v2314_v30 = vpop.f32.mrf.mxu1  ;;  %v2885_v46 = vsel %vm6595_vm8, %v6624_v38, 0.0 }
 0x1de   : > { %5729 = vmatmul.msk.bf16.gmra.mxu0 %vm9037_vm6, %v2910_v45  ;;  %v1833_v11 = vpop.f32.mrf.mxu3  ;;  %v2434_v45 = vpack.c.bf16 %v2375_v28, %v2406_v12 }
 0x1df   : > { %v1880_v24 = vadd.f32 %v1833_v11, %v1626_v14  ;;  %v2656_v11 = vpack.c.bf16 %v2629_v49, %v2628_v57 }
 0x1e1   : > { %v2102_v63 = vadd.f32 %v2055_v40, %v1880_v24  ;;  %v9044_v24 = vld [vmem:[#allocation64_spill] sm:$0xff] }
 0x1e2   : > { %v2911_v20 = vpack.c.bf16 %v2885_v46, %v9044_v24  ;;  %v2377_v46 = vld [vmem:[#allocation2 + $0x87] sm:$0xff] }
 0x1e3   : > { %v2062_v18 = vpop.f32.mrf.mxu0  ;;  %v7033_v10 = vadd.f32 %v2309_v5, %v2102_v63  ;;  %v1581_v22 = vpop.f32.mrf.mxu2  ;;  %v2631_v24 = vld [vmem:[#allocation2 + $0x88] sm:$0xff] }
 0x1e4   : > { %v1627_v44 = vadd.f32 %v1581_v22, %v9042_v58  ;;  %v9048_v58 = vld [vmem:[#allocation61_spill] sm:$0xff]  ;;  %v7046_v22 = vpop.f32.mrf.mxu1 }
 0x1e5   : > { %9041 = vst [vmem:[#allocation58_spill] sm:$0xff] %v7033_v10 }
 0x1e6   : > { %v1835_v14 = vpop.f32.mrf.mxu3  ;;  %9049 = vst [vmem:[#allocation64_spill] sm:$0xff] %v7046_v22 }
 0x1e7   : > { %v1881_v40 = vadd.f32 %v1835_v14, %v1627_v44  ;;  %v2376_v44 = vld [vmem:[#allocation2 + $0x7f] sm:$0xff] }
 0x1e8   : > { %5695 = vmatmul.msk.bf16.gmra.mxu2 %vm9045_vm11, %v2434_v45  ;;  %v9050_v14 = vld [vmem:[#allocation39_spill] sm:$0xff] }
 0x1e9   : > { %v7041_v5 = vadd.f32 %v2057_v3, %v1881_v40  ;;  %vm9051_vm11 = vnez %v9050_v14 }
 0x1ea   : > { %v2408_v3 = vsel %vm9051_vm11, %v2376_v44, 0.0  ;;  %vm9059_vm11 = vmmov %vm9047_vm2 }
 0x1eb   : > { %9046 = vst [vmem:[#allocation59_spill] sm:$0xff] %v7041_v5  ;;  %v2065_v26 = vpop.f32.mrf.mxu0  ;;  %5712 = vmatmul.msk.bf16.gmra.mxu3 %vm9037_vm6, %v2656_v11  ;;  %v1584_v63 = vpop.f32.mrf.mxu2  ;;  %v2630_v11 = vld [vmem:[#allocation2 + $0x80] sm:$0xff]  ;;  %v9053_v5 = vld [vmem:[#allocation62_spill] sm:$0xff]  ;;  %v2435_v10 = vpack.c.bf16 %v2377_v46, %v2408_v3  ;;  %vm9058_vm6 = vmmov %vm9047_vm2 }
 0x1ec   : > { %v1628_v28 = vadd.f32 %v1584_v63, %v9048_v58  ;;  %v9054_v63 = vld [vmem:[#allocation66_spill] sm:$0xff] }
 0x1ed   : > { %v2887_v22 = vsel %vm6629_vm10, %v9054_v63, 0.0  ;;  %v2378_v63 = vld [vmem:[#allocation2 + $0x8f] sm:$0xff] }
 0x1ee   : > { %5730 = vmatmul.msk.bf16.gmra.mxu0 %vm9047_vm2, %v2911_v20  ;;  %v1838_v12 = vpop.f32.mrf.mxu3  ;;  %v2912_v62 = vpack.c.bf16 %v2887_v22, %v9056_v21 }
 0x1ef   : > { %v1882_v38 = vadd.f32 %v1838_v12, %v1628_v28 }
 0x1f1   : > { %v2104_v49 = vadd.f32 %v2060_v33, %v1882_v38  ;;  %v2657_v33 = vpack.c.bf16 %v2631_v24, %v2630_v11  ;;  %v2319_v38 = vpop.f32.mrf.mxu1  ;;  %v2379_v24 = vld [vmem:[#allocation2 + $0x97] sm:$0xff] }
 0x1f3   : > { %v2067_v57 = vpop.f32.mrf.mxu0  ;;  %v7050_v45 = vadd.f32 %v2314_v30, %v2104_v49  ;;  %v1586_v40 = vpop.f32.mrf.mxu2 }
 0x1f4   : > { %v1629_v20 = vadd.f32 %v1586_v40, %v9053_v5  ;;  %v9060_v5 = vld [vmem:[#allocation65_spill] sm:$0xff] }
 0x1f5   : > { %9052 = vst [vmem:[#allocation61_spill] sm:$0xff] %v7050_v45 }
 0x1f6   : > { %v1840_v28 = vpop.f32.mrf.mxu3 }
 0x1f7   : > { %v1883_v12 = vadd.f32 %v1840_v28, %v1629_v20  ;;  %v9061_v28 = vld [vmem:[#allocation44_spill] sm:$0xff] }
 0x1f8   : > { %5696 = vmatmul.msk.bf16.gmra.mxu2 %vm9047_vm2, %v2435_v10  ;;  %vm9062_vm1 = vnez %v9061_v28 }
 0x1f9   : > { %v7058_v30 = vadd.f32 %v2062_v18, %v1883_v12  ;;  %v2410_v21 = vsel %vm9062_vm1, %v2378_v63, 0.0  ;;  %v7065_v10 = vpop.f32.mrf.mxu1  ;;  %v2632_v12 = vld [vmem:[#allocation2 + $0x90] sm:$0xff] }
 0x1fa   : > { %9063 = vst [vmem:[#allocation66_spill] sm:$0xff] %v7065_v10  ;;  %v2436_v45 = vpack.c.bf16 %v2379_v24, %v2410_v21 }
 0x1fb   : > { %9057 = vst [vmem:[#allocation62_spill] sm:$0xff] %v7058_v30  ;;  %v2070_v44 = vpop.f32.mrf.mxu0  ;;  %5713 = vmatmul.msk.bf16.gmra.mxu3 %vm9058_vm6, %v2657_v33  ;;  %v1589_v49 = vpop.f32.mrf.mxu2  ;;  %v2633_v33 = vld [vmem:[#allocation2 + $0x98] sm:$0xff]  ;;  %vm9069_vm6 = vmmov %vm9047_vm2 }
 0x1fc   : > { %v1630_v46 = vadd.f32 %v1589_v49, %v9060_v5  ;;  %v9065_v30 = vld [vmem:[#allocation67_spill] sm:$0xff]  ;;  %v2889_v5 = vsel %vm6663_vm12, %v6692_v54, 0.0 }
 0x1fe   : > { %5731 = vmatmul.msk.bf16.gmra.mxu0 %vm9059_vm11, %v2912_v62  ;;  %v1843_v3 = vpop.f32.mrf.mxu3  ;;  %vm9067_vm11 = vmmov %vm9047_vm2 }
 0x1ff   : > { %v1884_v40 = vadd.f32 %v1843_v3, %v1630_v46  ;;  %v2658_v3 = vpack.c.bf16 %v2633_v33, %v2632_v12  ;;  %v3313_v33 = vld [vmem:[#allocation3 + $0x10] sm:$0xff] }
 0x201   : > { %v2106_v20 = vadd.f32 %v2065_v26, %v1884_v40  ;;  %v2913_v40 = vpack.c.bf16 %v2889_v5, %v6701_v9  ;;  %v2324_v10 = vpop.f32.mrf.mxu1  ;;  %v3314_v9 = vld [vmem:[#allocation3 + $0x18] sm:$0xff]  ;;  %v2381_v5 = vld [vmem:[#allocation2 + $0xa7] sm:$0xff] }
 0x203   : > { %v2072_v11 = vpop.f32.mrf.mxu0  ;;  %v7067_v18 = vadd.f32 %v2319_v38, %v2106_v20  ;;  %v1591_v22 = vpop.f32.mrf.mxu2 }
 0x204   : > { %v1631_v62 = vadd.f32 %v1591_v22, %v9065_v30  ;;  %v9070_v30 = vld [vmem:[#allocation70_spill] sm:$0xff]  ;;  %v2380_v22 = vld [vmem:[#allocation2 + $0x9f] sm:$0xff] }
 0x205   : > { %9064 = vst [vmem:[#allocation69_spill] sm:$0xff] %v7067_v18  ;;  %v2635_v18 = vld [vmem:[#allocation2 + $0xa8] sm:$0xff] }
 0x206   : > { %v1845_v26 = vpop.f32.mrf.mxu3 }
 0x207   : > { %v1885_v46 = vadd.f32 %v1845_v26, %v1631_v62  ;;  %v3345_v26 = vpack.c.bf16 %v3314_v9, %v3313_v33  ;;  %v3312_v9 = vld [vmem:[%s8608_s4] sm:$0xf] }
 0x208   : > { %5697 = vmatmul.msk.bf16.gmra.mxu2 %vm9067_vm11, %v2436_v45  ;;  %v9071_v45 = vld [vmem:[#allocation46_spill] sm:$0xff] }
 0x209   : > { %v7075_v63 = vadd.f32 %v2067_v57, %v1885_v46  ;;  %vm9072_vm11 = vnez %v9071_v45  ;;  %5742 = vmatmul.msk.bf16.vlgmr.msra.gmra.mxu1 %vm9047_vm2, %v3345_v26  ;;  %v2382_v26 = vld [vmem:[#allocation2 + $0xaf] sm:$0xff] }
 0x20a   : > { %v2412_v57 = vsel %vm9072_vm11, %v2380_v22, 0.0 }
 0x20b   : > { %9068 = vst [vmem:[#allocation65_spill] sm:$0xff] %v7075_v63  ;;  %v2075_v38 = vpop.f32.mrf.mxu0  ;;  %5714 = vmatmul.msk.bf16.gmra.mxu3 %vm9047_vm2, %v2658_v3  ;;  %v1594_v20 = vpop.f32.mrf.mxu2  ;;  %v2634_v63 = vld [vmem:[#allocation2 + $0xa0] sm:$0xff] }
 0x20c   : > { %v1632_v24 = vadd.f32 %v1594_v20, %v9070_v30  ;;  %v2437_v30 = vpack.c.bf16 %v2381_v5, %v2412_v57  ;;  %v2659_v22 = vpack.c.bf16 %v2635_v18, %v2634_v63 }
 0x20e   : > { %5732 = vmatmul.msk.bf16.gmra.mxu0 %vm9069_vm6, %v2913_v40  ;;  %v1848_v21 = vpop.f32.mrf.mxu3  ;;  %v9073_v40 = vld [vmem:[#allocation71_spill] sm:$0xff]  ;;  %vm9076_vm6 = vmmov %vm9047_vm2  ;;  %vm9078_vm2 = vcmask 1043456  }
 0x20f   : > { %v1886_v54 = vadd.f32 %v1848_v21, %v1632_v24  ;;  %v2891_v24 = vsel %vm6697_vm14, %v6726_v36, 0.0  ;;  %v5774_v36 = vld [vmem:[%s8608_s4 + $0x8] sm:$0xf]  ;;  %v3552_v5 = vsel %vm9078_vm2, %v3312_v9, 0  ;;  %vm9079_vm11 = vmmov %vm9078_vm2 }
 0x210   : > { %v3774_v57 = vsel %vm9079_vm11, %v5774_v36, 0  ;;  %vm9080_vm1 = vmmov %vm9076_vm6  ;;  %3561 = vmatpush.bf16.msrb.mxu2 %v3552_v5 }
 0x211   : > { %v2108_v62 = vadd.f32 %v2070_v44, %v1886_v54  ;;  %v7089_v54 = vpop.f32.mrf.mxu1  ;;  %3783 = vmatpush.bf16.msrb.mxu3 %v3774_v57  ;;  %vm9085_vm11 = vmmov %vm9078_vm2  ;;  %v2636_v57 = vld [vmem:[#allocation2 + $0xb0] sm:$0xff] }
 0x212   : > { %9075 = vst [vmem:[#allocation67_spill] sm:$0xff] %v7089_v54 }
 0x213   : > { %v2077_v12 = vpop.f32.mrf.mxu0  ;;  %v7082_v46 = vadd.f32 %v2324_v10, %v2108_v62  ;;  %v1596_v3 = vpop.f32.mrf.mxu2  ;;  %v2914_v10 = vpack.c.bf16 %v2891_v24, %v6735_v48  ;;  %v5808_v24 = vld [vmem:[%s8608_s4 + $0x10] sm:$0xf] }
 0x214   : > { %v1633_v20 = vadd.f32 %v1596_v3, %v9073_v40  ;;  %v4250_v36 = vsel %vm9078_vm2, %v5808_v24, 0 }
 0x215   : > { %4259 = vmatpush.bf16.msrb.mxu1 %v4250_v36  ;;  %v2385_v36 = vld [vmem:[#allocation2 + $0xc7] sm:$0xff] }
 0x216   : > { %v1850_v21 = vpop.f32.mrf.mxu3 }
 0x217   : > { %v1887_v45 = vadd.f32 %v1850_v21, %v1633_v20  ;;  %v2383_v21 = vld [vmem:[#allocation2 + $0xb7] sm:$0xff] }
 0x218   : > { %5698 = vmatmul.msk.bf16.gmra.mxu2 %vm9076_vm6, %v2437_v30  ;;  %vm9081_vm6 = vmmov %vm9080_vm1  ;;  %v5791_v30 = vld [vmem:[%s8608_s4 + $0xc] sm:$0xf] }
 0x219   : > { %v7093_v62 = vadd.f32 %v2072_v11, %v1887_v45  ;;  %v9082_v11 = vld [vmem:[#allocation73_spill] sm:$0xff]  ;;  %v2329_v3 = vpop.f32.mrf.mxu1  ;;  %v4028_v9 = vsel %vm9085_vm11, %v5791_v30, 0  ;;  %vm9089_vm11 = vmmov %vm9081_vm6 }
 0x21a   : > { %4037 = vmatpush.bf16.msrb.mxu0 %v4028_v9  ;;  %vm9090_vm2 = vmmov %vm9081_vm6 }
 0x21b   : > { %9077 = vst [vmem:[#allocation70_spill] sm:$0xff] %v7093_v62  ;;  %v2984_v33 = vpop.f32.mrf.mxu0  ;;  %5715 = vmatmul.msk.bf16.gmra.mxu3 %vm9080_vm1, %v2659_v22  ;;  %v1599_v48 = vpop.f32.mrf.mxu2  ;;  %v9083_v22 = vld [vmem:[#allocation15_spill] sm:$0xff] }
 0x21c   : > { %v1634_v18 = vadd.f32 %v1599_v48, %v9082_v11  ;;  %vm9084_vm1 = vnez %v9083_v22  ;;  %v2637_v48 = vld [vmem:[#allocation2 + $0xb8] sm:$0xff]  ;;  %v9087_v11 = vld [vmem:[#allocation74_spill] sm:$0xff] }
 0x21d   : > { %v2660_v62 = vpack.c.bf16 %v2637_v48, %v2636_v57 }
 0x21e   : > { %5733 = vmatmul.msk.bf16.gmra.mxu0 %vm9081_vm6, %v2914_v10  ;;  %v1853_v63 = vpop.f32.mrf.mxu3  ;;  %v2414_v10 = vsel %vm9084_vm1, %v2382_v26, 0.0 }
 0x21f   : > { %v1888_v45 = vadd.f32 %v1853_v63, %v1634_v18  ;;  %v2438_v63 = vpack.c.bf16 %v2383_v21, %v2414_v10 }
 0x221   : > { %v2110_v40 = vadd.f32 %v2075_v38, %v1888_v45  ;;  %v2893_v45 = vsel %vm6731_vm0, %v6758_v13, 0.0  ;;  %v7132_v13 = vld [vmem:[%s8606_s2] ss:$0 sm:$0xff]  ;;  %vm9097_vm0 = vmmov %vm9090_vm2 }
 0x222   : > { %v2915_v30 = vpack.c.bf16 %v2893_v45, %v6765_v37  ;;  %v2384_v37 = vld [vmem:[#allocation2 + $0xbf] sm:$0xff]  ;;  %v9093_v45 = vld [vmem:[#allocation77_spill] sm:$0xff]  ;;  %vm9098_vm1 = vmmov %vm9097_vm0 }
 0x223   : > { %v2986_v20 = vpop.f32.mrf.mxu0  ;;  %v7116_v5 = vadd.f32 %v2329_v3, %v2110_v40  ;;  %v1601_v38 = vpop.f32.mrf.mxu2 }
 0x224   : > { %v1635_v18 = vadd.f32 %v1601_v38, %v9087_v11  ;;  %v9091_v38 = vld [vmem:[#allocation22_spill] sm:$0xff]  ;;  %v2638_v11 = vld [vmem:[#allocation2 + $0xc0] sm:$0xff] }
 0x225   : > { %9086 = vst [vmem:[#allocation71_spill] sm:$0xff] %v7116_v5 }
 0x226   : > { %v1855_v54 = vpop.f32.mrf.mxu3 }
 0x227   : > { %v1889_v26 = vadd.f32 %v1855_v54, %v1635_v18  ;;  %v2639_v18 = vld [vmem:[#allocation2 + $0xc8] sm:$0xff] }
 0x228   : > { %5699 = vmatmul.msk.bf16.gmra.mxu2 %vm9081_vm6, %v2438_v63  ;;  %vm9092_vm6 = vnez %v9091_v38 }
 0x229   : > { %v7124_v3 = vadd.f32 %v2077_v12, %v1889_v26  ;;  %v7137_v12 = vld [vmem:[%s8607_s3] ss:$0 sm:$0xff]  ;;  %v2416_v57 = vsel %vm9092_vm6, %v2384_v37, 0.0  ;;  %vm9096_vm6 = vmmov %vm9090_vm2 }
 0x22b   : > { %9088 = vst [vmem:[#allocation73_spill] sm:$0xff] %v7124_v3  ;;  %v2989_v40 = vpop.f32.mrf.mxu0  ;;  %5716 = vmatmul.msk.bf16.gmra.mxu3 %vm9089_vm11, %v2660_v62  ;;  %v2508_v24 = vpop.f32.mrf.mxu2  ;;  %v2661_v3 = vpack.c.bf16 %v2639_v18, %v2638_v11  ;;  %v2386_v18 = vld [vmem:[#allocation2 + $0xcf] sm:$0xff] }
 0x22c   : > { %v2588_v21 = vadd.f32 %v2508_v24, %v6751_v61 }
 0x22e   : > { %5734 = vmatmul.msk.bf16.gmra.mxu0 %vm9090_vm2, %v2915_v30  ;;  %v2730_v10 = vpop.f32.mrf.mxu3  ;;  %v9094_v30 = vld [vmem:[#allocation76_spill] sm:$0xff] }
 0x22f   : > { %v2810_v9 = vadd.f32 %v2730_v10, %v2588_v21  ;;  %vm9095_vm11 = vnez %v9094_v30 }
 0x230   : > { %v2895_v24 = vsel %vm9095_vm11, %v6789_v43, 0.0 }
 0x231   : > { %v3064_v54 = vadd.f32 %v2984_v33, %v2810_v9  ;;  %v2439_v33 = vpack.c.bf16 %v2385_v36, %v2416_v57  ;;  %v2916_v37 = vpack.c.bf16 %v2895_v24, %v6795_v1  ;;  %v2640_v24 = vld [vmem:[#allocation2 + $0xd0] sm:$0xff] }
 0x233   : > { %v2991_v62 = vpop.f32.mrf.mxu0  ;;  %v3100_v61 = vmul.f32 %v7132_v13, %v3064_v54  ;;  %v2510_v48 = vpop.f32.mrf.mxu2 }
 0x234   : > { %v2589_v26 = vadd.f32 %v2510_v48, %v9093_v45  ;;  %v2387_v45 = vld [vmem:[#allocation2 + $0xd7] sm:$0xff] }
 0x235   : > { %v3136_v63 = vadd.f32 %v7137_v12, %v3100_v61 }
 0x236   : > { %v2732_v21 = vpop.f32.mrf.mxu3 }
 0x237   : > { %v3168_v10 = vmax.f32 %v3136_v63, 0.0  ;;  %v2811_v9 = vadd.f32 %v2732_v21, %v2589_v26  ;;  %v2641_v21 = vld [vmem:[#allocation2 + $0xd8] sm:$0xff] }
 0x238   : > { %5700 = vmatmul.msk.bf16.gmra.mxu2 %vm9096_vm6, %v2439_v33  ;;  %vm9100_vm6 = vnez %v8829_v25 }
 0x239   : > { %3200 = vst.msk [vmem:[#allocation3 + $0x20] sm:$0xff] %vm9090_vm2, %v3168_v10  ;;  %v3065_v54 = vadd.f32 %v2986_v20, %v2811_v9  ;;  %vm9099_vm2 = vmmov %vm9097_vm0  ;;  %v2418_v26 = vsel %vm9100_vm6, %v2386_v18, 0.0 }
 0x23a   : > { %vm9105_vm6 = vmmov %vm9098_vm1 }
 0x23b   : > { %v2994_v5 = vpop.f32.mrf.mxu0  ;;  %v3101_v61 = vmul.f32 %v7132_v13, %v3065_v54  ;;  %5717 = vmatmul.msk.bf16.gmra.mxu3 %vm9097_vm0, %v2661_v3  ;;  %v2513_v36 = vpop.f32.mrf.mxu2  ;;  %v9102_v54 = vld [vmem:[#allocation78_spill] sm:$0xff] }
 0x23c   : > { %v2590_v57 = vadd.f32 %v2513_v36, %v6783_v27  ;;  %v9101_v27 = vld [vmem:[#allocation79_spill] sm:$0xff]  ;;  %vm9103_vm0 = vnez %v9102_v54 }
 0x23d   : > { %v3137_v43 = vadd.f32 %v7137_v12, %v3101_v61  ;;  %v2897_v61 = vsel %vm9103_vm0, %v6819_v32, 0.0  ;;  %vm9106_vm0 = vmmov %vm9098_vm1 }
 0x23e   : > { %5735 = vmatmul.msk.bf16.gmra.mxu0 %vm9098_vm1, %v2916_v37  ;;  %v2735_v48 = vpop.f32.mrf.mxu3  ;;  %v2440_v37 = vpack.c.bf16 %v2387_v45, %v2418_v26  ;;  %vm9107_vm11 = vmmov %vm9106_vm0 }
 0x23f   : > { %v3169_v11 = vmax.f32 %v3137_v43, 0.0  ;;  %v2812_v1 = vadd.f32 %v2735_v48, %v2590_v57  ;;  %v2662_v57 = vpack.c.bf16 %v2641_v21, %v2640_v24  ;;  %v2388_v21 = vld [vmem:[#allocation2 + $0xdf] sm:$0xff] }
 0x240   : > { %v3315_v48 = vld [vmem:[#allocation3 + $0x20] sm:$0xff] }
 0x241   : > { %3201 = vst.msk [vmem:[#allocation3 + $0x28] sm:$0xff] %vm9099_vm2, %v3169_v11  ;;  %v3066_v20 = vadd.f32 %v2989_v40, %v2812_v1  ;;  %v2917_v1 = vpack.c.bf16 %v2897_v61, %v6825_v17  ;;  %vm9104_vm2 = vmmov %vm9098_vm1 }
 0x243   : > { %v2996_v63 = vpop.f32.mrf.mxu0  ;;  %v3102_v3 = vmul.f32 %v7132_v13, %v3066_v20  ;;  %v2515_v33 = vpop.f32.mrf.mxu2 }
 0x244   : > { %v2591_v9 = vadd.f32 %v2515_v33, %v9101_v27 }
 0x245   : > { %v3138_v10 = vadd.f32 %v7137_v12, %v3102_v3 }
 0x246   : > { %v2737_v40 = vpop.f32.mrf.mxu3 }
 0x247   : > { %v3170_v36 = vmax.f32 %v3138_v10, 0.0  ;;  %v2813_v43 = vadd.f32 %v2737_v40, %v2591_v9  ;;  %v2389_v9 = vld [vmem:[#allocation2 + $0xe7] sm:$0xff] }
 0x248   : > { %v3316_v11 = vld [vmem:[#allocation3 + $0x28] sm:$0xff]  ;;  %5701 = vmatmul.msk.bf16.gmra.mxu2 %vm9104_vm2, %v2440_v37  ;;  %vm9112_vm2 = vmmov %vm9106_vm0 }
 0x249   : > { %3202 = vst.msk [vmem:[#allocation3 + $0x30] sm:$0xff] %vm9098_vm1, %v3170_v36  ;;  %v3067_v18 = vadd.f32 %v2991_v62, %v2813_v43  ;;  %v3346_v20 = vpack.c.bf16 %v3316_v11, %v3315_v48  ;;  %vm9108_vm1 = vmmov %vm9106_vm0  ;;  %v2642_v36 = vld [vmem:[#allocation2 + $0xe0] sm:$0xff]  ;;  %v2643_v43 = vld [vmem:[#allocation2 + $0xe8] sm:$0xff] }
 0x24a   : > { %v9110_v11 = vld [vmem:[#allocation80_spill] sm:$0xff] }
 0x24b   : > { %v2999_v3 = vpop.f32.mrf.mxu0  ;;  %v3103_v45 = vmul.f32 %v7132_v13, %v3067_v18  ;;  %5718 = vmatmul.msk.bf16.gmra.mxu3 %vm9105_vm6, %v2662_v57  ;;  %5743 = vmatmul.msk.bf16.gmra.mxu1 %vm9106_vm0, %v3346_v20  ;;  %v2518_v32 = vpop.f32.mrf.mxu2  ;;  %vm9109_vm6 = vnez %v8838_v16 }
 0x24c   : > { %v2592_v17 = vadd.f32 %v2518_v32, %v6813_v23  ;;  %v2420_v37 = vsel %vm9109_vm6, %v2388_v21, 0.0  ;;  %vm9114_vm6 = vmmov %vm9106_vm0 }
 0x24d   : > { %v3139_v26 = vadd.f32 %v7137_v12, %v3103_v45  ;;  %v2441_v48 = vpack.c.bf16 %v2389_v9, %v2420_v37  ;;  %v2663_v45 = vpack.c.bf16 %v2643_v43, %v2642_v36 }
 0x24e   : > { %5736 = vmatmul.msk.bf16.gmra.mxu0 %vm9107_vm11, %v2917_v1  ;;  %v2740_v33 = vpop.f32.mrf.mxu3  ;;  %vm9111_vm11 = vnez %v9110_v11 }
 0x24f   : > { %v3171_v24 = vmax.f32 %v3139_v26, 0.0  ;;  %v2814_v62 = vadd.f32 %v2740_v33, %v2592_v17  ;;  %v2899_v1 = vsel %vm9111_vm11, %v6851_v29, 0.0  ;;  %vm9115_vm11 = vmmov %vm9106_vm0 }
 0x250   : > { %v3317_v32 = vld [vmem:[#allocation3 + $0x30] sm:$0xff]  ;;  %v2918_v17 = vpack.c.bf16 %v2899_v1, %v6857_v4 }
 0x251   : > { %3203 = vst.msk [vmem:[#allocation3 + $0x38] sm:$0xff] %vm9108_vm1, %v3171_v24  ;;  %v3068_v10 = vadd.f32 %v2994_v5, %v2814_v62  ;;  %vm9113_vm1 = vmmov %vm9106_vm0 }
 0x253   : > { %v3001_v27 = vpop.f32.mrf.mxu0  ;;  %v3104_v61 = vmul.f32 %v7132_v13, %v3068_v10  ;;  %v2520_v40 = vpop.f32.mrf.mxu2  ;;  %v9116_v10 = vld [vmem:[#allocation81_spill] sm:$0xff] }
 0x254   : > { %v2593_v23 = vadd.f32 %v2520_v40, %v6832_v60 }
 0x255   : > { %v3140_v57 = vadd.f32 %v7137_v12, %v3104_v61  ;;  %v2390_v61 = vld [vmem:[#allocation2 + $0xef] sm:$0xff] }
 0x256   : > { %v2742_v5 = vpop.f32.mrf.mxu3 }
 0x257   : > { %v3172_v18 = vmax.f32 %v3140_v57, 0.0  ;;  %v2815_v20 = vadd.f32 %v2742_v5, %v2593_v23  ;;  %v2391_v57 = vld [vmem:[#allocation2 + $0xf7] sm:$0xff] }
 0x258   : > { %v3318_v26 = vld [vmem:[#allocation3 + $0x38] sm:$0xff]  ;;  %5702 = vmatmul.msk.bf16.gmra.mxu2 %vm9112_vm2, %v2441_v48  ;;  %v9117_v23 = vld [vmem:[#allocation38_spill] sm:$0xff]  ;;  %vm9123_vm2 = vmmov %vm9106_vm0 }
 0x259   : > { %3204 = vst.msk [vmem:[#allocation3 + $0x40] sm:$0xff] %vm9106_vm0, %v3172_v18  ;;  %v3069_v33 = vadd.f32 %v2996_v63, %v2815_v20  ;;  %v3347_v24 = vpack.c.bf16 %v3318_v26, %v3317_v32  ;;  %v4375_v5 = vld [vmem:[#allocation3 + $0x31] sm:$0xff] }
 0x25a   : > { %v2645_v32 = vld [vmem:[#allocation2 + $0xf8] sm:$0xff] }
 0x25b   : > { %v3004_v60 = vpop.f32.mrf.mxu0  ;;  %v3105_v62 = vmul.f32 %v7132_v13, %v3069_v33  ;;  %5719 = vmatmul.msk.bf16.gmra.mxu3 %vm9113_vm1, %v2663_v45  ;;  %5744 = vmatmul.msk.bf16.gmra.mxu1 %vm9114_vm6, %v3347_v24  ;;  %v2523_v29 = vpop.f32.mrf.mxu2  ;;  %vm9118_vm6 = vnez %v9117_v23  ;;  %v2644_v45 = vld [vmem:[#allocation2 + $0xf0] sm:$0xff]  ;;  %vm9124_vm1 = vmmov %vm9106_vm0 }
 0x25c   : > { %v2594_v4 = vadd.f32 %v2523_v29, %v9116_v10  ;;  %v2422_v48 = vsel %vm9118_vm6, %v2390_v61, 0.0  ;;  %v2901_v29 = vsel %vm6853_vm5, %v6892_v50, 0.0  ;;  %vm9125_vm6 = vmmov %vm9106_vm0 }
 0x25d   : > { %v3141_v21 = vadd.f32 %v7137_v12, %v3105_v62  ;;  %v2442_v24 = vpack.c.bf16 %v2391_v57, %v2422_v48  ;;  %v2919_v61 = vpack.c.bf16 %v2901_v29, %v6898_v52  ;;  %v9129_v29 = vld [vmem:[#allocation89_spill] sm:$0xff] }
 0x25e   : > { %5737 = vmatmul.msk.bf16.gmra.mxu0 %vm9115_vm11, %v2918_v17  ;;  %v2745_v9 = vpop.f32.mrf.mxu3  ;;  %v9120_v17 = vld [vmem:[#allocation86_spill] sm:$0xff]  ;;  %vm9122_vm11 = vmmov %vm9106_vm0 }
 0x25f   : > { %v3173_v37 = vmax.f32 %v3141_v21, 0.0  ;;  %v2816_v63 = vadd.f32 %v2745_v9, %v2594_v4  ;;  %v2664_v9 = vpack.c.bf16 %v2645_v32, %v2644_v45 }
 0x260   : > { %v4376_v43 = vld [vmem:[#allocation3 + $0x39] sm:$0xff] }
 0x261   : > { %3205 = vst.msk [vmem:[#allocation3 + $0x48] sm:$0xff] %vm9106_vm0, %v3173_v37  ;;  %v3070_v40 = vadd.f32 %v2999_v3, %v2816_v63  ;;  %v5136_v18 = vsel %vm6437_vm13, %v4376_v43, 0.0  ;;  %v3319_v37 = vld [vmem:[#allocation3 + $0x40] sm:$0xff] }
 0x262   : > { %v7199_v26 = vpack.c.bf16 %v5136_v18, %v4375_v5  ;;  %v2392_v18 = vld [vmem:[#allocation2 + $0xff] sm:$0xff] }
 0x263   : > { %v7192_v36 = vpop.f32.mrf.mxu0  ;;  %v3106_v1 = vmul.f32 %v7132_v13, %v3070_v40  ;;  %v2525_v20 = vpop.f32.mrf.mxu2 }
 0x264   : > { %9119 = vst [vmem:[#allocation15_spill] sm:$0xff] %v7199_v26  ;;  %v2595_v33 = vadd.f32 %v2525_v20, %v9120_v17  ;;  %v9127_v17 = vld [vmem:[#allocation43_spill] sm:$0xff] }
 0x265   : > { %v3142_v3 = vadd.f32 %v7137_v12, %v3106_v1 }
 0x266   : > { %v2747_v21 = vpop.f32.mrf.mxu3 }
 0x267   : > { %v3174_v10 = vmax.f32 %v3142_v3, 0.0  ;;  %v2817_v4 = vadd.f32 %v2747_v21, %v2595_v33  ;;  %v2393_v3 = vld [vmem:[#allocation2 + $0x107] sm:$0xff]  ;;  %v9130_v21 = vld [vmem:[#allocation82_spill] sm:$0xff] }
 0x268   : > { %v3320_v63 = vld [vmem:[#allocation3 + $0x48] sm:$0xff]  ;;  %5703 = vmatmul.msk.bf16.gmra.mxu2 %vm9123_vm2, %v2442_v24  ;;  %vm9128_vm2 = vnez %v9127_v17 }
 0x269   : > { %3206 = vst.msk [vmem:[#allocation3 + $0x50] sm:$0xff] %vm9122_vm11, %v3174_v10  ;;  %v3071_v40 = vadd.f32 %v3001_v27, %v2817_v4  ;;  %v3348_v43 = vpack.c.bf16 %v3320_v63, %v3319_v37  ;;  %vm9126_vm11 = vmmov %vm9106_vm0  ;;  %v2424_v33 = vsel %vm9128_vm2, %v2392_v18, 0.0  ;;  %v2343_v10 = vadd.f32 %v9130_v21, %v9129_v29  ;;  %v2646_v37 = vld [vmem:[#allocation2 + $0x100] sm:$0xff]  ;;  %v2647_v63 = vld [vmem:[#allocation2 + $0x108] sm:$0xff] }
 0x26a   : > { %vm9136_vm2 = vmmov %vm9106_vm0  ;;  %v7368_v26 = vld [vmem:[#allocation3 + $0x47] sm:$0xff] }
 0x26b   : > { %v3009_v1 = vpop.f32.mrf.mxu0  ;;  %v3107_v57 = vmul.f32 %v7132_v13, %v3071_v40  ;;  %5720 = vmatmul.msk.bf16.gmra.mxu3 %vm9124_vm1, %v2664_v9  ;;  %5745 = vmatmul.msk.bf16.gmra.mxu1 %vm9106_vm0, %v3348_v43  ;;  %v2528_v50 = vpop.f32.mrf.mxu2  ;;  %v2443_v9 = vpack.c.bf16 %v2393_v3, %v2424_v33  ;;  %vm9134_vm1 = vmmov %vm9106_vm0 }
 0x26c   : > { %v2596_v52 = vadd.f32 %v2528_v50, %v6884_v0 }
 0x26d   : > { %v3143_v48 = vadd.f32 %v7137_v12, %v3107_v57  ;;  %v9131_v57 = vld [vmem:[#allocation88_spill] sm:$0xff] }
 0x26e   : > { %5738 = vmatmul.msk.bf16.gmra.mxu0 %vm9125_vm6, %v2919_v61  ;;  %v2750_v5 = vpop.f32.mrf.mxu3  ;;  %v4377_v61 = vld [vmem:[#allocation3 + $0x41] sm:$0xff]  ;;  %vm9132_vm6 = vnez %v9131_v57 }
 0x26f   : > { %v3175_v27 = vmax.f32 %v3143_v48, 0.0  ;;  %v2818_v20 = vadd.f32 %v2750_v5, %v2596_v52  ;;  %v2903_v50 = vsel %vm9132_vm6, %v6923_v51, 0.0  ;;  %vm9137_vm6 = vmmov %vm9106_vm0 }
 0x270   : > { %v4378_v24 = vld [vmem:[#allocation3 + $0x49] sm:$0xff]  ;;  %v2920_v3 = vpack.c.bf16 %v2903_v50, %v6929_v47 }
 0x271   : > { %3207 = vst.msk [vmem:[#allocation3 + $0x58] sm:$0xff] %vm9126_vm11, %v3175_v27  ;;  %v3072_v45 = vadd.f32 %v3004_v60, %v2818_v20  ;;  %v5138_v60 = vsel %vm9007_vm15, %v4378_v24, 0.0  ;;  %v2665_v27 = vpack.c.bf16 %v2647_v63, %v2646_v37  ;;  %v3321_v20 = vld [vmem:[#allocation3 + $0x50] sm:$0xff]  ;;  %vm9135_vm11 = vmmov %vm9106_vm0 }
 0x272   : > { %v7229_v48 = vpack.c.bf16 %v5138_v60, %v4377_v61  ;;  %v2394_v37 = vld [vmem:[#allocation2 + $0x10f] sm:$0xff]  ;;  %v2395_v60 = vld [vmem:[#allocation2 + $0x117] sm:$0xff] }
 0x273   : > { %v7216_v32 = vpop.f32.mrf.mxu0  ;;  %v3108_v4 = vmul.f32 %v7132_v13, %v3072_v45  ;;  %v2530_v0 = vpop.f32.mrf.mxu2  ;;  %v2873_v50 = vld [vmem:[#allocation2 + $0x129] sm:$0xff] }
 0x274   : > { %v2597_v43 = vadd.f32 %v2530_v0, %v2343_v10  ;;  %9133 = vst [vmem:[#allocation74_spill] sm:$0xff] %v7229_v48 }
 0x275   : > { %v3144_v40 = vadd.f32 %v7137_v12, %v3108_v4 }
 0x276   : > { %v2752_v52 = vpop.f32.mrf.mxu3 }
 0x277   : > { %v3176_v5 = vmax.f32 %v3144_v40, 0.0  ;;  %v2819_v18 = vadd.f32 %v2752_v52, %v2597_v43  ;;  %v9139_v40 = vld [vmem:[#allocation45_spill] sm:$0xff] }
 0x278   : > { %v3322_v45 = vld [vmem:[#allocation3 + $0x58] sm:$0xff]  ;;  %5704 = vmatmul.msk.bf16.gmra.mxu2 %vm9106_vm0, %v2443_v9 }
 0x279   : > { %3208 = vst.msk [vmem:[#allocation3 + $0x60] sm:$0xff] %vm9134_vm1, %v3176_v5  ;;  %v3073_v33 = vadd.f32 %v7192_v36, %v2819_v18  ;;  %v3349_v24 = vpack.c.bf16 %v3322_v45, %v3321_v20  ;;  %vm9138_vm1 = vmmov %vm9106_vm0  ;;  %v4379_v52 = vld [vmem:[#allocation3 + $0x51] sm:$0xff] }
 0x27a   : > { %v9142_v18 = vld [vmem:[#allocation87_spill] sm:$0xff] }
 0x27b   : > { %v3014_v29 = vpop.f32.mrf.mxu0  ;;  %v3109_v51 = vmul.f32 %v7132_v13, %v3073_v33  ;;  %5721 = vmatmul.msk.bf16.gmra.mxu3 %vm9135_vm11, %v2665_v27  ;;  %5746 = vmatmul.msk.bf16.gmra.mxu1 %vm9136_vm2, %v3349_v24  ;;  %v2533_v21 = vpop.f32.mrf.mxu2  ;;  %vm9140_vm2 = vnez %v9139_v40  ;;  %v2649_v33 = vld [vmem:[#allocation2 + $0x118] sm:$0xff]  ;;  %vm9145_vm11 = vmmov %vm9106_vm0 }
 0x27c   : > { %v2598_v47 = vadd.f32 %v2533_v21, %v6915_v56  ;;  %v2426_v43 = vsel %vm9140_vm2, %v2394_v37, 0.0  ;;  %v9141_v56 = vld [vmem:[#allocation92_spill] sm:$0xff] }
 0x27d   : > { %v3145_v10 = vadd.f32 %v7137_v12, %v3109_v51  ;;  %v2345_v27 = vadd.f32 %v9142_v18, %v9141_v56  ;;  %v2444_v21 = vpack.c.bf16 %v2395_v60, %v2426_v43 }
 0x27e   : > { %5739 = vmatmul.msk.bf16.gmra.mxu0 %vm9137_vm6, %v2920_v3  ;;  %v2755_v4 = vpop.f32.mrf.mxu3  ;;  %v2648_v3 = vld [vmem:[#allocation2 + $0x110] sm:$0xff]  ;;  %vm9144_vm6 = vmmov %vm9106_vm0 }
 0x27f   : > { %v3177_v0 = vmax.f32 %v3145_v10, 0.0  ;;  %v2820_v36 = vadd.f32 %v2755_v4, %v2598_v47  ;;  %v2872_v10 = vld [vmem:[#allocation2 + $0x121] sm:$0xff]  ;;  %v2905_v47 = vsel %vm6925_vm7, %v2873_v50, 0.0  ;;  %v2666_v37 = vpack.c.bf16 %v2649_v33, %v2648_v3  ;;  %vm9147_vm7 = vmmov %vm9106_vm0 }
 0x280   : > { %v4380_v61 = vld [vmem:[#allocation3 + $0x59] sm:$0xff] }
 0x281   : > { %3209 = vst.msk [vmem:[#allocation3 + $0x68] sm:$0xff] %vm9138_vm1, %v3177_v0  ;;  %v3074_v9 = vadd.f32 %v3009_v1, %v2820_v36  ;;  %v5140_v5 = vsel %vm9015_vm3, %v4380_v61, 0.0  ;;  %v3323_v61 = vld [vmem:[#allocation3 + $0x60] sm:$0xff]  ;;  %vm9146_vm1 = vmmov %vm9106_vm0 }
 0x282   : > { %v7251_v45 = vpack.c.bf16 %v5140_v5, %v4379_v52  ;;  %v2396_v3 = vld [vmem:[#allocation2 + $0x11f] sm:$0xff] }
 0x283   : > { %v7242_v63 = vpop.f32.mrf.mxu0  ;;  %v3110_v20 = vmul.f32 %v7132_v13, %v3074_v9  ;;  %v2535_v1 = vpop.f32.mrf.mxu2  ;;  %v2921_v9 = vpack.c.bf16 %v2905_v47, %v2872_v10  ;;  %v7453_v19 = vld [vmem:[#allocation3 + $0x5f] sm:$0xff] }
 0x284   : > { %9143 = vst [vmem:[#allocation22_spill] sm:$0xff] %v7251_v45  ;;  %v2599_v51 = vadd.f32 %v2535_v1, %v2345_v27 }
 0x285   : > { %v3146_v24 = vadd.f32 %v7137_v12, %v3110_v20 }
 0x286   : > { %v2757_v4 = vpop.f32.mrf.mxu3 }
 0x287   : > { %v3178_v0 = vmax.f32 %v3146_v24, 0.0  ;;  %v2821_v36 = vadd.f32 %v2757_v4, %v2599_v51  ;;  %v9150_v4 = vld [vmem:[#allocation94_spill] sm:$0xff] }
 0x288   : > { %v3324_v56 = vld [vmem:[#allocation3 + $0x68] sm:$0xff]  ;;  %5705 = vmatmul.msk.bf16.gmra.mxu2 %vm9106_vm0, %v2444_v21 }
 0x289   : > { %3210 = vst.msk [vmem:[#allocation3 + $0x70] sm:$0xff] %vm9144_vm6, %v3178_v0  ;;  %v3075_v52 = vadd.f32 %v7216_v32, %v2821_v36  ;;  %v3350_v5 = vpack.c.bf16 %v3324_v56, %v3323_v61  ;;  %vm9148_vm6 = vmmov %vm9106_vm0  ;;  %v2397_v21 = vld [vmem:[#allocation2 + $0x127] sm:$0xff]  ;;  %vm9149_vm0 = vnez %v8999_v39  ;;  %v9151_v0 = vld [vmem:[#allocation90_spill] sm:$0xff] }
 0x28a   : > { %v2428_v10 = vsel %vm9149_vm0, %v2396_v3, 0.0  ;;  %v7272_v47 = vld [vmem:[#allocation3 + $0x61] sm:$0xff]  ;;  %v2347_v36 = vadd.f32 %v9151_v0, %v9150_v4  ;;  %vm9156_vm0 = vmmov %vm9148_vm6 }
 0x28b   : > { %v3019_v18 = vpop.f32.mrf.mxu0  ;;  %v3111_v60 = vmul.f32 %v7132_v13, %v3075_v52  ;;  %5722 = vmatmul.msk.bf16.gmra.mxu3 %vm9145_vm11, %v2666_v37  ;;  %5747 = vmatmul.msk.bf16.gmra.mxu1 %vm9146_vm1, %v3350_v5  ;;  %v2538_v43 = vpop.f32.mrf.mxu2  ;;  %v2650_v56 = vld [vmem:[#allocation2 + $0x120] sm:$0xff]  ;;  %vm9154_vm11 = vmmov %vm9146_vm1 }
 0x28c   : > { %v2600_v27 = vadd.f32 %v2538_v43, %v6945_v31  ;;  %v7458_v2 = vld [vmem:[#allocation3 + $0x67] sm:$0xff] }
 0x28d   : > { %v3147_v50 = vadd.f32 %v7137_v12, %v3111_v60  ;;  %v2445_v60 = vpack.c.bf16 %v2397_v21, %v2428_v10 }
 0x28e   : > { %5740 = vmatmul.msk.bf16.gmra.mxu0 %vm9147_vm7, %v2921_v9  ;;  %v2760_v20 = vpop.f32.mrf.mxu3  ;;  %v2651_v9 = vld [vmem:[#allocation2 + $0x128] sm:$0xff]  ;;  %vm9153_vm7 = vmmov %vm9146_vm1  ;;  %vm9155_vm1 = vnez %v9004_v8 }
 0x28f   : > { %v3179_v1 = vmax.f32 %v3147_v50, 0.0  ;;  %v2822_v32 = vadd.f32 %v2760_v20, %v2600_v27  ;;  %v7284_v50 = vld [vmem:[#allocation3 + $0x1f] sm:$0xff] }
 0x290   : > { %v7265_v33 = vld [vmem:[#allocation3 + $0x69] sm:$0xff]  ;;  %v3929_v21 = vsel %vm9155_vm1, %v7284_v50, 0.0 }
 0x291   : > { %3211 = vst.msk [vmem:[#allocation3 + $0x78] sm:$0xff] %vm9148_vm6, %v3179_v1  ;;  %v3076_v24 = vadd.f32 %v3014_v29, %v2822_v32  ;;  %v4414_v31 = vsel %vm6561_vm4, %v7265_v33, 0.0  ;;  %v2667_v1 = vpack.c.bf16 %v2651_v9, %v2650_v56  ;;  %v7286_v32 = vld [vmem:[#allocation3 + $0x27] sm:$0xff]  ;;  %v3325_v3 = vld [vmem:[#allocation3 + $0x70] sm:$0xff] }
 0x292   : > { %v7281_v61 = vpack.c.bf16 %v4414_v31, %v7272_v47  ;;  %v3961_v10 = vpack.c.bf16 %v7286_v32, %v3929_v21  ;;  %v3644_v21 = vld [vmem:[#allocation3 + $0x19] sm:$0xff]  ;;  %v7510_v23 = vld [vmem:[#allocation3 + $0x6f] sm:$0xff] }
 0x293   : > { %v7268_v51 = vpop.f32.mrf.mxu0  ;;  %v3112_v37 = vmul.f32 %v7132_v13, %v3076_v24  ;;  %v2540_v29 = vpop.f32.mrf.mxu2 }
 0x294   : > { %9152 = vst [vmem:[#allocation77_spill] sm:$0xff] %v7281_v61  ;;  %v2601_v5 = vadd.f32 %v2540_v29, %v2347_v36  ;;  %v7407_v61 = vld [vmem:[#allocation3 + $0x4f] sm:$0xff] }
 0x295   : > { %v3148_v52 = vadd.f32 %v7137_v12, %v3112_v37 }
 0x296   : > { %v2762_v43 = vpop.f32.mrf.mxu3 }
 0x297   : > { %v3180_v27 = vmax.f32 %v3148_v52, 0.0  ;;  %v2823_v20 = vadd.f32 %v2762_v43, %v2601_v5  ;;  %v3232_v5 = vld [vmem:[#allocation3 + $0xf] sm:$0xff] }
 0x298   : > { %v3326_v24 = vld [vmem:[#allocation3 + $0x78] sm:$0xff]  ;;  %5706 = vmatmul.msk.bf16.gmra.mxu2 %vm9154_vm11, %v2445_v60  ;;  %vm9158_vm11 = vmmov %vm9156_vm0 }
 0x299   : > { %3212 = vst.msk [vmem:[#allocation3 + $0x80] sm:$0xff] %vm9153_vm7, %v3180_v27  ;;  %v3077_v31 = vadd.f32 %v7242_v63, %v2823_v20  ;;  %v3351_v4 = vpack.c.bf16 %v3326_v24, %v3325_v3  ;;  %vm9157_vm7 = vmmov %vm9156_vm0  ;;  %v3233_v20 = vld [vmem:[#allocation3 + $0x17] sm:$0xff]  ;;  %v9159_v24 = vld [vmem:[#allocation93_spill] sm:$0xff] }
 0x29a   : > { %v7308_v3 = vld [vmem:[#allocation3 + $0x71] sm:$0xff] }
 0x29b   : > { %v3024_v0 = vpop.f32.mrf.mxu0  ;;  %v3113_v36 = vmul.f32 %v7132_v13, %v3077_v31  ;;  %5723 = vmatmul.msk.bf16.gmra.mxu3 %vm9148_vm6, %v2667_v1  ;;  %5748 = vmatmul.msk.bf16.gmra.mxu1 %vm9156_vm0, %v3351_v4  ;;  %v2543_v37 = vpop.f32.mrf.mxu2  ;;  %v3264_v1 = vsel %vm9155_vm1, %v3232_v5, 0.0  ;;  %v2349_v31 = vadd.f32 %v9159_v24, %v6975_v42  ;;  %v7324_v24 = vld [vmem:[#allocation3 + $0x37] sm:$0xff]  ;;  %vm9161_vm6 = vmmov %vm9156_vm0 }
 0x29c   : > { %v2602_v29 = vadd.f32 %v2543_v37, %v6965_v15  ;;  %vm9164_vm1 = vmmov %vm9156_vm0 }
 0x29d   : > { %v3149_v63 = vadd.f32 %v7137_v12, %v3113_v36 }
 0x29e   : > { %5792 = vmatmul.msk.bf16.vlgmr.msrb.gmra.mxu0 %vm9157_vm7, %v3961_v10  ;;  %v2765_v56 = vpop.f32.mrf.mxu3  ;;  %vm9162_vm7 = vnez %v8812_v41 }
 0x29f   : > { %v3181_v9 = vmax.f32 %v3149_v63, 0.0  ;;  %v2824_v52 = vadd.f32 %v2765_v56, %v2602_v29  ;;  %v3296_v63 = vpack.c.bf16 %v3233_v20, %v3264_v1  ;;  %v3643_v56 = vld [vmem:[#allocation3 + $0x11] sm:$0xff] }
 0x2a0   : > { %v7301_v60 = vld [vmem:[#allocation3 + $0x79] sm:$0xff] }
 0x2a1   : > { %3213 = vst.msk [vmem:[#allocation3 + $0x88] sm:$0xff] %vm9158_vm11, %v3181_v9  ;;  %v3078_v43 = vadd.f32 %v3019_v18, %v2824_v52  ;;  %v4416_v15 = vsel %vm6595_vm8, %v7301_v60, 0.0  ;;  %v3676_v9 = vsel %vm6437_vm13, %v3644_v21, 0.0  ;;  %v7322_v52 = vld [vmem:[#allocation3 + $0x2f] sm:$0xff]  ;;  %vm9163_vm11 = vmmov %vm9156_vm0 }
 0x2a2   : > { %v7317_v18 = vpack.c.bf16 %v4416_v15, %v7308_v3  ;;  %v3707_v20 = vpack.c.bf16 %v3676_v9, %v3643_v56 }
 0x2a3   : > { %v7304_v27 = vpop.f32.mrf.mxu0  ;;  %v3114_v4 = vmul.f32 %v7132_v13, %v3078_v43  ;;  %v2545_v10 = vpop.f32.mrf.mxu2  ;;  %v3327_v43 = vld [vmem:[#allocation3 + $0x80] sm:$0xff] }
 0x2a4   : > { %9160 = vst [vmem:[#allocation79_spill] sm:$0xff] %v7317_v18  ;;  %v2603_v37 = vadd.f32 %v2545_v10, %v2349_v31 }
 0x2a5   : > { %v3150_v36 = vadd.f32 %v7137_v12, %v3114_v4  ;;  %v3931_v4 = vsel %vm9162_vm7, %v7322_v52, 0.0 }
 0x2a6   : > { %v2767_v29 = vpop.f32.mrf.mxu3  ;;  %v3962_v21 = vpack.c.bf16 %v7324_v24, %v3931_v4  ;;  %v9168_v4 = vld [vmem:[#allocation95_spill] sm:$0xff] }
 0x2a7   : > { %v3182_v5 = vmax.f32 %v3150_v36, 0.0  ;;  %v2825_v42 = vadd.f32 %v2767_v29, %v2603_v37  ;;  %v9165_v37 = vld [vmem:[#allocation50_spill] sm:$0xff] }
 0x2a8   : > { %v3328_v45 = vld [vmem:[#allocation3 + $0x88] sm:$0xff]  ;;  %5758 = vmatmul.msk.bf16.vlgmr.msrb.gmra.mxu2 %vm9161_vm6, %v3296_v63  ;;  %v7339_v63 = vpop.f32.mrf.mxu1  ;;  %vm9166_vm6 = vmmov %vm9156_vm0 }
 0x2a9   : > { %3214 = vst.msk [vmem:[#allocation3 + $0x90] sm:$0xff] %vm9156_vm0, %v3182_v5  ;;  %v3079_v15 = vadd.f32 %v7268_v51, %v2825_v42  ;;  %v3352_v1 = vpack.c.bf16 %v3328_v45, %v3327_v43 }
 0x2ab   : > { %v3029_v31 = vpop.f32.mrf.mxu0  ;;  %v3115_v10 = vmul.f32 %v7132_v13, %v3079_v15  ;;  %5775 = vmatmul.msk.bf16.vlgmr.msrb.gmra.mxu3 %vm9163_vm11, %v3707_v20  ;;  %5749 = vmatmul.msk.bf16.gmra.mxu1 %vm9164_vm1, %v3352_v1  ;;  %v2548_v36 = vpop.f32.mrf.mxu2  ;;  %v7346_v15 = vld [vmem:[#allocation3 + $0x81] sm:$0xff]  ;;  %vm9170_vm1 = vmmov %vm9156_vm0 }
 0x2ac   : > { %v2604_v45 = vadd.f32 %v2548_v36, %v9165_v37  ;;  %v9167_v1 = vld [vmem:[#allocation97_spill] sm:$0xff]  ;;  %vm9171_vm11 = vmmov %vm9156_vm0 }
 0x2ad   : > { %v3151_v51 = vadd.f32 %v7137_v12, %v3115_v10  ;;  %v3646_v36 = vld [vmem:[#allocation3 + $0x29] sm:$0xff] }
 0x2ae   : > { %5793 = vmatmul.msk.bf16.gmra.mxu0 %vm9156_vm0, %v3962_v21  ;;  %v2770_v29 = vpop.f32.mrf.mxu3  ;;  %v2351_v21 = vadd.f32 %v9168_v4, %v9167_v1  ;;  %v3678_v1 = vsel %vm9007_vm15, %v3646_v36, 0.0  ;;  %v7365_v4 = vld [vmem:[#allocation3 + $0x3f] sm:$0xff] }
 0x2af   : > { %v3183_v56 = vmax.f32 %v3151_v51, 0.0  ;;  %v2826_v9 = vadd.f32 %v2770_v29, %v2604_v45 }
 0x2b0   : > { %v7341_v5 = vld [vmem:[#allocation3 + $0x89] sm:$0xff]  ;;  %v7358_v29 = vpop.f32.mrf.mxu1 }
 0x2b1   : > { %3215 = vst.msk [vmem:[#allocation3 + $0x98] sm:$0xff] %vm9166_vm6, %v3183_v56  ;;  %v3080_v42 = vadd.f32 %v3024_v0, %v2826_v9  ;;  %v4418_v20 = vsel %vm6629_vm10, %v7341_v5, 0.0  ;;  %v3266_v9 = vsel %vm9162_vm7, %v7284_v50, 0.0  ;;  %vm9172_vm6 = vmmov %vm9156_vm0 }
 0x2b2   : > { %v7355_v51 = vpack.c.bf16 %v4418_v20, %v7346_v15  ;;  %v3297_v20 = vpack.c.bf16 %v7286_v32, %v3266_v9 }
 0x2b3   : > { %v7344_v43 = vpop.f32.mrf.mxu0  ;;  %v3116_v10 = vmul.f32 %v7132_v13, %v3080_v42  ;;  %v2550_v37 = vpop.f32.mrf.mxu2 }
 0x2b4   : > { %9169 = vst [vmem:[#allocation81_spill] sm:$0xff] %v7355_v51  ;;  %v2605_v45 = vadd.f32 %v2550_v37, %v2351_v21  ;;  %v3329_v21 = vld [vmem:[#allocation3 + $0x90] sm:$0xff] }
 0x2b5   : > { %v3152_v0 = vadd.f32 %v7137_v12, %v3116_v10  ;;  %v3645_v10 = vld [vmem:[#allocation3 + $0x21] sm:$0xff] }
 0x2b6   : > { %v2772_v56 = vpop.f32.mrf.mxu3  ;;  %v3708_v50 = vpack.c.bf16 %v3678_v1, %v3645_v10 }
 0x2b7   : > { %v3184_v42 = vmax.f32 %v3152_v0, 0.0  ;;  %v2827_v48 = vadd.f32 %v2772_v56, %v2605_v45  ;;  %v3933_v0 = vsel %vm9021_vm9, %v7365_v4, 0.0 }
 0x2b8   : > { %v3330_v37 = vld [vmem:[#allocation3 + $0x98] sm:$0xff]  ;;  %5759 = vmatmul.msk.bf16.gmra.mxu2 %vm9171_vm11, %v3297_v20  ;;  %v3963_v32 = vpack.c.bf16 %v7368_v26, %v3933_v0  ;;  %v7383_v20 = vpop.f32.mrf.mxu1  ;;  %vm9174_vm11 = vmmov %vm9156_vm0 }
 0x2b9   : > { %3216 = vst.msk [vmem:[#allocation3 + $0xa0] sm:$0xff] %vm9170_vm1, %v3184_v42  ;;  %v3081_v51 = vadd.f32 %v7304_v27, %v2827_v48  ;;  %v3353_v18 = vpack.c.bf16 %v3330_v37, %v3329_v21  ;;  %vm9173_vm1 = vmmov %vm9156_vm0 }
 0x2bb   : > { %v3034_v36 = vpop.f32.mrf.mxu0  ;;  %v3117_v45 = vmul.f32 %v7132_v13, %v3081_v51  ;;  %5776 = vmatmul.msk.bf16.gmra.mxu3 %vm9156_vm0, %v3708_v50  ;;  %5750 = vmatmul.msk.bf16.gmra.mxu1 %vm9172_vm6, %v3353_v18  ;;  %v2553_v56 = vpop.f32.mrf.mxu2  ;;  %v7390_v18 = vld [vmem:[#allocation3 + $0x91] sm:$0xff]  ;;  %v9175_v50 = vld [vmem:[#allocation53_spill] sm:$0xff]  ;;  %vm9178_vm6 = vmmov %vm9156_vm0 }
 0x2bc   : > { %v2606_v27 = vadd.f32 %v2553_v56, %v6999_v6  ;;  %v9176_v6 = vld [vmem:[#allocation96_spill] sm:$0xff] }
 0x2bd   : > { %v3153_v48 = vadd.f32 %v7137_v12, %v3117_v45  ;;  %v2353_v0 = vadd.f32 %v9176_v6, %v9175_v50  ;;  %v3648_v45 = vld [vmem:[#allocation3 + $0x39] sm:$0xff] }
 0x2be   : > { %5794 = vmatmul.msk.bf16.gmra.mxu0 %vm9173_vm1, %v3963_v32  ;;  %v2775_v9 = vpop.f32.mrf.mxu3 }
 0x2bf   : > { %v3185_v1 = vmax.f32 %v3153_v48, 0.0  ;;  %v2828_v42 = vadd.f32 %v2775_v9, %v2606_v27 }
 0x2c0   : > { %v7385_v10 = vld [vmem:[#allocation3 + $0x99] sm:$0xff] }
 0x2c1   : > { %3217 = vst.msk [vmem:[#allocation3 + $0xa8] sm:$0xff] %vm9174_vm11, %v3185_v1  ;;  %v3082_v51 = vadd.f32 %v3029_v31, %v2828_v42  ;;  %v4420_v37 = vsel %vm6663_vm12, %v7385_v10, 0.0  ;;  %v3268_v1 = vsel %vm9021_vm9, %v7322_v52, 0.0  ;;  %v3680_v42 = vsel %vm9015_vm3, %v3648_v45, 0.0  ;;  %vm9181_vm11 = vmmov %vm9156_vm0 }
 0x2c2   : > { %v7399_v56 = vpack.c.bf16 %v4420_v37, %v7390_v18  ;;  %v3298_v6 = vpack.c.bf16 %v7324_v24, %v3268_v1  ;;  %v7410_v37 = vld [vmem:[#allocation3 + $0x57] sm:$0xff]  ;;  %vm9182_vm9 = vmmov %vm9156_vm0 }
 0x2c3   : > { %v7388_v21 = vpop.f32.mrf.mxu0  ;;  %v3118_v32 = vmul.f32 %v7132_v13, %v3082_v51  ;;  %v2555_v48 = vpop.f32.mrf.mxu2  ;;  %vm9199_vm3 = vmmov %vm9156_vm0 }
 0x2c4   : > { %9177 = vst [vmem:[#allocation86_spill] sm:$0xff] %v7399_v56  ;;  %v2607_v27 = vadd.f32 %v2555_v48, %v2353_v0  ;;  %v3331_v0 = vld [vmem:[#allocation3 + $0xa0] sm:$0xff] }
 0x2c5   : > { %v3154_v31 = vadd.f32 %v7137_v12, %v3118_v32  ;;  %v3647_v32 = vld [vmem:[#allocation3 + $0x31] sm:$0xff] }
 0x2c6   : > { %v2777_v9 = vpop.f32.mrf.mxu3  ;;  %v3709_v45 = vpack.c.bf16 %v3680_v42, %v3647_v32  ;;  %v9183_v42 = vld [vmem:[#allocation55_spill] sm:$0xff] }
 0x2c7   : > { %v3186_v50 = vmax.f32 %v3154_v31, 0.0  ;;  %v2829_v51 = vadd.f32 %v2777_v9, %v2607_v27  ;;  %v9179_v31 = vld [vmem:[#allocation28_spill] sm:$0xff] }
 0x2c8   : > { %v7412_v56 = vpop.f32.mrf.mxu1  ;;  %v3332_v48 = vld [vmem:[#allocation3 + $0xa8] sm:$0xff]  ;;  %5760 = vmatmul.msk.bf16.gmra.mxu2 %vm9178_vm6, %v3298_v6  ;;  %vm9180_vm1 = vnez %v9179_v31  ;;  %vm9184_vm6 = vmmov %vm9156_vm0 }
 0x2c9   : > { %3218 = vst.msk [vmem:[#allocation3 + $0xb0] sm:$0xff] %vm9156_vm0, %v3186_v50  ;;  %v3083_v52 = vadd.f32 %v7344_v43, %v2829_v51  ;;  %v3354_v34 = vpack.c.bf16 %v3332_v48, %v3331_v0  ;;  %v3935_v24 = vsel %vm9180_vm1, %v7407_v61, 0.0  ;;  %v3270_v8 = vsel %vm9180_vm1, %v7365_v4, 0.0 }
 0x2ca   : > { %v3964_v27 = vpack.c.bf16 %v7410_v37, %v3935_v24  ;;  %v7436_v24 = vld [vmem:[#allocation3 + $0xa1] sm:$0xff]  ;;  %vm9193_vm1 = vnez %v9083_v22 }
 0x2cb   : > { %v7417_v55 = vpop.f32.mrf.mxu0  ;;  %v3119_v9 = vmul.f32 %v7132_v13, %v3083_v52  ;;  %5777 = vmatmul.msk.bf16.gmra.mxu3 %vm9181_vm11, %v3709_v45  ;;  %5751 = vmatmul.msk.bf16.gmra.mxu1 %vm9182_vm9, %v3354_v34  ;;  %v2558_v1 = vpop.f32.mrf.mxu2  ;;  %v3650_v34 = vld [vmem:[#allocation3 + $0x49] sm:$0xff]  ;;  %vm9190_vm11 = vmmov %vm9156_vm0 }
 0x2cc   : > { %v2608_v50 = vadd.f32 %v2558_v1, %v9183_v42  ;;  %v9186_v1 = vld [vmem:[#allocation52_spill] sm:$0xff] }
 0x2cd   : > { %v3155_v43 = vadd.f32 %v7137_v12, %v3119_v9  ;;  %v9185_v9 = vld [vmem:[#allocation56_spill] sm:$0xff] }
 0x2ce   : > { %5795 = vmatmul.msk.bf16.gmra.mxu0 %vm9156_vm0, %v3964_v27  ;;  %v2780_v51 = vpop.f32.mrf.mxu3 }
 0x2cf   : > { %v3187_v6 = vmax.f32 %v3155_v43, 0.0  ;;  %v2830_v32 = vadd.f32 %v2780_v51, %v2608_v50  ;;  %v2355_v43 = vadd.f32 %v9186_v1, %v9185_v9 }
 0x2d0   : > { %v7429_v0 = vpop.f32.mrf.mxu1  ;;  %v7431_v48 = vld [vmem:[#allocation3 + $0xa9] sm:$0xff] }
 0x2d1   : > { %3219 = vst.msk [vmem:[#allocation3 + $0xb8] sm:$0xff] %vm9184_vm6, %v3187_v6  ;;  %v3084_v52 = vadd.f32 %v3034_v36, %v2830_v32  ;;  %v4422_v27 = vsel %vm6697_vm14, %v7431_v48, 0.0  ;;  %v9188_v32 = vld [vmem:[#allocation54_spill] sm:$0xff] }
 0x2d2   : > { %v7445_v50 = vpack.c.bf16 %v4422_v27, %v7436_v24  ;;  %vm9189_vm9 = vnez %v9188_v32  ;;  %v7455_v9 = vld [vmem:[#allocation3 + $0xaf] sm:$0xff]  ;;  %v3299_v27 = vpack.c.bf16 %v7368_v26, %v3270_v8 }
 0x2d3   : > { %v7434_v45 = vpop.f32.mrf.mxu0  ;;  %v3120_v42 = vmul.f32 %v7132_v13, %v3084_v52  ;;  %v2560_v51 = vpop.f32.mrf.mxu2  ;;  %v3682_v41 = vsel %vm9189_vm9, %v3650_v34, 0.0  ;;  %v3333_v34 = vld [vmem:[#allocation3 + $0xb0] sm:$0xff]  ;;  %v9191_v8 = vld [vmem:[#allocation33_spill] sm:$0xff]  ;;  %vm9196_vm9 = vmmov %vm9156_vm0 }
 0x2d4   : > { %9187 = vst [vmem:[#allocation89_spill] sm:$0xff] %v7445_v50  ;;  %v2609_v6 = vadd.f32 %v2560_v51, %v2355_v43  ;;  %v3649_v50 = vld [vmem:[#allocation3 + $0x41] sm:$0xff]  ;;  %vm9192_vm6 = vnez %v9191_v8 }
 0x2d5   : > { %v3156_v36 = vadd.f32 %v7137_v12, %v3120_v42  ;;  %v3710_v42 = vpack.c.bf16 %v3682_v41, %v3649_v50  ;;  %v3937_v26 = vsel %vm9192_vm6, %v7453_v19, 0.0  ;;  %v4675_v41 = vsel %vm9193_vm1, %v7455_v9, 0.0 }
 0x2d6   : > { %v2782_v59 = vpop.f32.mrf.mxu3  ;;  %v3965_v50 = vpack.c.bf16 %v7458_v2, %v3937_v26  ;;  %v3272_v17 = vsel %vm9192_vm6, %v7407_v61, 0.0 }
 0x2d7   : > { %v3188_v52 = vmax.f32 %v3156_v36, 0.0  ;;  %v2831_v1 = vadd.f32 %v2782_v59, %v2609_v6 }
 0x2d8   : > { %v7460_v43 = vpop.f32.mrf.mxu1  ;;  %v3334_v51 = vld [vmem:[#allocation3 + $0xb8] sm:$0xff]  ;;  %5761 = vmatmul.msk.bf16.gmra.mxu2 %vm9156_vm0, %v3299_v27  ;;  %v9197_v27 = vld [vmem:[#allocation58_spill] sm:$0xff] }
 0x2d9   : > { %v7462_v32 = vld [vmem:[#allocation3 + $0xb7] sm:$0xff]  ;;  %3220 = vst.msk [vmem:[#allocation3 + $0xc0] sm:$0xff] %vm9190_vm11, %v3188_v52  ;;  %v3085_v4 = vadd.f32 %v7388_v21, %v2831_v1  ;;  %v3355_v36 = vpack.c.bf16 %v3334_v51, %v3333_v34  ;;  %vm9195_vm11 = vmmov %vm9156_vm0 }
 0x2da   : > { %v7477_v6 = vpack.c.bf16 %v7462_v32, %v4675_v41 }
 0x2db   : > { %v7467_v59 = vpop.f32.mrf.mxu0  ;;  %v3121_v21 = vmul.f32 %v7132_v13, %v3085_v4  ;;  %5778 = vmatmul.msk.bf16.gmra.mxu3 %vm9195_vm11, %v3710_v42  ;;  %5752 = vmatmul.msk.bf16.gmra.mxu1 %vm9156_vm0, %v3355_v36  ;;  %v2563_v52 = vpop.f32.mrf.mxu2  ;;  %v3652_v36 = vld [vmem:[#allocation3 + $0x59] sm:$0xff]  ;;  %vm9206_vm11 = vmmov %vm9156_vm0 }
 0x2dc   : > { %9194 = vst [vmem:[#allocation82_spill] sm:$0xff] %v7477_v6  ;;  %v2610_v34 = vadd.f32 %v2563_v52, %v9197_v27  ;;  %v7493_v6 = vld [vmem:[#allocation3 + $0xb1] sm:$0xff] }
 0x2dd   : > { %v3157_v1 = vadd.f32 %v7137_v12, %v3121_v21  ;;  %v9201_v21 = vld [vmem:[#allocation59_spill] sm:$0xff]  ;;  %v9202_v52 = vld [vmem:[#allocation98_spill] sm:$0xff] }
 0x2de   : > { %5796 = vmatmul.msk.bf16.gmra.mxu0 %vm9196_vm9, %v3965_v50  ;;  %v2785_v51 = vpop.f32.mrf.mxu3  ;;  %vm9200_vm9 = vnez %v8939_v53 }
 0x2df   : > { %v3189_v31 = vmax.f32 %v3157_v1, 0.0  ;;  %v2832_v39 = vadd.f32 %v2785_v51, %v2610_v34  ;;  %v2357_v1 = vadd.f32 %v9202_v52, %v9201_v21  ;;  %v3684_v51 = vsel %vm6561_vm4, %v3652_v36, 0.0 }
 0x2e0   : > { %v7485_v26 = vpop.f32.mrf.mxu1  ;;  %v7487_v41 = vld [vmem:[#allocation3 + $0xb9] sm:$0xff]  ;;  %vm9208_vm4 = vnez %v9091_v38 }
 0x2e1   : > { %9198 = vst [vmem:[#allocation88_spill] sm:$0xff] %v7485_v26  ;;  %v3086_v42 = vadd.f32 %v7417_v55, %v2832_v39  ;;  %v4424_v50 = vsel %vm9200_vm9, %v7487_v41, 0.0  ;;  %v7512_v21 = vld [vmem:[#allocation3 + $0xbf] sm:$0xff]  ;;  %v7515_v26 = vld [vmem:[#allocation3 + $0x77] sm:$0xff] }
 0x2e2   : > { %3221 = vst.msk [vmem:[#allocation3 + $0xc8] sm:$0xff] %vm9199_vm3, %v3189_v31  ;;  %v7502_v34 = vpack.c.bf16 %v4424_v50, %v7493_v6  ;;  %v3300_v50 = vpack.c.bf16 %v7410_v37, %v3272_v17  ;;  %v3335_v36 = vld [vmem:[#allocation3 + $0xc0] sm:$0xff]  ;;  %vm9205_vm3 = vmmov %vm9156_vm0  ;;  %vm9207_vm0 = vnez %v9050_v14  ;;  %v4677_v37 = vsel %vm9208_vm4, %v7512_v21, 0.0 }
 0x2e3   : > { %v7491_v4 = vpop.f32.mrf.mxu0  ;;  %v3122_v27 = vmul.f32 %v7132_v13, %v3086_v42  ;;  %v2565_v31 = vpop.f32.mrf.mxu2  ;;  %v3939_v17 = vsel %vm9207_vm0, %v7510_v23, 0.0  ;;  %vm9211_vm6 = vmmov %vm9205_vm3 }
 0x2e4   : > { %9203 = vst [vmem:[#allocation92_spill] sm:$0xff] %v7502_v34  ;;  %v2611_v55 = vadd.f32 %v2565_v31, %v2357_v1  ;;  %v3651_v34 = vld [vmem:[#allocation3 + $0x51] sm:$0xff]  ;;  %vm9214_vm7 = vmmov %vm9205_vm3 }
 0x2e5   : > { %v3158_v39 = vadd.f32 %v7137_v12, %v3122_v27  ;;  %v3711_v27 = vpack.c.bf16 %v3684_v51, %v3651_v34  ;;  %v3966_v34 = vpack.c.bf16 %v7515_v26, %v3939_v17  ;;  %vm9239_vm15 = vmmov %vm9205_vm3 }
 0x2e6   : > { %v2787_v40 = vpop.f32.mrf.mxu3 }
 0x2e7   : > { %v3190_v42 = vmax.f32 %v3158_v39, 0.0  ;;  %v2833_v52 = vadd.f32 %v2787_v40, %v2611_v55 }
 0x2e8   : > { %v7517_v1 = vpop.f32.mrf.mxu1  ;;  %5762 = vmatmul.msk.bf16.gmra.mxu2 %vm9206_vm11, %v3300_v50  ;;  %vm9210_vm11 = vmmov %vm9205_vm3 }
 0x2e9   : > { %9204 = vst [vmem:[#allocation87_spill] sm:$0xff] %v7517_v1  ;;  %v3336_v31 = vld [vmem:[#allocation3 + $0xc8] sm:$0xff]  ;;  %v3087_v61 = vadd.f32 %v7434_v45, %v2833_v52  ;;  %v7568_v1 = vld [vmem:[#allocation3 + $0x7f] sm:$0xff] }
 0x2ea   : > { %v7519_v35 = vld [vmem:[#allocation3 + $0xc7] sm:$0xff]  ;;  %3222 = vst.msk [vmem:[#allocation3 + $0xd0] sm:$0xff] %vm9205_vm3, %v3190_v42  ;;  %v3356_v39 = vpack.c.bf16 %v3336_v31, %v3335_v36 }
 0x2eb   : > { %v7524_v40 = vpop.f32.mrf.mxu0  ;;  %v7534_v55 = vpack.c.bf16 %v7519_v35, %v4677_v37  ;;  %v3123_v45 = vmul.f32 %v7132_v13, %v3087_v61  ;;  %5779 = vmatmul.msk.bf16.gmra.mxu3 %vm9205_vm3, %v3711_v27  ;;  %v2568_v51 = vpop.f32.mrf.mxu2  ;;  %v9212_v52 = vld [vmem:[#allocation61_spill] sm:$0xff] }
 0x2ec   : > { %5753 = vmatmul.msk.bf16.gmra.mxu1 %vm9210_vm11, %v3356_v39  ;;  %v2612_v50 = vadd.f32 %v2568_v51, %v9212_v52  ;;  %v7550_v39 = vld [vmem:[#allocation3 + $0xc1] sm:$0xff]  ;;  %vm9221_vm11 = vnez %v9061_v28 }
 0x2ed   : > { %9209 = vst [vmem:[#allocation94_spill] sm:$0xff] %v7534_v55  ;;  %v3159_v42 = vadd.f32 %v7137_v12, %v3123_v45  ;;  %v9216_v45 = vld [vmem:[#allocation62_spill] sm:$0xff]  ;;  %v9217_v51 = vld [vmem:[#allocation64_spill] sm:$0xff]  ;;  %v3276_v14 = vsel %vm9221_vm11, %v7510_v23, 0.0 }
 0x2ee   : > { %5797 = vmatmul.msk.bf16.gmra.mxu0 %vm9211_vm6, %v3966_v34  ;;  %v2790_v36 = vpop.f32.mrf.mxu3  ;;  %vm9215_vm6 = vnez %v9094_v30 }
 0x2ef   : > { %v3191_v31 = vmax.f32 %v3159_v42, 0.0  ;;  %v2834_v8 = vadd.f32 %v2790_v36, %v2612_v50  ;;  %v2359_v42 = vadd.f32 %v9217_v51, %v9216_v45  ;;  %v7573_v51 = vld [vmem:[#allocation3 + $0x87] sm:$0xff] }
 0x2f0   : > { %v7542_v17 = vpop.f32.mrf.mxu1 }
 0x2f1   : > { %9213 = vst [vmem:[#allocation90_spill] sm:$0xff] %v7542_v17  ;;  %v7544_v37 = vld [vmem:[#allocation3 + $0xc9] sm:$0xff]  ;;  %v3088_v27 = vadd.f32 %v7467_v59, %v2834_v8  ;;  %v3686_v8 = vsel %vm6595_vm8, %v7265_v33, 0.0  ;;  %v3274_v17 = vsel %vm9207_vm0, %v7453_v19, 0.0  ;;  %vm9222_vm8 = vnez %v8829_v25  ;;  %vm9225_vm0 = vmmov %vm9205_vm3 }
 0x2f2   : > { %3223 = vst.msk [vmem:[#allocation3 + $0xd8] sm:$0xff] %vm9214_vm7, %v3191_v31  ;;  %v4426_v34 = vsel %vm9215_vm6, %v7544_v37, 0.0  ;;  %v7570_v45 = vld [vmem:[#allocation3 + $0xcf] sm:$0xff]  ;;  %vm9220_vm7 = vmmov %vm9205_vm3  ;;  %v3949_v38 = vsel %vm9222_vm8, %v7512_v21, 0.0 }
 0x2f3   : > { %v7548_v61 = vpop.f32.mrf.mxu0  ;;  %v3124_v52 = vmul.f32 %v7132_v13, %v3088_v27  ;;  %v7559_v50 = vpack.c.bf16 %v4426_v34, %v7550_v39  ;;  %v2570_v36 = vpop.f32.mrf.mxu2  ;;  %v3301_v34 = vpack.c.bf16 %v7458_v2, %v3274_v17  ;;  %v3337_v33 = vld [vmem:[#allocation3 + $0xd0] sm:$0xff]  ;;  %v3941_v2 = vsel %vm9221_vm11, %v7568_v1, 0.0  ;;  %vm9237_vm11 = vmmov %vm9205_vm3 }
 0x2f4   : > { %v2613_v59 = vadd.f32 %v2570_v36, %v2359_v42  ;;  %v3712_v42 = vpack.c.bf16 %v3686_v8, %v7272_v47  ;;  %v4679_v47 = vsel %vm9222_vm8, %v7570_v45, 0.0  ;;  %v3967_v17 = vpack.c.bf16 %v7573_v51, %v3941_v2 }
 0x2f5   : > { %9218 = vst [vmem:[#allocation93_spill] sm:$0xff] %v7559_v50  ;;  %v3160_v31 = vadd.f32 %v7137_v12, %v3124_v52 }
 0x2f6   : > { %v2792_v55 = vpop.f32.mrf.mxu3 }
 0x2f7   : > { %v3192_v13 = vmax.f32 %v3160_v31, 0.0  ;;  %v2835_v27 = vadd.f32 %v2792_v55, %v2613_v59 }
 0x2f8   : > { %v7575_v12 = vpop.f32.mrf.mxu1  ;;  %5763 = vmatmul.msk.bf16.gmra.mxu2 %vm9205_vm3, %v3301_v34 }
 0x2f9   : > { %9219 = vst [vmem:[#allocation50_spill] sm:$0xff] %v7575_v12  ;;  %v3338_v52 = vld [vmem:[#allocation3 + $0xd8] sm:$0xff]  ;;  %v3089_v19 = vadd.f32 %v7491_v4, %v2835_v27  ;;  %v7596_v4 = vld [vmem:[%s8606_s2] ss:$0 sm:$0xff]  ;;  %v7635_v12 = vld [vmem:[#allocation3 + $0x8f] sm:$0xff] }
 0x2fa   : > { %v7578_v36 = vld [vmem:[#allocation3 + $0xd7] sm:$0xff]  ;;  %3224 = vst.msk [vmem:[#allocation3 + $0xe0] sm:$0xff] %vm9220_vm7, %v3192_v13  ;;  %v3357_v31 = vpack.c.bf16 %v3338_v52, %v3337_v33  ;;  %vm9224_vm7 = vmmov %vm9205_vm3  ;;  %v7605_v27 = vld [vmem:[%s8607_s3] ss:$0 sm:$0xff] }
 0x2fb   : > { %v3054_v55 = vpop.f32.mrf.mxu0  ;;  %v7591_v59 = vpack.c.bf16 %v7578_v36, %v4679_v47  ;;  %v3125_v8 = vmul.f32 %v7596_v4, %v3089_v19  ;;  %5780 = vmatmul.msk.bf16.gmra.mxu3 %vm9224_vm7, %v3712_v42  ;;  %v2573_v13 = vpop.f32.mrf.mxu2  ;;  %v9226_v33 = vld [vmem:[#allocation69_spill] sm:$0xff]  ;;  %vm9228_vm7 = vmmov %vm9225_vm0 }
 0x2fc   : > { %5754 = vmatmul.msk.bf16.gmra.mxu1 %vm9205_vm3, %v3357_v31  ;;  %v2614_v52 = vadd.f32 %v2573_v13, %v9226_v33  ;;  %v9230_v13 = vld [vmem:[#allocation65_spill] sm:$0xff]  ;;  %v9231_v33 = vld [vmem:[#allocation66_spill] sm:$0xff] }
 0x2fd   : > { %9223 = vst [vmem:[#allocation97_spill] sm:$0xff] %v7591_v59  ;;  %v3161_v34 = vadd.f32 %v7605_v27, %v3125_v8  ;;  %v7617_v59 = vld [vmem:[#allocation3 + $0xd1] sm:$0xff] }
 0x2fe   : > { %5798 = vmatmul.msk.bf16.gmra.mxu0 %vm9225_vm0, %v3967_v17  ;;  %v2795_v2 = vpop.f32.mrf.mxu3  ;;  %vm9229_vm0 = vnez %v9102_v54 }
 0x2ff   : > { %v3193_v47 = vmax.f32 %v3161_v34, 0.0  ;;  %v2836_v7 = vadd.f32 %v2795_v2, %v2614_v52  ;;  %v2361_v34 = vadd.f32 %v9231_v33, %v9230_v13  ;;  %v7638_v33 = vld [vmem:[#allocation3 + $0x97] sm:$0xff] }
 0x300   : > { %v7609_v19 = vpop.f32.mrf.mxu1 }
 0x301   : > { %9227 = vst [vmem:[#allocation95_spill] sm:$0xff] %v7609_v19  ;;  %v7611_v42 = vld [vmem:[#allocation3 + $0xd9] sm:$0xff]  ;;  %v3090_v31 = vadd.f32 %v7524_v40, %v2836_v7  ;;  %v3688_v19 = vsel %vm6629_vm10, %v7301_v60, 0.0 }
 0x302   : > { %3225 = vst.msk [vmem:[#allocation3 + $0xe8] sm:$0xff] %vm9228_vm7, %v3193_v47  ;;  %v4428_v8 = vsel %vm9229_vm0, %v7611_v42, 0.0  ;;  %vm9233_vm7 = vmmov %vm9205_vm3  ;;  %v3713_v60 = vpack.c.bf16 %v3688_v19, %v7308_v3 }
 0x303   : > { %v7615_v17 = vpop.f32.mrf.mxu0  ;;  %v3126_v52 = vmul.f32 %v7596_v4, %v3090_v31  ;;  %v7626_v2 = vpack.c.bf16 %v4428_v8, %v7617_v59  ;;  %v2575_v50 = vpop.f32.mrf.mxu2  ;;  %v3302_v8 = vpack.c.bf16 %v7515_v26, %v3276_v14  ;;  %v9235_v14 = vld [vmem:[#allocation46_spill] sm:$0xff] }
 0x304   : > { %v2615_v7 = vadd.f32 %v2575_v50, %v2361_v34  ;;  %v3339_v50 = vld [vmem:[#allocation3 + $0xe0] sm:$0xff]  ;;  %vm9236_vm10 = vnez %v9235_v14 }
 0x305   : > { %9232 = vst [vmem:[#allocation53_spill] sm:$0xff] %v7626_v2  ;;  %v3162_v47 = vadd.f32 %v7605_v27, %v3126_v52  ;;  %v3943_v26 = vsel %vm9236_vm10, %v7635_v12, 0.0 }
 0x306   : > { %v2797_v40 = vpop.f32.mrf.mxu3 }
 0x307   : > { %v3194_v13 = vmax.f32 %v3162_v47, 0.0  ;;  %v2837_v31 = vadd.f32 %v2797_v40, %v2615_v7  ;;  %v3968_v7 = vpack.c.bf16 %v7638_v33, %v3943_v26  ;;  %v5825_v26 = vld [vmem:[%s8608_s4 + $0x14] sm:$0xf] }
 0x308   : > { %v7640_v2 = vpop.f32.mrf.mxu1  ;;  %5764 = vmatmul.msk.bf16.gmra.mxu2 %vm9233_vm7, %v3302_v8  ;;  %vm9238_vm7 = vmmov %vm9205_vm3 }
 0x309   : > { %v3340_v34 = vld [vmem:[#allocation3 + $0xe8] sm:$0xff]  ;;  %3226 = vst.msk [vmem:[#allocation3 + $0xf0] sm:$0xff] %vm9205_vm3, %v3194_v13  ;;  %v3091_v23 = vadd.f32 %v7548_v61, %v2837_v31 }
 0x30a   : > { %v7646_v52 = vpack.c.bf16 %v3340_v34, %v3339_v50 }
 0x30b   : > { %v7648_v47 = vpop.f32.mrf.mxu0  ;;  %v3127_v40 = vmul.f32 %v7596_v4, %v3091_v23  ;;  %5781 = vmatmul.msk.bf16.gmra.mxu3 %vm9237_vm11, %v3713_v60  ;;  %v2578_v61 = vpop.f32.mrf.mxu2  ;;  %vm9240_vm11 = vcmask 1043456  }
 0x30c   : > { %9234 = vst [vmem:[#allocation96_spill] sm:$0xff] %v7646_v52  ;;  %5755 = vmatmul.msk.bf16.gmra.mxu1 %vm9205_vm3, %v7646_v52  ;;  %v2616_v19 = vadd.f32 %v2578_v61, %v7082_v46  ;;  %v5842_v46 = vld [vmem:[%s8608_s4 + $0x18] sm:$0xf]  ;;  %vm9241_vm3 = vmmov %vm9240_vm11  ;;  %v9242_v61 = vld [vmem:[#allocation70_spill] sm:$0xff] }
 0x30d   : > { %v3163_v3 = vadd.f32 %v7605_v27, %v3127_v40  ;;  %v4758_v40 = vsel %vm9241_vm3, %v5842_v46, 0 }
 0x30e   : > { %5799 = vmatmul.msk.bf16.gmra.mxu0 %vm9238_vm7, %v3968_v7  ;;  %v2800_v13 = vpop.f32.mrf.mxu3  ;;  %v4504_v7 = vsel %vm9240_vm11, %v5825_v26, 0  ;;  %4767 = vmatpush.bf16.msra.mxu3 %v4758_v40  ;;  %v7694_v40 = vld [vmem:[#allocation3 + $0x9f] sm:$0xff]  ;;  %vm9246_vm11 = vmmov %vm9238_vm7 }
 0x30f   : > { %v3195_v31 = vmax.f32 %v3163_v3, 0.0  ;;  %v2838_v8 = vadd.f32 %v2800_v13, %v2616_v19  ;;  %v9243_v3 = vld [vmem:[#allocation67_spill] sm:$0xff]  ;;  %4513 = vmatpush.bf16.msra.mxu2 %v4504_v7  ;;  %v3690_v7 = vsel %vm6663_vm12, %v7341_v5, 0.0  ;;  %vm9248_vm12 = vmmov %vm9238_vm7 }
 0x310   : > { %v7661_v50 = vpop.f32.mrf.mxu1  ;;  %v7663_v34 = vld [vmem:[#allocation3 + $0xe9] sm:$0xff]  ;;  %v2363_v19 = vadd.f32 %v9243_v3, %v9242_v61  ;;  %v3714_v5 = vpack.c.bf16 %v3690_v7, %v7346_v15  ;;  %v5876_v15 = vld [vmem:[%s8608_s4 + $0x20] sm:$0xf] }
 0x311   : > { %3227 = vst.msk [vmem:[#allocation3 + $0xf8] sm:$0xff] %vm9239_vm15, %v3195_v31  ;;  %v3092_v23 = vadd.f32 %v3054_v55, %v2838_v8  ;;  %v7679_v55 = vld [vmem:[#allocation3 + $0xe1] sm:$0xff]  ;;  %vm9244_vm15 = vnez %v9110_v11 }
 0x312   : > { %v4430_v31 = vsel %vm9244_vm15, %v7663_v34, 0.0  ;;  %v4160_v11 = vld [vmem:[#allocation3 + $0x68] sm:$0xff] }
 0x313   : > { %v7666_v60 = vpop.f32.mrf.mxu0  ;;  %v3128_v13 = vmul.f32 %v7596_v4, %v3092_v23  ;;  %v2580_v8 = vpop.f32.mrf.mxu2  ;;  %v7685_v58 = vpack.c.bf16 %v4430_v31, %v7679_v55  ;;  %v3278_v23 = vsel %vm9236_vm10, %v7568_v1, 0.0  ;;  %v7697_v31 = vld [vmem:[#allocation3 + $0xa7] sm:$0xff]  ;;  %vm9249_vm10 = vmmov %vm9241_vm3 }
 0x314   : > { %v2617_v46 = vadd.f32 %v2580_v8, %v2363_v19  ;;  %v3303_v52 = vpack.c.bf16 %v7573_v51, %v3278_v23  ;;  %v3341_v19 = vld [vmem:[#allocation3 + $0xf0] sm:$0xff]  ;;  %v5859_v51 = vld [vmem:[%s8608_s4 + $0x1c] sm:$0xf]  ;;  %v5234_v7 = vsel %vm9249_vm10, %v5876_v15, 0 }
 0x315   : > { %9245 = vst [vmem:[#allocation55_spill] sm:$0xff] %v7685_v58  ;;  %v3164_v26 = vadd.f32 %v7605_v27, %v3128_v13  ;;  %5243 = vmatpush.bf16.msra.mxu1 %v5234_v7 }
 0x316   : > { %v2802_v28 = vpop.f32.mrf.mxu3 }
 0x317   : > { %v3196_v61 = vmax.f32 %v3164_v26, 0.0  ;;  %v2839_v3 = vadd.f32 %v2802_v28, %v2617_v46  ;;  %v3945_v28 = vsel %vm9193_vm1, %v7694_v40, 0.0 }
 0x318   : > { %v7699_v58 = vpop.f32.mrf.mxu1  ;;  %v3342_v13 = vld [vmem:[#allocation3 + $0xf8] sm:$0xff]  ;;  %5765 = vmatmul.msk.bf16.gmra.mxu2 %vm9246_vm11, %v3303_v52  ;;  %v3969_v46 = vpack.c.bf16 %v7697_v31, %v3945_v28  ;;  %vm9247_vm11 = vmmov %vm9238_vm7 }
 0x319   : > { %3228 = vst.msk [vmem:[#allocation3 + $0x100] sm:$0xff] %vm9238_vm7, %v3196_v61  ;;  %v3093_v1 = vadd.f32 %v7615_v17, %v2839_v3  ;;  %v7705_v8 = vpack.c.bf16 %v3342_v13, %v3341_v19  ;;  %v4980_v17 = vsel %vm9241_vm3, %v5859_v51, 0  ;;  %v9250_v3 = vld [vmem:[#allocation71_spill] sm:$0xff]  ;;  %vm9251_vm3 = vmmov %vm9238_vm7 }
 0x31a   : > { %4989 = vmatpush.bf16.msra.mxu0 %v4980_v17  ;;  %v7734_v14 = vld [vmem:[#allocation3 + $0xf1] sm:$0xff]  ;;  %v9252_v17 = vld [vmem:[#allocation73_spill] sm:$0xff]  ;;  %vm9254_vm10 = vmmov %vm9251_vm3 }
 0x31b   : > { %v7707_v26 = vpop.f32.mrf.mxu0  ;;  %v3129_v52 = vmul.f32 %v7596_v4, %v3093_v1  ;;  %5782 = vmatmul.msk.bf16.gmra.mxu3 %vm9238_vm7, %v3714_v5  ;;  %v2583_v23 = vpop.f32.mrf.mxu2  ;;  %v2365_v15 = vadd.f32 %v7339_v63, %v9252_v17 }
 0x31c   : > { %5756 = vmatmul.msk.bf16.gmra.mxu1 %vm9247_vm11, %v7705_v8  ;;  %v2618_v19 = vadd.f32 %v2583_v23, %v9250_v3 }
 0x31d   : > { %v3165_v61 = vadd.f32 %v7605_v27, %v3129_v52 }
 0x31e   : > { %5800 = vmatmul.msk.bf16.gmra.mxu0 %vm9248_vm12, %v3969_v46  ;;  %v2805_v13 = vpop.f32.mrf.mxu3  ;;  %vm9255_vm12 = vmmov %vm9251_vm3 }
 0x31f   : > { %v3197_v1 = vmax.f32 %v3165_v61, 0.0  ;;  %v2840_v5 = vadd.f32 %v2805_v13, %v2618_v19  ;;  %v3280_v13 = vsel %vm9193_vm1, %v7635_v12, 0.0  ;;  %vm9256_vm1 = vmmov %vm9251_vm3 }
 0x320   : > { %v7728_v28 = vpop.f32.mrf.mxu1  ;;  %v7730_v51 = vld [vmem:[#allocation3 + $0xf9] sm:$0xff]  ;;  %vm9257_vm7 = vmmov %vm9256_vm1 }
 0x321   : > { %3229 = vst.msk [vmem:[#allocation3 + $0x108] sm:$0xff] %vm9251_vm3, %v3197_v1  ;;  %v3094_v49 = vadd.f32 %v7648_v47, %v2840_v5  ;;  %v4432_v52 = vsel %vm6853_vm5, %v7730_v51, 0.0  ;;  %v3692_v1 = vsel %vm6697_vm14, %v7385_v10, 0.0  ;;  %v3947_v10 = vsel %vm9208_vm4, %v7455_v9, 0.0  ;;  %vm9258_vm11 = vmmov %vm9256_vm1 }
 0x322   : > { %v7743_v7 = vpack.c.bf16 %v4432_v52, %v7734_v14  ;;  %v3343_v52 = vld [vmem:[#allocation3 + $0x100] sm:$0xff]  ;;  %v3715_v22 = vpack.c.bf16 %v3692_v1, %v7390_v18  ;;  %vm9259_vm3 = vmmov %vm9256_vm1 }
 0x323   : > { %v4041_v46 = vpop.f32.mrf.mxu0  ;;  %v3130_v23 = vmul.f32 %v7596_v4, %v3094_v49  ;;  %v2585_v61 = vpop.f32.mrf.mxu2  ;;  %v3304_v49 = vpack.c.bf16 %v7638_v33, %v3280_v13  ;;  %v3970_v33 = vpack.c.bf16 %v7462_v32, %v3947_v10  ;;  %v4152_v10 = vld [vmem:[#allocation3 + $0x28] sm:$0xff] }
 0x324   : > { %9253 = vst [vmem:[#allocation56_spill] sm:$0xff] %v7743_v7  ;;  %v2619_v19 = vadd.f32 %v2585_v61, %v2365_v15 }
 0x325   : > { %v3166_v3 = vadd.f32 %v7605_v27, %v3130_v23 }
 0x326   : > { %v2807_v47 = vpop.f32.mrf.mxu3 }
 0x327   : > { %v3198_v5 = vmax.f32 %v3166_v3, 0.0  ;;  %v2841_v63 = vadd.f32 %v2807_v47, %v2619_v19 }
 0x328   : > { %v7753_v17 = vpop.f32.mrf.mxu1  ;;  %v3344_v7 = vld [vmem:[#allocation3 + $0x108] sm:$0xff]  ;;  %5766 = vmatmul.msk.bf16.gmra.mxu2 %vm9255_vm12, %v3304_v49  ;;  %vm9262_vm12 = vmmov %vm9256_vm1 }
 0x329   : > { %3230 = vst.msk [vmem:[#allocation3 + $0x110] sm:$0xff] %vm9254_vm10, %v3198_v5  ;;  %v3095_v15 = vadd.f32 %v7666_v60, %v2841_v63  ;;  %v7759_v12 = vpack.c.bf16 %v3344_v7, %v3343_v52  ;;  %v7777_v5 = vld [vmem:[#allocation3 + $0x101] sm:$0xff]  ;;  %vm9260_vm10 = vnez %v9131_v57 }
 0x32b   : > { %v4044_v23 = vpop.f32.mrf.mxu0  ;;  %v3131_v61 = vmul.f32 %v7596_v4, %v3095_v15  ;;  %5783 = vmatmul.msk.bf16.gmra.mxu3 %vm9256_vm1, %v3715_v22  ;;  %v3563_v60 = vpop.f32.mrf.mxu2  ;;  %v3282_v22 = vsel %vm9208_vm4, %v7694_v40, 0.0  ;;  %vm9263_vm4 = vmmov %vm9256_vm1 }
 0x32c   : > { %5757 = vmatmul.msk.bf16.gmra.mxu1 %vm9257_vm7, %v7759_v12  ;;  %v3564_v7 = vadd.f32 %v3563_v60, %v7358_v29  ;;  %vm9265_vm7 = vmmov %vm9256_vm1 }
 0x32d   : > { %v3167_v18 = vadd.f32 %v7605_v27, %v3131_v61  ;;  %v3305_v61 = vpack.c.bf16 %v7697_v31, %v3282_v22 }
 0x32e   : > { %5801 = vmatmul.msk.bf16.gmra.mxu0 %vm9258_vm11, %v3970_v33  ;;  %v3785_v3 = vpop.f32.mrf.mxu3  ;;  %vm9266_vm11 = vmmov %vm9256_vm1 }
 0x32f   : > { %v3199_v19 = vmax.f32 %v3167_v18, 0.0  ;;  %v3865_v47 = vadd.f32 %v3785_v3, %v3564_v7  ;;  %v4151_v18 = vld [vmem:[#allocation3 + $0x20] sm:$0xff] }
 0x330   : > { %v7772_v13 = vpop.f32.mrf.mxu1  ;;  %v7774_v1 = vld [vmem:[#allocation3 + $0x109] sm:$0xff]  ;;  %v4183_v7 = vpack.c.bf16 %v4152_v10, %v4151_v18  ;;  %v3284_v18 = vsel %vm9222_vm8, %v7455_v9, 0.0  ;;  %vm9267_vm8 = vnez %v8838_v16 }
 0x331   : > { %3231 = vst.msk [vmem:[#allocation3 + $0x118] sm:$0xff] %vm9259_vm3, %v3199_v19  ;;  %v7780_v63 = vadd.f32 %v7707_v26, %v3865_v47  ;;  %v4434_v27 = vsel %vm9260_vm10, %v7774_v1, 0.0  ;;  %v3694_v26 = vsel %vm9200_vm9, %v7431_v48, 0.0  ;;  %v3971_v47 = vpack.c.bf16 %v7519_v35, %v3949_v38  ;;  %vm9268_vm3 = vmmov %vm9256_vm1 }
 0x332   : > { %v7786_v29 = vpack.c.bf16 %v4434_v27, %v7777_v5  ;;  %v3306_v38 = vpack.c.bf16 %v7462_v32, %v3284_v18  ;;  %v3951_v25 = vsel %vm9267_vm8, %v7570_v45, 0.0  ;;  %v3286_v18 = vsel %vm9267_vm8, %v7512_v21, 0.0 }
 0x333   : > { %v4046_v4 = vpop.f32.mrf.mxu0  ;;  %v3565_v49 = vpop.f32.mrf.mxu2 }
 0x334   : > { %9261 = vst [vmem:[#allocation52_spill] sm:$0xff] %v7786_v29  ;;  %v3566_v52 = vadd.f32 %v3565_v49, %v7383_v20  ;;  %v3716_v20 = vpack.c.bf16 %v3694_v26, %v7436_v24 }
 0x336   : > { %v3787_v15 = vpop.f32.mrf.mxu3 }
 0x337   : > { %v3866_v33 = vadd.f32 %v3787_v15, %v3566_v52 }
 0x338   : > { %v7796_v60 = vpop.f32.mrf.mxu1  ;;  %5767 = vmatmul.msk.bf16.gmra.mxu2 %vm9262_vm12, %v3305_v61  ;;  %v4403_v48 = vld [vmem:[#allocation3 + $0x111] sm:$0xff]  ;;  %v4404_v19 = vld [vmem:[#allocation3 + $0x119] sm:$0xff]  ;;  %vm9269_vm12 = vmmov %vm9256_vm1 }
 0x339   : > { %v7803_v40 = vadd.f32 %v4041_v46, %v3866_v33  ;;  %v5164_v31 = vsel %vm9260_vm10, %v4404_v19, 0.0 }
 0x33a   : > { %v7810_v24 = vpack.c.bf16 %v5164_v31, %v4403_v48 }
 0x33b   : > { %v4049_v3 = vpop.f32.mrf.mxu0  ;;  %5784 = vmatmul.msk.bf16.gmra.mxu3 %vm9263_vm4, %v3716_v20  ;;  %v3568_v27 = vpop.f32.mrf.mxu2  ;;  %v3696_v20 = vsel %vm9215_vm6, %v7487_v41, 0.0  ;;  %v3972_v41 = vpack.c.bf16 %v7578_v36, %v3951_v25  ;;  %vm9270_vm4 = vmmov %vm9256_vm1 }
 0x33c   : > { %5809 = vmatmul.msk.bf16.vlgmr.msrb.gmra.mxu1 %vm9256_vm1, %v4183_v7  ;;  %9264 = vst [vmem:[#allocation58_spill] sm:$0xff] %v7810_v24  ;;  %v3569_v49 = vadd.f32 %v3568_v27, %v7412_v56  ;;  %v4154_v56 = vld [vmem:[#allocation3 + $0x38] sm:$0xff] }
 0x33e   : > { %5802 = vmatmul.msk.bf16.gmra.mxu0 %vm9265_vm7, %v3971_v47  ;;  %v3790_v46 = vpop.f32.mrf.mxu3 }
 0x33f   : > { %v3867_v52 = vadd.f32 %v3790_v46, %v3569_v49 }
 0x340   : > { %v7814_v15 = vpop.f32.mrf.mxu1 }
 0x341   : > { %v7816_v26 = vadd.f32 %v4044_v23, %v3867_v52  ;;  %v4153_v23 = vld [vmem:[#allocation3 + $0x30] sm:$0xff] }
 0x342   : > { %v7830_v19 = vpack.c.bf16 %v4154_v56, %v4153_v23  ;;  %v3921_v56 = vld [vmem:[#allocation3 + $0xdf] sm:$0xff]  ;;  %v3922_v23 = vld [vmem:[#allocation3 + $0xe7] sm:$0xff] }
 0x343   : > { %v4051_v22 = vpop.f32.mrf.mxu0  ;;  %v3570_v10 = vpop.f32.mrf.mxu2 }
 0x344   : > { %v3571_v33 = vadd.f32 %v3570_v10, %v7429_v0  ;;  %v3717_v0 = vpack.c.bf16 %v3696_v20, %v7493_v6  ;;  %v9271_v10 = vld [vmem:[#allocation88_spill] sm:$0xff]  ;;  %v3698_v20 = vsel %vm9229_vm0, %v7544_v37, 0.0 }
 0x345   : > { %v3718_v25 = vpack.c.bf16 %v3698_v20, %v7550_v39  ;;  %v9278_v20 = vld [vmem:[#allocation90_spill] sm:$0xff] }
 0x346   : > { %v3792_v61 = vpop.f32.mrf.mxu3 }
 0x347   : > { %v3868_v7 = vadd.f32 %v3792_v61, %v3571_v33 }
 0x348   : > { %v7826_v48 = vpop.f32.mrf.mxu1  ;;  %5768 = vmatmul.msk.bf16.gmra.mxu2 %vm9266_vm11, %v3306_v38  ;;  %v3307_v38 = vpack.c.bf16 %v7519_v35, %v3286_v18  ;;  %vm9274_vm11 = vmmov %vm9256_vm1 }
 0x349   : > { %v7835_v9 = vadd.f32 %v4046_v4, %v3868_v7 }
 0x34b   : > { %v4054_v47 = vpop.f32.mrf.mxu0  ;;  %5785 = vmatmul.msk.bf16.gmra.mxu3 %vm9268_vm3, %v3717_v0  ;;  %v3573_v32 = vpop.f32.mrf.mxu2  ;;  %v4155_v0 = vld [vmem:[#allocation3 + $0x40] sm:$0xff]  ;;  %vm9275_vm3 = vmmov %vm9256_vm1 }
 0x34c   : > { %5810 = vmatmul.msk.bf16.gmra.mxu1 %vm9269_vm12, %v7830_v19  ;;  %v3574_v6 = vadd.f32 %v3573_v32, %v7460_v43  ;;  %v4156_v43 = vld [vmem:[#allocation3 + $0x48] sm:$0xff]  ;;  %v9272_v32 = vld [vmem:[#allocation38_spill] sm:$0xff]  ;;  %vm9276_vm12 = vmmov %vm9256_vm1 }
 0x34d   : > { %vm9273_vm7 = vnez %v9272_v32 }
 0x34e   : > { %5803 = vmatmul.msk.bf16.gmra.mxu0 %vm9270_vm4, %v3972_v41  ;;  %v3795_v31 = vpop.f32.mrf.mxu3  ;;  %v7859_v41 = vpack.c.bf16 %v4156_v43, %v4155_v0  ;;  %v3700_v0 = vsel %vm9244_vm15, %v7611_v42, 0.0  ;;  %vm9279_vm4 = vmmov %vm9256_vm1 }
 0x34f   : > { %v3869_v27 = vadd.f32 %v3795_v31, %v3574_v6  ;;  %v3953_v6 = vsel %vm9273_vm7, %v3921_v56, 0.0 }
 0x350   : > { %v7843_v49 = vpop.f32.mrf.mxu1  ;;  %v3973_v31 = vpack.c.bf16 %v3922_v23, %v3953_v6  ;;  %v3923_v6 = vld [vmem:[#allocation3 + $0xef] sm:$0xff] }
 0x351   : > { %v7845_v52 = vadd.f32 %v4049_v3, %v3869_v27  ;;  %v9277_v27 = vld [vmem:[#allocation87_spill] sm:$0xff] }
 0x353   : > { %v4056_v46 = vpop.f32.mrf.mxu0  ;;  %v3575_v4 = vpop.f32.mrf.mxu2 }
 0x354   : > { %v3576_v33 = vadd.f32 %v3575_v4, %v9271_v10 }
 0x356   : > { %v3797_v61 = vpop.f32.mrf.mxu3 }
 0x357   : > { %v3870_v7 = vadd.f32 %v3797_v61, %v3576_v33 }
 0x358   : > { %v7855_v3 = vpop.f32.mrf.mxu1  ;;  %5769 = vmatmul.msk.bf16.gmra.mxu2 %vm9256_vm1, %v3307_v38  ;;  %v3288_v38 = vsel %vm9273_vm7, %v7570_v45, 0.0 }
 0x359   : > { %v7863_v37 = vadd.f32 %v4051_v22, %v3870_v7 }
 0x35b   : > { %v4059_v21 = vpop.f32.mrf.mxu0  ;;  %5786 = vmatmul.msk.bf16.gmra.mxu3 %vm9274_vm11, %v3718_v25  ;;  %v3578_v35 = vpop.f32.mrf.mxu2  ;;  %v4158_v25 = vld [vmem:[#allocation3 + $0x58] sm:$0xff]  ;;  %vm9282_vm11 = vmmov %vm9275_vm3 }
 0x35c   : > { %5811 = vmatmul.msk.bf16.gmra.mxu1 %vm9275_vm3, %v7859_v41  ;;  %v3579_v4 = vadd.f32 %v3578_v35, %v9277_v27  ;;  %v3308_v35 = vpack.c.bf16 %v7578_v36, %v3288_v38  ;;  %v3924_v27 = vld [vmem:[#allocation3 + $0xf7] sm:$0xff] }
 0x35e   : > { %5804 = vmatmul.msk.bf16.gmra.mxu0 %vm9276_vm12, %v3973_v31  ;;  %v3800_v39 = vpop.f32.mrf.mxu3  ;;  %vm9283_vm12 = vmmov %vm9275_vm3 }
 0x35f   : > { %v3871_v10 = vadd.f32 %v3800_v39, %v3579_v4  ;;  %v4157_v4 = vld [vmem:[#allocation3 + $0x50] sm:$0xff]  ;;  %v3719_v39 = vpack.c.bf16 %v3700_v0, %v7617_v59 }
 0x360   : > { %v7870_v33 = vpop.f32.mrf.mxu1 }
 0x361   : > { %v7872_v18 = vadd.f32 %v4054_v47, %v3871_v10  ;;  %v7886_v10 = vpack.c.bf16 %v4158_v25, %v4157_v4 }
 0x363   : > { %v4061_v61 = vpop.f32.mrf.mxu0  ;;  %v3580_v22 = vpop.f32.mrf.mxu2 }
 0x364   : > { %v3581_v43 = vadd.f32 %v3580_v22, %v9278_v20  ;;  %v9280_v22 = vld [vmem:[#allocation43_spill] sm:$0xff] }
 0x365   : > { %vm9281_vm1 = vnez %v9280_v22 }
 0x366   : > { %v3802_v7 = vpop.f32.mrf.mxu3  ;;  %v3955_v20 = vsel %vm9281_vm1, %v3923_v6, 0.0 }
 0x367   : > { %v3872_v31 = vadd.f32 %v3802_v7, %v3581_v43  ;;  %v3974_v24 = vpack.c.bf16 %v3924_v27, %v3955_v20  ;;  %v9284_v43 = vld [vmem:[#allocation50_spill] sm:$0xff] }
 0x368   : > { %5770 = vmatmul.msk.bf16.gmra.mxu2 %vm9279_vm4, %v3308_v35  ;;  %vm9286_vm4 = vmmov %vm9275_vm3 }
 0x369   : > { %v7882_v47 = vpop.f32.mrf.mxu1  ;;  %v7890_v42 = vadd.f32 %v4056_v46, %v3872_v31  ;;  %v9285_v31 = vld [vmem:[#allocation95_spill] sm:$0xff] }
 0x36b   : > { %v4064_v45 = vpop.f32.mrf.mxu0  ;;  %5787 = vmatmul.msk.bf16.gmra.mxu3 %vm9282_vm11, %v3719_v39  ;;  %v3583_v36 = vpop.f32.mrf.mxu2  ;;  %v3290_v39 = vsel %vm9281_vm1, %v3921_v56, 0.0  ;;  %vm9288_vm11 = vmmov %vm9275_vm3 }
 0x36c   : > { %5812 = vmatmul.msk.bf16.gmra.mxu1 %vm9275_vm3, %v7886_v10  ;;  %v3584_v7 = vadd.f32 %v3583_v36, %v9284_v43  ;;  %v3925_v36 = vld [vmem:[#allocation3 + $0xff] sm:$0xff] }
 0x36d   : > { %v3957_v30 = vsel %vm9140_vm2, %v3925_v36, 0.0 }
 0x36e   : > { %5805 = vmatmul.msk.bf16.gmra.mxu0 %vm9283_vm12, %v3974_v24  ;;  %v3805_v59 = vpop.f32.mrf.mxu3  ;;  %v3702_v24 = vsel %vm6853_vm5, %v7663_v34, 0.0  ;;  %vm9289_vm12 = vmmov %vm9275_vm3 }
 0x36f   : > { %v3873_v38 = vadd.f32 %v3805_v59, %v3584_v7  ;;  %v3309_v7 = vpack.c.bf16 %v3922_v23, %v3290_v39  ;;  %v3926_v59 = vld [vmem:[#allocation3 + $0x107] sm:$0xff]  ;;  %vm9299_vm5 = vmmov %vm9275_vm3 }
 0x370   : > { %v3975_v34 = vpack.c.bf16 %v3926_v59, %v3957_v30 }
 0x371   : > { %v7897_v0 = vpop.f32.mrf.mxu1  ;;  %v7899_v35 = vadd.f32 %v4059_v21, %v3873_v38  ;;  %v4159_v21 = vld [vmem:[#allocation3 + $0x60] sm:$0xff]  ;;  %v3720_v38 = vpack.c.bf16 %v3702_v24, %v7679_v55 }
 0x373   : > { %v4066_v25 = vpop.f32.mrf.mxu0  ;;  %v3585_v46 = vpop.f32.mrf.mxu2 }
 0x374   : > { %v3586_v4 = vadd.f32 %v3585_v46, %v9285_v31  ;;  %v7911_v46 = vpack.c.bf16 %v4160_v11, %v4159_v21  ;;  %v3704_v21 = vsel %vm9260_vm10, %v7730_v51, 0.0  ;;  %vm9293_vm10 = vmmov %vm9275_vm3 }
 0x376   : > { %v3807_v20 = vpop.f32.mrf.mxu3 }
 0x377   : > { %v3874_v43 = vadd.f32 %v3807_v20, %v3586_v4 }
 0x378   : > { %5771 = vmatmul.msk.bf16.gmra.mxu2 %vm9286_vm4, %v3309_v7  ;;  %v3292_v7 = vsel %vm9140_vm2, %v3923_v6, 0.0  ;;  %vm9290_vm4 = vmmov %vm9275_vm3  ;;  %v9291_v6 = vld [vmem:[#allocation47_spill] sm:$0xff] }
 0x379   : > { %v7907_v54 = vpop.f32.mrf.mxu1  ;;  %v7915_v62 = vadd.f32 %v4061_v61, %v3874_v43 }
 0x37b   : > { %v4069_v31 = vpop.f32.mrf.mxu0  ;;  %5788 = vmatmul.msk.bf16.gmra.mxu3 %vm9288_vm11, %v3720_v38  ;;  %v3588_v23 = vpop.f32.mrf.mxu2  ;;  %v4162_v38 = vld [vmem:[#allocation3 + $0x78] sm:$0xff]  ;;  %vm9292_vm11 = vnez %v9291_v6 }
 0x37c   : > { %5813 = vmatmul.msk.bf16.gmra.mxu1 %vm9275_vm3, %v7911_v46  ;;  %v3589_v4 = vadd.f32 %v3588_v23, %v7640_v2  ;;  %v3927_v2 = vld [vmem:[#allocation3 + $0x10f] sm:$0xff]  ;;  %v3310_v23 = vpack.c.bf16 %v3924_v27, %v3292_v7 }
 0x37d   : > { %v3959_v53 = vsel %vm9292_vm11, %v3927_v2, 0.0 }
 0x37e   : > { %5806 = vmatmul.msk.bf16.gmra.mxu0 %vm9289_vm12, %v3975_v34  ;;  %v3810_v55 = vpop.f32.mrf.mxu3  ;;  %vm9294_vm12 = vmmov %vm9275_vm3 }
 0x37f   : > { %v3875_v11 = vadd.f32 %v3810_v55, %v3589_v4  ;;  %v3928_v4 = vld [vmem:[#allocation3 + $0x117] sm:$0xff] }
 0x380   : > { %v3976_v51 = vpack.c.bf16 %v3928_v4, %v3959_v53 }
 0x381   : > { %v7922_v20 = vpop.f32.mrf.mxu1  ;;  %v7924_v24 = vadd.f32 %v4064_v45, %v3875_v11  ;;  %v4161_v45 = vld [vmem:[#allocation3 + $0x70] sm:$0xff] }
 0x382   : > { %v7936_v11 = vpack.c.bf16 %v4162_v38, %v4161_v45  ;;  %v4164_v45 = vld [vmem:[#allocation3 + $0x88] sm:$0xff] }
 0x383   : > { %v4071_v39 = vpop.f32.mrf.mxu0  ;;  %v3590_v61 = vpop.f32.mrf.mxu2 }
 0x384   : > { %v3591_v30 = vadd.f32 %v3590_v61, %v7661_v50  ;;  %v3721_v50 = vpack.c.bf16 %v3704_v21, %v7734_v14 }
 0x386   : > { %v3812_v43 = vpop.f32.mrf.mxu3 }
 0x387   : > { %v3876_v34 = vadd.f32 %v3812_v43, %v3591_v30 }
 0x388   : > { %5772 = vmatmul.msk.bf16.gmra.mxu2 %vm9290_vm4, %v3310_v23  ;;  %v9295_v23 = vld [vmem:[#allocation91_spill] sm:$0xff] }
 0x389   : > { %v7932_v55 = vpop.f32.mrf.mxu1  ;;  %v7940_v57 = vadd.f32 %v4066_v25, %v3876_v34  ;;  %v3294_v34 = vsel %vm9292_vm11, %v3925_v36, 0.0  ;;  %vm9296_vm4 = vnez %v9295_v23 }
 0x38a   : > { %v3706_v4 = vsel %vm9296_vm4, %v7774_v1, 0.0 }
 0x38b   : > { %v4074_v61 = vpop.f32.mrf.mxu0  ;;  %5789 = vmatmul.msk.bf16.gmra.mxu3 %vm9293_vm10, %v3721_v50  ;;  %v3593_v27 = vpop.f32.mrf.mxu2  ;;  %v3311_v50 = vpack.c.bf16 %v3926_v59, %v3294_v34  ;;  %vm9297_vm10 = vmmov %vm9275_vm3 }
 0x38c   : > { %5814 = vmatmul.msk.bf16.gmra.mxu1 %vm9275_vm3, %v7936_v11  ;;  %v3594_v30 = vadd.f32 %v3593_v27, %v7699_v58  ;;  %v4163_v27 = vld [vmem:[#allocation3 + $0x80] sm:$0xff] }
 0x38e   : > { %5807 = vmatmul.msk.bf16.gmra.mxu0 %vm9294_vm12, %v3976_v51  ;;  %v3815_v14 = vpop.f32.mrf.mxu3  ;;  %vm9298_vm12 = vmmov %vm9275_vm3 }
 0x38f   : > { %v3877_v43 = vadd.f32 %v3815_v14, %v3594_v30  ;;  %v7961_v30 = vpack.c.bf16 %v4164_v45, %v4163_v27  ;;  %v4373_v27 = vld [vmem:[#allocation3 + $0x21] sm:$0xff] }
 0x391   : > { %v7947_v7 = vpop.f32.mrf.mxu1  ;;  %v7949_v38 = vadd.f32 %v4069_v31, %v3877_v43  ;;  %v3722_v31 = vpack.c.bf16 %v3706_v4, %v7777_v5 }
 0x393   : > { %v4076_v21 = vpop.f32.mrf.mxu0  ;;  %v3595_v25 = vpop.f32.mrf.mxu2 }
 0x394   : > { %v3596_v53 = vadd.f32 %v3595_v25, %v7728_v28 }
 0x396   : > { %v3817_v2 = vpop.f32.mrf.mxu3 }
 0x397   : > { %v3878_v58 = vadd.f32 %v3817_v2, %v3596_v53  ;;  %v4374_v53 = vld [vmem:[#allocation3 + $0x29] sm:$0xff] }
 0x398   : > { %5773 = vmatmul.msk.bf16.gmra.mxu2 %vm9297_vm10, %v3311_v50  ;;  %v4406_v4 = vsel %vm6437_vm13, %v4374_v53, 0.0  ;;  %vm9303_vm10 = vmmov %vm9275_vm3 }
 0x399   : > { %v7957_v51 = vpop.f32.mrf.mxu1  ;;  %v7963_v14 = vadd.f32 %v4071_v39, %v3878_v58  ;;  %v4627_v58 = vld [vmem:[#allocation3 + $0x2f] sm:$0xff]  ;;  %vm9304_vm13 = vmmov %vm9275_vm3 }
 0x39b   : > { %v4079_v28 = vpop.f32.mrf.mxu0  ;;  %5790 = vmatmul.msk.bf16.gmra.mxu3 %vm9275_vm3, %v3722_v31  ;;  %v3598_v1 = vpop.f32.mrf.mxu2  ;;  %v4166_v31 = vld [vmem:[#allocation3 + $0x98] sm:$0xff] }
 0x39c   : > { %5815 = vmatmul.msk.bf16.gmra.mxu1 %vm9298_vm12, %v7961_v30  ;;  %v3599_v36 = vadd.f32 %v3598_v1, %v7753_v17  ;;  %v4437_v1 = vpack.c.bf16 %v4406_v4, %v4373_v27  ;;  %vm9305_vm12 = vmmov %vm9275_vm3 }
 0x39e   : > { %5860 = vmatmul.msk.bf16.vlgmr.msra.gmra.mxu0 %vm9299_vm5, %v7830_v19  ;;  %v3820_v59 = vpop.f32.mrf.mxu3  ;;  %v4628_v19 = vld [vmem:[#allocation3 + $0x37] sm:$0xff] }
 0x39f   : > { %v3879_v43 = vadd.f32 %v3820_v59, %v3599_v36  ;;  %v9301_v59 = vld [vmem:[#allocation4_spill] sm:$0xff] }
 0x3a0   : > { %vm9302_vm5 = vnez %v9301_v59  ;;  %v4629_v59 = vld [vmem:[#allocation3 + $0x3f] sm:$0xff] }
 0x3a1   : > { %v7971_v25 = vpop.f32.mrf.mxu1  ;;  %v7973_v2 = vadd.f32 %v4074_v61, %v3879_v43  ;;  %v4659_v44 = vsel %vm9302_vm5, %v4627_v58, 0.0  ;;  %v4165_v61 = vld [vmem:[#allocation3 + $0x90] sm:$0xff] }
 0x3a2   : > { %v4691_v43 = vpack.c.bf16 %v4628_v19, %v4659_v44  ;;  %v7983_v34 = vpack.c.bf16 %v4166_v31, %v4165_v61  ;;  %v5914_v19 = vld [vmem:[#allocation3 + $0x39] sm:$0xff]  ;;  %v9306_v31 = vld [vmem:[#allocation49_spill] sm:$0xff] }
 0x3a3   : > { %v4081_v5 = vpop.f32.mrf.mxu0  ;;  %v3600_v39 = vpop.f32.mrf.mxu2  ;;  %vm9307_vm5 = vnez %v9306_v31 }
 0x3a4   : > { %v3601_v45 = vadd.f32 %v3600_v39, %v7772_v13 }
 0x3a6   : > { %v3822_v50 = vpop.f32.mrf.mxu3 }
 0x3a7   : > { %v3880_v17 = vadd.f32 %v3822_v50, %v3601_v45 }
 0x3a8   : > { %5826 = vmatmul.msk.bf16.vlgmr.msra.gmra.mxu2 %vm9303_vm10, %v4437_v1 }
 0x3a9   : > { %v7978_v36 = vpop.f32.mrf.mxu1  ;;  %v7985_v13 = vadd.f32 %v4076_v21, %v3880_v17  ;;  %v4408_v17 = vsel %vm9307_vm5, %v5914_v19, 0.0  ;;  %vm9312_vm5 = vmmov %vm9275_vm3 }
 0x3ab   : > { %v4084_v53 = vpop.f32.mrf.mxu0  ;;  %5843 = vmatmul.msk.bf16.vlgmr.msra.gmra.mxu3 %vm9304_vm13, %v4691_v43  ;;  %v3603_v39 = vpop.f32.mrf.mxu2  ;;  %v4630_v43 = vld [vmem:[#allocation3 + $0x47] sm:$0xff]  ;;  %vm9310_vm13 = vmmov %vm9275_vm3 }
 0x3ac   : > { %5816 = vmatmul.msk.bf16.gmra.mxu1 %vm9275_vm3, %v7983_v34  ;;  %v3604_v4 = vadd.f32 %v3603_v39, %v7796_v60  ;;  %v5915_v60 = vld [vmem:[#allocation3 + $0x31] sm:$0xff] }
 0x3ad   : > { %v4438_v39 = vpack.c.bf16 %v4408_v17, %v5915_v60  ;;  %v9313_v60 = vld [vmem:[#allocation51_spill] sm:$0xff] }
 0x3ae   : > { %5861 = vmatmul.msk.bf16.gmra.mxu0 %vm9305_vm12, %v7859_v41  ;;  %v3825_v45 = vpop.f32.mrf.mxu3  ;;  %v4168_v41 = vld [vmem:[#allocation3 + $0xa8] sm:$0xff]  ;;  %vm9311_vm12 = vmmov %vm9275_vm3 }
 0x3af   : > { %v3881_v58 = vadd.f32 %v3825_v45, %v3604_v4  ;;  %v9308_v45 = vld [vmem:[#allocation17_spill] sm:$0xff] }
 0x3b0   : > { %vm9309_vm10 = vnez %v9308_v45  ;;  %v4631_v45 = vld [vmem:[#allocation3 + $0x4f] sm:$0xff] }
 0x3b1   : > { %v7993_v50 = vpop.f32.mrf.mxu1  ;;  %v7995_v27 = vadd.f32 %v4079_v28, %v3881_v58  ;;  %v4661_v23 = vsel %vm9309_vm10, %v4629_v59, 0.0  ;;  %v4167_v28 = vld [vmem:[#allocation3 + $0xa0] sm:$0xff]  ;;  %vm9314_vm10 = vnez %v9313_v60 }
 0x3b2   : > { %v4692_v19 = vpack.c.bf16 %v4630_v43, %v4661_v23  ;;  %v8006_v31 = vpack.c.bf16 %v4168_v41, %v4167_v28  ;;  %v5916_v41 = vld [vmem:[#allocation3 + $0x49] sm:$0xff]  ;;  %v4632_v28 = vld [vmem:[#allocation3 + $0x57] sm:$0xff] }
 0x3b3   : > { %v4086_v44 = vpop.f32.mrf.mxu0  ;;  %v3605_v21 = vpop.f32.mrf.mxu2 }
 0x3b4   : > { %v3606_v1 = vadd.f32 %v3605_v21, %v7814_v15 }
 0x3b6   : > { %v3827_v61 = vpop.f32.mrf.mxu3 }
 0x3b7   : > { %v3882_v6 = vadd.f32 %v3827_v61, %v3606_v1 }
 0x3b8   : > { %5827 = vmatmul.msk.bf16.gmra.mxu2 %vm9310_vm13, %v4438_v39  ;;  %v4410_v39 = vsel %vm9314_vm10, %v5916_v41, 0.0  ;;  %vm9319_vm10 = vmmov %vm9275_vm3 }
 0x3b9   : > { %v4261_v4 = vpop.f32.mrf.mxu1  ;;  %v8008_v21 = vadd.f32 %v4081_v5, %v3882_v6 }
 0x3ba   : > { %v8003_v58 = vadd.f32 %v4261_v4, %v7780_v63 }
 0x3bb   : > { %v4089_v15 = vpop.f32.mrf.mxu0  ;;  %5844 = vmatmul.msk.bf16.gmra.mxu3 %vm9275_vm3, %v4692_v19  ;;  %v3608_v17 = vpop.f32.mrf.mxu2 }
 0x3bc   : > { %5817 = vmatmul.msk.bf16.gmra.mxu1 %vm9311_vm12, %v8006_v31  ;;  %v3609_v63 = vadd.f32 %v3608_v17, %v7826_v48  ;;  %v4170_v48 = vld [vmem:[#allocation3 + $0xb8] sm:$0xff]  ;;  %v5917_v17 = vld [vmem:[#allocation3 + $0x41] sm:$0xff]  ;;  %vm9317_vm12 = vmmov %vm9275_vm3 }
 0x3be   : > { %5862 = vmatmul.msk.bf16.gmra.mxu0 %vm9312_vm5, %v7886_v10  ;;  %v3830_v1 = vpop.f32.mrf.mxu3  ;;  %vm9318_vm5 = vmmov %vm9275_vm3 }
 0x3bf   : > { %v3883_v59 = vadd.f32 %v3830_v1, %v3609_v63  ;;  %v4439_v63 = vpack.c.bf16 %v4410_v39, %v5917_v17  ;;  %v5918_v17 = vld [vmem:[#allocation3 + $0x59] sm:$0xff] }
 0x3c1   : > { %v4263_v61 = vpop.f32.mrf.mxu1  ;;  %v8019_v6 = vadd.f32 %v4084_v53, %v3883_v59  ;;  %v4169_v53 = vld [vmem:[#allocation3 + $0xb0] sm:$0xff] }
 0x3c2   : > { %v8017_v23 = vadd.f32 %v4263_v61, %v7803_v40  ;;  %v9315_v40 = vld [vmem:[#allocation23_spill] sm:$0xff]  ;;  %v8030_v60 = vpack.c.bf16 %v4170_v48, %v4169_v53  ;;  %v4634_v53 = vld [vmem:[#allocation3 + $0x67] sm:$0xff] }
 0x3c3   : > { %v4091_v43 = vpop.f32.mrf.mxu0  ;;  %v3610_v5 = vpop.f32.mrf.mxu2  ;;  %vm9316_vm13 = vnez %v9315_v40 }
 0x3c4   : > { %v3611_v4 = vadd.f32 %v3610_v5, %v7843_v49  ;;  %v4663_v61 = vsel %vm9316_vm13, %v4631_v45, 0.0 }
 0x3c5   : > { %v4693_v41 = vpack.c.bf16 %v4632_v28, %v4663_v61  ;;  %v4633_v61 = vld [vmem:[#allocation3 + $0x5f] sm:$0xff] }
 0x3c6   : > { %v3832_v10 = vpop.f32.mrf.mxu3 }
 0x3c7   : > { %v3884_v19 = vadd.f32 %v3832_v10, %v3611_v4 }
 0x3c8   : > { %5828 = vmatmul.msk.bf16.gmra.mxu2 %vm9275_vm3, %v4439_v63  ;;  %v9320_v63 = vld [vmem:[#allocation54_spill] sm:$0xff] }
 0x3c9   : > { %v4266_v1 = vpop.f32.mrf.mxu1  ;;  %v8032_v5 = vadd.f32 %v4086_v44, %v3884_v19  ;;  %vm9321_vm13 = vnez %v9320_v63 }
 0x3ca   : > { %v8027_v59 = vadd.f32 %v4266_v1, %v7816_v26  ;;  %v4412_v1 = vsel %vm9321_vm13, %v5918_v17, 0.0 }
 0x3cb   : > { %v4094_v49 = vpop.f32.mrf.mxu0  ;;  %5845 = vmatmul.msk.bf16.gmra.mxu3 %vm9317_vm12, %v4693_v41  ;;  %v3613_v39 = vpop.f32.mrf.mxu2  ;;  %vm9324_vm12 = vmmov %vm9318_vm5 }
 0x3cc   : > { %5818 = vmatmul.msk.bf16.gmra.mxu1 %vm9318_vm5, %v8030_v60  ;;  %v3614_v26 = vadd.f32 %v3613_v39, %v7855_v3  ;;  %v4172_v3 = vld [vmem:[#allocation3 + $0xc8] sm:$0xff]  ;;  %v5919_v39 = vld [vmem:[#allocation3 + $0x51] sm:$0xff] }
 0x3ce   : > { %5863 = vmatmul.msk.bf16.gmra.mxu0 %vm9319_vm10, %v7911_v46  ;;  %v3835_v4 = vpop.f32.mrf.mxu3  ;;  %vm9325_vm10 = vmmov %vm9318_vm5 }
 0x3cf   : > { %v3885_v45 = vadd.f32 %v3835_v4, %v3614_v26  ;;  %v4440_v26 = vpack.c.bf16 %v4412_v1, %v5919_v39 }
 0x3d1   : > { %v4268_v10 = vpop.f32.mrf.mxu1  ;;  %v8043_v44 = vadd.f32 %v4089_v15, %v3885_v45  ;;  %v4171_v15 = vld [vmem:[#allocation3 + $0xc0] sm:$0xff] }
 0x3d2   : > { %v8041_v28 = vadd.f32 %v4268_v10, %v7835_v9  ;;  %v9322_v9 = vld [vmem:[#allocation28_spill] sm:$0xff]  ;;  %v8054_v29 = vpack.c.bf16 %v4172_v3, %v4171_v15 }
 0x3d3   : > { %v4096_v48 = vpop.f32.mrf.mxu0  ;;  %v3615_v19 = vpop.f32.mrf.mxu2  ;;  %vm9323_vm3 = vnez %v9322_v9  ;;  %v4636_v9 = vld [vmem:[#allocation3 + $0x77] sm:$0xff] }
 0x3d4   : > { %v3616_v40 = vadd.f32 %v3615_v19, %v7870_v33  ;;  %v4665_v10 = vsel %vm9323_vm3, %v4633_v61, 0.0  ;;  %vm9326_vm3 = vmmov %vm9318_vm5 }
 0x3d5   : > { %v4694_v17 = vpack.c.bf16 %v4634_v53, %v4665_v10  ;;  %v4174_v10 = vld [vmem:[#allocation3 + $0xd8] sm:$0xff]  ;;  %vm9339_vm15 = vmmov %vm9326_vm3 }
 0x3d6   : > { %v3837_v46 = vpop.f32.mrf.mxu3 }
 0x3d7   : > { %v3886_v41 = vadd.f32 %v3837_v46, %v3616_v40 }
 0x3d8   : > { %5829 = vmatmul.msk.bf16.gmra.mxu2 %vm9324_vm12, %v4440_v26  ;;  %v4635_v26 = vld [vmem:[#allocation3 + $0x6f] sm:$0xff] }
 0x3d9   : > { %v4271_v4 = vpop.f32.mrf.mxu1  ;;  %v8056_v19 = vadd.f32 %v4091_v43, %v3886_v41 }
 0x3da   : > { %v8051_v45 = vadd.f32 %v4271_v4, %v7845_v52 }
 0x3db   : > { %v4099_v33 = vpop.f32.mrf.mxu0  ;;  %5846 = vmatmul.msk.bf16.gmra.mxu3 %vm9318_vm5, %v4694_v17  ;;  %v3618_v1 = vpop.f32.mrf.mxu2  ;;  %v9327_v17 = vld [vmem:[#allocation33_spill] sm:$0xff]  ;;  %vm9330_vm5 = vmmov %vm9326_vm3 }
 0x3dc   : > { %5819 = vmatmul.msk.bf16.gmra.mxu1 %vm9325_vm10, %v8054_v29  ;;  %v3619_v52 = vadd.f32 %v3618_v1, %v7882_v47  ;;  %vm9328_vm12 = vnez %v9327_v17  ;;  %v4173_v1 = vld [vmem:[#allocation3 + $0xd0] sm:$0xff]  ;;  %vm9331_vm10 = vmmov %vm9326_vm3 }
 0x3dd   : > { %v4667_v47 = vsel %vm9328_vm12, %v4635_v26, 0.0  ;;  %vm9332_vm12 = vmmov %vm9326_vm3 }
 0x3de   : > { %5864 = vmatmul.msk.bf16.gmra.mxu0 %vm9326_vm3, %v7936_v11  ;;  %v3840_v40 = vpop.f32.mrf.mxu3 }
 0x3df   : > { %v3887_v61 = vadd.f32 %v3840_v40, %v3619_v52  ;;  %v8077_v40 = vpack.c.bf16 %v4174_v10, %v4173_v1 }
 0x3e1   : > { %v4273_v46 = vpop.f32.mrf.mxu1  ;;  %v8067_v43 = vadd.f32 %v4094_v49, %v3887_v61  ;;  %v4695_v49 = vpack.c.bf16 %v4636_v9, %v4667_v47  ;;  %v4638_v47 = vld [vmem:[#allocation3 + $0x87] sm:$0xff] }
 0x3e2   : > { %v8065_v53 = vadd.f32 %v4273_v46, %v7863_v37  ;;  %v9329_v37 = vld [vmem:[#allocation77_spill] sm:$0xff] }
 0x3e3   : > { %v4101_v3 = vpop.f32.mrf.mxu0  ;;  %v3620_v41 = vpop.f32.mrf.mxu2 }
 0x3e4   : > { %v3621_v39 = vadd.f32 %v3620_v41, %v7897_v0 }
 0x3e6   : > { %v3842_v4 = vpop.f32.mrf.mxu3 }
 0x3e7   : > { %v3888_v15 = vadd.f32 %v3842_v4, %v3621_v39 }
 0x3e8   : > { %5830 = vmatmul.msk.bf16.gmra.mxu2 %vm9330_vm5, %v9329_v37 }
 0x3e9   : > { %v4276_v11 = vpop.f32.mrf.mxu1  ;;  %v8079_v61 = vadd.f32 %v4096_v48, %v3888_v15 }
 0x3ea   : > { %v8073_v52 = vadd.f32 %v4276_v11, %v7872_v18  ;;  %v4637_v11 = vld [vmem:[#allocation3 + $0x7f] sm:$0xff] }
 0x3eb   : > { %v4104_v0 = vpop.f32.mrf.mxu0  ;;  %5847 = vmatmul.msk.bf16.gmra.mxu3 %vm9331_vm10, %v4695_v49  ;;  %v3623_v46 = vpop.f32.mrf.mxu2  ;;  %vm9336_vm10 = vmmov %vm9326_vm3 }
 0x3ec   : > { %5820 = vmatmul.msk.bf16.gmra.mxu1 %vm9326_vm3, %v8077_v40  ;;  %v3624_v18 = vadd.f32 %v3623_v46, %v7907_v54  ;;  %v9335_v46 = vld [vmem:[#allocation79_spill] sm:$0xff] }
 0x3ee   : > { %5865 = vmatmul.msk.bf16.gmra.mxu0 %vm9332_vm12, %v7961_v30  ;;  %v3845_v41 = vpop.f32.mrf.mxu3  ;;  %v9333_v30 = vld [vmem:[#allocation39_spill] sm:$0xff]  ;;  %vm9338_vm12 = vmmov %vm9326_vm3 }
 0x3ef   : > { %v3889_v39 = vadd.f32 %v3845_v41, %v3624_v18  ;;  %vm9334_vm5 = vnez %v9333_v30  ;;  %v4640_v30 = vld [vmem:[#allocation3 + $0x97] sm:$0xff] }
 0x3f0   : > { %v4669_v54 = vsel %vm9334_vm5, %v4637_v11, 0.0  ;;  %vm9343_vm5 = vmmov %vm9326_vm3 }
 0x3f1   : > { %v4278_v26 = vpop.f32.mrf.mxu1  ;;  %v8090_v48 = vadd.f32 %v4099_v33, %v3889_v39 }
 0x3f2   : > { %v8088_v4 = vadd.f32 %v4278_v26, %v7890_v42  ;;  %v4696_v42 = vpack.c.bf16 %v4638_v47, %v4669_v54 }
 0x3f3   : > { %v4106_v9 = vpop.f32.mrf.mxu0  ;;  %v3625_v10 = vpop.f32.mrf.mxu2 }
 0x3f4   : > { %v3626_v15 = vadd.f32 %v3625_v10, %v7922_v20  ;;  %v9337_v20 = vld [vmem:[#allocation96_spill] sm:$0xff] }
 0x3f6   : > { %v3847_v17 = vpop.f32.mrf.mxu3 }
 0x3f7   : > { %v3890_v1 = vadd.f32 %v3847_v17, %v3626_v15 }
 0x3f8   : > { %5831 = vmatmul.msk.bf16.gmra.mxu2 %vm9336_vm10, %v9335_v46  ;;  %vm9344_vm10 = vmmov %vm9326_vm3 }
 0x3f9   : > { %v4281_v37 = vpop.f32.mrf.mxu1  ;;  %v8100_v33 = vadd.f32 %v4101_v3, %v3890_v1  ;;  %v4639_v1 = vld [vmem:[#allocation3 + $0x8f] sm:$0xff] }
 0x3fa   : > { %v8096_v49 = vadd.f32 %v4281_v37, %v7899_v35 }
 0x3fb   : > { %v4109_v18 = vpop.f32.mrf.mxu0  ;;  %5848 = vmatmul.msk.bf16.gmra.mxu3 %vm9326_vm3, %v4696_v42  ;;  %v3628_v41 = vpop.f32.mrf.mxu2 }
 0x3fc   : > { %5821 = vmatmul.msk.bf16.gmra.mxu1 %vm9338_vm12, %v9337_v20  ;;  %v3629_v39 = vadd.f32 %v3628_v41, %v7932_v55  ;;  %v9342_v20 = vld [vmem:[#allocation81_spill] sm:$0xff]  ;;  %vm9345_vm12 = vmmov %vm9326_vm3 }
 0x3fe   : > { %5866 = vmatmul.msk.bf16.gmra.mxu0 %vm9339_vm15, %v7983_v34  ;;  %v3850_v35 = vpop.f32.mrf.mxu3  ;;  %v9340_v34 = vld [vmem:[#allocation44_spill] sm:$0xff] }
 0x3ff   : > { %v3891_v26 = vadd.f32 %v3850_v35, %v3629_v39  ;;  %vm9341_vm15 = vnez %v9340_v34 }
 0x400   : > { %v4671_v55 = vsel %vm9341_vm15, %v4639_v1, 0.0  ;;  %v4641_v1 = vld [vmem:[#allocation3 + $0x9f] sm:$0xff] }
 0x401   : > { %v4283_v10 = vpop.f32.mrf.mxu1  ;;  %v8111_v3 = vadd.f32 %v4104_v0, %v3891_v26 }
 0x402   : > { %v8109_v15 = vadd.f32 %v4283_v10, %v7915_v62  ;;  %v4697_v62 = vpack.c.bf16 %v4640_v30, %v4671_v55  ;;  %v9348_v55 = vld [vmem:[#allocation86_spill] sm:$0xff] }
 0x403   : > { %v3630_v11 = vpop.f32.mrf.mxu2  ;;  %v4111_v17 = vpop.f32.mrf.mxu0 }
 0x404   : > { %v3631_v47 = vadd.f32 %v3630_v11, %v7947_v7 }
 0x406   : > { %v3852_v37 = vpop.f32.mrf.mxu3 }
 0x407   : > { %v3892_v54 = vadd.f32 %v3852_v37, %v3631_v47  ;;  %v4642_v37 = vld [vmem:[#allocation3 + $0xa7] sm:$0xff] }
 0x408   : > { %5832 = vmatmul.msk.bf16.gmra.mxu2 %vm9343_vm5, %v9342_v20  ;;  %vm9349_vm5 = vmmov %vm9326_vm3 }
 0x409   : > { %v4286_v46 = vpop.f32.mrf.mxu1  ;;  %v8121_v0 = vadd.f32 %v4106_v9, %v3892_v54 }
 0x40a   : > { %v8117_v42 = vadd.f32 %v4286_v46, %v7924_v24  ;;  %v9346_v46 = vld [vmem:[#allocation46_spill] sm:$0xff] }
 0x40b   : > { %5849 = vmatmul.msk.bf16.gmra.mxu3 %vm9344_vm10, %v4697_v62  ;;  %v3633_v7 = vpop.f32.mrf.mxu2  ;;  %v4114_v24 = vpop.f32.mrf.mxu0  ;;  %vm9347_vm15 = vnez %v9346_v46  ;;  %vm9350_vm10 = vmmov %vm9326_vm3 }
 0x40c   : > { %5822 = vmatmul.msk.bf16.gmra.mxu1 %vm9326_vm3, %v7705_v8  ;;  %v3634_v41 = vadd.f32 %v3633_v7, %v7957_v51  ;;  %v4673_v51 = vsel %vm9347_vm15, %v4641_v1, 0.0  ;;  %vm9353_vm15 = vmmov %vm9326_vm3 }
 0x40e   : > { %5867 = vmatmul.msk.bf16.gmra.mxu0 %vm9345_vm12, %v8006_v31  ;;  %v3855_v39 = vpop.f32.mrf.mxu3  ;;  %vm9351_vm12 = vmmov %vm9326_vm3 }
 0x40f   : > { %v3893_v35 = vadd.f32 %v3855_v39, %v3634_v41 }
 0x411   : > { %v4288_v26 = vpop.f32.mrf.mxu1  ;;  %v8132_v9 = vadd.f32 %v4109_v18, %v3893_v35 }
 0x412   : > { %v8130_v10 = vadd.f32 %v4288_v26, %v7940_v57  ;;  %v4698_v57 = vpack.c.bf16 %v4642_v37, %v4673_v51 }
 0x413   : > { %v3635_v11 = vpop.f32.mrf.mxu2  ;;  %v4116_v54 = vpop.f32.mrf.mxu0 }
 0x414   : > { %v3636_v47 = vadd.f32 %v3635_v11, %v7971_v25 }
 0x416   : > { %v3857_v8 = vpop.f32.mrf.mxu3 }
 0x417   : > { %v3894_v30 = vadd.f32 %v3857_v8, %v3636_v47  ;;  %v4181_v8 = vld [vmem:[#allocation3 + $0x110] sm:$0xff] }
 0x418   : > { %5833 = vmatmul.msk.bf16.gmra.mxu2 %vm9349_vm5, %v9348_v55  ;;  %vm9355_vm5 = vmmov %vm9326_vm3 }
 0x419   : > { %v4291_v31 = vpop.f32.mrf.mxu1  ;;  %v8142_v18 = vadd.f32 %v4111_v17, %v3894_v30 }
 0x41a   : > { %v8138_v34 = vadd.f32 %v4291_v31, %v7949_v38 }
 0x41b   : > { %5850 = vmatmul.msk.bf16.gmra.mxu3 %vm9350_vm10, %v4698_v57  ;;  %v3638_v25 = vpop.f32.mrf.mxu2  ;;  %v4991_v17 = vpop.f32.mrf.mxu0  ;;  %vm9356_vm10 = vmmov %vm9326_vm3 }
 0x41c   : > { %5823 = vmatmul.msk.bf16.gmra.mxu1 %vm9326_vm3, %v7759_v12  ;;  %v3639_v20 = vadd.f32 %v3638_v25, %v7978_v36  ;;  %v4182_v12 = vld [vmem:[#allocation3 + $0x118] sm:$0xff]  ;;  %v9352_v36 = vld [vmem:[#allocation89_spill] sm:$0xff] }
 0x41d   : > { %v8161_v37 = vpack.c.bf16 %v4182_v12, %v4181_v8 }
 0x41e   : > { %5868 = vmatmul.msk.bf16.gmra.mxu0 %vm9351_vm12, %v8030_v60  ;;  %v3860_v62 = vpop.f32.mrf.mxu3  ;;  %vm9358_vm12 = vmmov %vm9326_vm3 }
 0x41f   : > { %v3895_v38 = vadd.f32 %v3860_v62, %v3639_v20 }
 0x421   : > { %v4293_v7 = vpop.f32.mrf.mxu1  ;;  %v8153_v39 = vadd.f32 %v4114_v24, %v3895_v38  ;;  %v9354_v24 = vld [vmem:[#allocation82_spill] sm:$0xff] }
 0x422   : > { %v8151_v41 = vadd.f32 %v4293_v7, %v7963_v14 }
 0x423   : > { %v3640_v35 = vpop.f32.mrf.mxu2 }
 0x424   : > { %v3641_v26 = vadd.f32 %v3640_v35, %v7993_v50  ;;  %v4993_v50 = vpop.f32.mrf.mxu0 }
 0x426   : > { %v3862_v11 = vpop.f32.mrf.mxu3 }
 0x427   : > { %v3896_v47 = vadd.f32 %v3862_v11, %v3641_v26  ;;  %v9359_v26 = vld [vmem:[#allocation94_spill] sm:$0xff] }
 0x428   : > { %5834 = vmatmul.msk.bf16.gmra.mxu2 %vm9353_vm15, %v9352_v36  ;;  %vm9360_vm15 = vmmov %vm9326_vm3 }
 0x429   : > { %v4296_v1 = vpop.f32.mrf.mxu1  ;;  %v8163_v14 = vadd.f32 %v4116_v54, %v3896_v47 }
 0x42a   : > { %v8157_v60 = vadd.f32 %v4296_v1, %v7973_v2 }
 0x42b   : > { %5851 = vmatmul.msk.bf16.gmra.mxu3 %vm9355_vm5, %v9354_v24  ;;  %v4515_v30 = vpop.f32.mrf.mxu2  ;;  %vm9362_vm5 = vmmov %vm9326_vm3 }
 0x42c   : > { %5824 = vmatmul.msk.bf16.gmra.mxu1 %vm9356_vm10, %v8161_v37  ;;  %v4595_v2 = vadd.f32 %v4515_v30, %v8003_v58  ;;  %v4996_v20 = vpop.f32.mrf.mxu0  ;;  %vm9363_vm10 = vmmov %vm9326_vm3 }
 0x42e   : > { %5869 = vmatmul.msk.bf16.gmra.mxu0 %vm9326_vm3, %v8054_v29  ;;  %v4769_v31 = vpop.f32.mrf.mxu3  ;;  %v9357_v29 = vld [vmem:[#allocation92_spill] sm:$0xff] }
 0x42f   : > { %v4849_v46 = vadd.f32 %v4769_v31, %v4595_v2  ;;  %v4904_v2 = vld [vmem:[#allocation3 + $0xe8] sm:$0xff] }
 0x431   : > { %v4298_v51 = vpop.f32.mrf.mxu1  ;;  %v8175_v54 = vadd.f32 %v4991_v17, %v4849_v46  ;;  %v4903_v46 = vld [vmem:[#allocation3 + $0xe0] sm:$0xff] }
 0x432   : > { %v8173_v55 = vadd.f32 %v4298_v51, %v7985_v13  ;;  %v9361_v13 = vld [vmem:[#allocation15_spill] sm:$0xff] }
 0x433   : > { %v4517_v57 = vpop.f32.mrf.mxu2 }
 0x434   : > { %v4596_v25 = vadd.f32 %v4517_v57, %v8017_v23  ;;  %v4998_v12 = vpop.f32.mrf.mxu0  ;;  %v4924_v57 = vpack.c.bf16 %v4904_v2, %v4903_v46  ;;  %v4905_v2 = vld [vmem:[#allocation3 + $0xf0] sm:$0xff] }
 0x436   : > { %v4771_v62 = vpop.f32.mrf.mxu3 }
 0x437   : > { %v4850_v38 = vadd.f32 %v4771_v62, %v4596_v25  ;;  %v9365_v25 = vld [vmem:[#allocation97_spill] sm:$0xff] }
 0x438   : > { %5835 = vmatmul.msk.bf16.gmra.mxu2 %vm9358_vm12, %v9357_v29  ;;  %vm9366_vm12 = vmmov %vm9326_vm3 }
 0x439   : > { %v4301_v7 = vpop.f32.mrf.mxu1  ;;  %v8183_v58 = vadd.f32 %v4993_v50, %v4850_v38 }
 0x43a   : > { %v8179_v35 = vadd.f32 %v4301_v7, %v7995_v27 }
 0x43b   : > { %5852 = vmatmul.msk.bf16.gmra.mxu3 %vm9360_vm15, %v9359_v26  ;;  %v4520_v17 = vpop.f32.mrf.mxu2  ;;  %vm9368_vm15 = vmmov %vm9326_vm3 }
 0x43c   : > { %5877 = vmatmul.msk.bf16.vlgmr.msra.gmra.mxu1 %vm9362_vm5, %v9361_v13  ;;  %v4597_v23 = vadd.f32 %v4520_v17, %v8027_v59  ;;  %v9364_v59 = vld [vmem:[#allocation93_spill] sm:$0xff]  ;;  %vm9369_vm5 = vmmov %vm9326_vm3 }
 0x43e   : > { %5870 = vmatmul.msk.bf16.gmra.mxu0 %vm9363_vm10, %v8077_v40  ;;  %v4774_v11 = vpop.f32.mrf.mxu3  ;;  %vm9371_vm10 = vmmov %vm9326_vm3 }
 0x43f   : > { %v4851_v27 = vadd.f32 %v4774_v11, %v4597_v23  ;;  %v4649_v11 = vld [vmem:[#allocation3 + $0xdf] sm:$0xff] }
 0x441   : > { %v4303_v47 = vpop.f32.mrf.mxu1  ;;  %v8195_v8 = vadd.f32 %v4996_v20, %v4851_v27  ;;  %v9367_v20 = vld [vmem:[#allocation74_spill] sm:$0xff] }
 0x442   : > { %v8193_v1 = vadd.f32 %v4303_v47, %v8008_v21  ;;  %v5001_v21 = vpop.f32.mrf.mxu0 }
 0x443   : > { %v4522_v36 = vpop.f32.mrf.mxu2 }
 0x444   : > { %v4598_v24 = vadd.f32 %v4522_v36, %v8041_v28  ;;  %v4906_v36 = vld [vmem:[#allocation3 + $0xf8] sm:$0xff] }
 0x446   : > { %v4776_v50 = vpop.f32.mrf.mxu3 }
 0x447   : > { %v4852_v30 = vadd.f32 %v4776_v50, %v4598_v24 }
 0x448   : > { %5836 = vmatmul.msk.bf16.gmra.mxu2 %vm9326_vm3, %v9364_v59  ;;  %v9372_v59 = vld [vmem:[#allocation22_spill] sm:$0xff] }
 0x449   : > { %v4306_v31 = vpop.f32.mrf.mxu1  ;;  %v8203_v51 = vadd.f32 %v4998_v12, %v4852_v30  ;;  %v4650_v12 = vld [vmem:[#allocation3 + $0xe7] sm:$0xff] }
 0x44a   : > { %v8199_v40 = vadd.f32 %v4306_v31, %v8019_v6  ;;  %v5003_v13 = vpop.f32.mrf.mxu0 }
 0x44b   : > { %5853 = vmatmul.msk.bf16.gmra.mxu3 %vm9366_vm12, %v9365_v25  ;;  %v4525_v28 = vpop.f32.mrf.mxu2  ;;  %vm9373_vm12 = vmmov %vm9326_vm3 }
 0x44c   : > { %5878 = vmatmul.msk.bf16.gmra.mxu1 %vm9368_vm15, %v9367_v20  ;;  %v4599_v6 = vadd.f32 %v4525_v28, %v8051_v45  ;;  %v4681_v45 = vsel %vm9267_vm8, %v4649_v11, 0.0  ;;  %vm9374_vm15 = vmmov %vm9326_vm3  ;;  %v4908_v11 = vld [vmem:[#allocation3 + $0x108] sm:$0xff] }
 0x44d   : > { %v4702_v30 = vpack.c.bf16 %v4650_v12, %v4681_v45  ;;  %vm9376_vm8 = vmmov %vm9326_vm3 }
 0x44e   : > { %5871 = vmatmul.msk.bf16.gmra.mxu0 %vm9369_vm5, %v4924_v57  ;;  %v4779_v62 = vpop.f32.mrf.mxu3  ;;  %vm9378_vm5 = vmmov %vm9326_vm3 }
 0x44f   : > { %v4853_v38 = vadd.f32 %v4779_v62, %v4599_v6  ;;  %v5110_v6 = vld [vmem:[#allocation3 + $0x69] sm:$0xff] }
 0x451   : > { %v4308_v7 = vpop.f32.mrf.mxu1  ;;  %v8214_v26 = vadd.f32 %v5001_v21, %v4853_v38 }
 0x452   : > { %v8212_v29 = vadd.f32 %v4308_v7, %v8032_v5  ;;  %v9370_v5 = vld [vmem:[#allocation53_spill] sm:$0xff] }
 0x453   : > { %v4527_v17 = vpop.f32.mrf.mxu2  ;;  %v4651_v7 = vld [vmem:[#allocation3 + $0xef] sm:$0xff] }
 0x454   : > { %v4600_v23 = vadd.f32 %v4527_v17, %v8065_v53  ;;  %v4925_v53 = vpack.c.bf16 %v4906_v36, %v4905_v2  ;;  %v4652_v17 = vld [vmem:[#allocation3 + $0xf7] sm:$0xff] }
 0x456   : > { %v4781_v27 = vpop.f32.mrf.mxu3 }
 0x457   : > { %v4854_v47 = vadd.f32 %v4781_v27, %v4600_v23  ;;  %v5142_v23 = vsel %vm9321_vm13, %v5110_v6, 0.0  ;;  %vm9377_vm13 = vmmov %vm9326_vm3  ;;  %v9382_v6 = vld [vmem:[#allocation56_spill] sm:$0xff] }
 0x458   : > { %5837 = vmatmul.msk.bf16.gmra.mxu2 %vm9371_vm10, %v9370_v5  ;;  %v4907_v5 = vld [vmem:[#allocation3 + $0x100] sm:$0xff]  ;;  %vm9379_vm10 = vmmov %vm9326_vm3 }
 0x459   : > { %v4311_v24 = vpop.f32.mrf.mxu1  ;;  %v8224_v31 = vadd.f32 %v5003_v13, %v4854_v47  ;;  %v5109_v47 = vld [vmem:[#allocation3 + $0x61] sm:$0xff]  ;;  %v4926_v63 = vpack.c.bf16 %v4908_v11, %v4907_v5 }
 0x45a   : > { %v8220_v50 = vadd.f32 %v4311_v24, %v8043_v44  ;;  %v5006_v44 = vpop.f32.mrf.mxu0  ;;  %v9375_v24 = vld [vmem:[#allocation55_spill] sm:$0xff]  ;;  %v5170_v45 = vpack.c.bf16 %v5142_v23, %v5109_v47 }
 0x45b   : > { %5854 = vmatmul.msk.bf16.gmra.mxu3 %vm9326_vm3, %v4702_v30  ;;  %v4530_v46 = vpop.f32.mrf.mxu2  ;;  %v4656_v23 = vld [vmem:[#allocation3 + $0x117] sm:$0xff]  ;;  %v4657_v5 = vld [vmem:[#allocation3 + $0x11f] sm:$0xff] }
 0x45c   : > { %5879 = vmatmul.msk.bf16.gmra.mxu1 %vm9373_vm12, %v9372_v59  ;;  %v4601_v16 = vadd.f32 %v4530_v46, %v8073_v52  ;;  %v4654_v59 = vld [vmem:[#allocation3 + $0x107] sm:$0xff]  ;;  %vm9383_vm12 = vmmov %vm9326_vm3 }
 0x45d   : > { %v9380_v46 = vld [vmem:[#allocation57_spill] sm:$0xff] }
 0x45e   : > { %5872 = vmatmul.msk.bf16.gmra.mxu0 %vm9374_vm15, %v4925_v53  ;;  %v4784_v21 = vpop.f32.mrf.mxu3  ;;  %v4653_v53 = vld [vmem:[#allocation3 + $0xff] sm:$0xff]  ;;  %vm9384_vm15 = vmmov %vm9326_vm3 }
 0x45f   : > { %v4855_v57 = vadd.f32 %v4784_v21, %v4601_v16  ;;  %v4685_v21 = vsel %vm9281_vm1, %v4653_v53, 0.0  ;;  %v4658_v53 = vld [vmem:[#allocation3 + $0x127] sm:$0xff] }
 0x461   : > { %v4313_v25 = vpop.f32.mrf.mxu1  ;;  %v8234_v28 = vadd.f32 %v5006_v44, %v4855_v57  ;;  %v5111_v57 = vld [vmem:[#allocation3 + $0x71] sm:$0xff] }
 0x462   : > { %v8232_v20 = vadd.f32 %v4313_v25, %v8056_v19  ;;  %v5008_v27 = vpop.f32.mrf.mxu0  ;;  %v4683_v19 = vsel %vm9273_vm7, %v4651_v7, 0.0  ;;  %vm9381_vm7 = vnez %v9380_v46  ;;  %v5114_v7 = vld [vmem:[#allocation3 + $0x89] sm:$0xff]  ;;  %v4689_v46 = vsel %vm9292_vm11, %v4657_v5, 0.0  ;;  %v8320_v5 = vld [vmem:[%s8610_s6] ss:$0 sm:$0xff] }
 0x463   : > { %v4532_v62 = vpop.f32.mrf.mxu2 }
 0x464   : > { %v4602_v38 = vadd.f32 %v4532_v62, %v8088_v4  ;;  %v4703_v4 = vpack.c.bf16 %v4652_v17, %v4683_v19  ;;  %v4704_v62 = vpack.c.bf16 %v4654_v59, %v4685_v21  ;;  %v4912_v17 = vld [vmem:[#allocation3 + $0x128] sm:$0xff]  ;;  %v5921_v21 = vld [vmem:[#allocation3 + $0x111] sm:$0xff] }
 0x465   : > { %v5113_v19 = vld [vmem:[#allocation3 + $0x81] sm:$0xff] }
 0x466   : > { %v4786_v13 = vpop.f32.mrf.mxu3 }
 0x467   : > { %v4856_v52 = vadd.f32 %v4786_v13, %v4602_v38  ;;  %v4655_v13 = vld [vmem:[#allocation3 + $0x10f] sm:$0xff] }
 0x468   : > { %5838 = vmatmul.msk.bf16.gmra.mxu2 %vm9376_vm8, %v9375_v24  ;;  %vm9385_vm8 = vmmov %vm9326_vm3  ;;  %v9388_v24 = vld [vmem:[#allocation52_spill] sm:$0xff] }
 0x469   : > { %v4316_v12 = vpop.f32.mrf.mxu1  ;;  %v8246_v30 = vadd.f32 %v5008_v27, %v4856_v52  ;;  %v9386_v52 = vld [vmem:[#allocation60_spill] sm:$0xff] }
 0x46a   : > { %v8242_v36 = vadd.f32 %v4316_v12, %v8067_v43  ;;  %v5112_v43 = vld [vmem:[#allocation3 + $0x79] sm:$0xff]  ;;  %vm9387_vm1 = vnez %v9386_v52  ;;  %v4687_v12 = vsel %vm9140_vm2, %v4655_v13, 0.0 }
 0x46b   : > { %5855 = vmatmul.msk.bf16.gmra.mxu3 %vm9377_vm13, %v4703_v4  ;;  %v5144_v16 = vsel %vm9381_vm7, %v5112_v43, 0.0  ;;  %v5146_v11 = vsel %vm9387_vm1, %v5114_v7, 0.0  ;;  %vm9389_vm13 = vmmov %vm9326_vm3 }
 0x46c   : > { %5880 = vmatmul.msk.bf16.gmra.mxu1 %vm9378_vm5, %v5170_v45  ;;  %v5172_v4 = vpack.c.bf16 %v5146_v11, %v5113_v19  ;;  %vm9390_vm5 = vmmov %vm9326_vm3  ;;  %v5117_v11 = vld [vmem:[#allocation3 + $0xa1] sm:$0xff] }
 0x46d   : > { %vm9392_vm7 = vmmov %vm9326_vm3 }
 0x46e   : > { %5873 = vmatmul.msk.bf16.gmra.mxu0 %vm9379_vm10, %v4926_v63  ;;  %vm9391_vm10 = vmmov %vm9326_vm3  ;;  %v5116_v63 = vld [vmem:[#allocation3 + $0x99] sm:$0xff] }
 0x46f   : > { %vm9403_vm1 = vmmov %vm9326_vm3 }
 0x471   : > { %v4318_v32 = vpop.f32.mrf.mxu1 }
 0x472   : > { %v8252_v2 = vadd.f32 %v4318_v32, %v8079_v61  ;;  %v5171_v61 = vpack.c.bf16 %v5144_v16, %v5111_v57  ;;  %v5920_v32 = vld [vmem:[#allocation3 + $0x119] sm:$0xff] }
 0x473   : > { %v4436_v43 = vsel %vm9296_vm4, %v5920_v32, 0.0  ;;  %v9395_v16 = vld [vmem:[#allocation63_spill] sm:$0xff] }
 0x474   : > { %vm9396_vm2 = vnez %v9395_v16  ;;  %v4452_v57 = vpack.c.bf16 %v4436_v43, %v5921_v21  ;;  %v8325_v43 = vpop.f32.mrf.mxu2 }
 0x478   : > { %5839 = vmatmul.msk.bf16.gmra.mxu2 %vm9326_vm3, %v9382_v6 }
 0x479   : > { %v4321_v44 = vpop.f32.mrf.mxu1 }
 0x47a   : > { %v8259_v25 = vadd.f32 %v4321_v44, %v8090_v48  ;;  %v4911_v48 = vld [vmem:[#allocation3 + $0x120] sm:$0xff]  ;;  %v5148_v44 = vsel %vm9396_vm2, %v5116_v63, 0.0  ;;  %vm9420_vm2 = vmmov %vm9403_vm1 }
 0x47b   : > { %5856 = vmatmul.msk.bf16.gmra.mxu3 %vm9383_vm12, %v4704_v62  ;;  %v4928_v47 = vpack.c.bf16 %v4912_v17, %v4911_v48  ;;  %v5115_v62 = vld [vmem:[#allocation3 + $0x91] sm:$0xff]  ;;  %vm9397_vm12 = vmmov %vm9326_vm3  ;;  %v5118_v48 = vld [vmem:[#allocation3 + $0xa9] sm:$0xff] }
 0x47c   : > { %5881 = vmatmul.msk.bf16.gmra.mxu1 %vm9384_vm15, %v5171_v61  ;;  %v4706_v61 = vpack.c.bf16 %v4658_v53, %v4689_v46  ;;  %vm9398_vm15 = vmmov %vm9326_vm3  ;;  %v9399_v17 = vld [vmem:[#allocation68_spill] sm:$0xff] }
 0x47d   : > { %vm9400_vm11 = vnez %v9399_v17  ;;  %v9404_v53 = vld [vmem:[#allocation8_spill] sm:$0xff]  ;;  %v8347_v17 = vpop.f32.mrf.mxu2 }
 0x47e   : > { %5874 = vmatmul.msk.bf16.gmra.mxu0 %vm9385_vm8, %v8161_v37  ;;  %vm9401_vm8 = vmmov %vm9326_vm3 }
 0x481   : > { %v4323_v38 = vpop.f32.mrf.mxu1 }
 0x482   : > { %v8268_v22 = vadd.f32 %v4323_v38, %v8100_v33  ;;  %v4705_v33 = vpack.c.bf16 %v4656_v23, %v4687_v12  ;;  %v5173_v38 = vpack.c.bf16 %v5148_v44, %v5115_v62  ;;  %v5150_v23 = vsel %vm9400_vm11, %v5118_v48, 0.0  ;;  %v8336_v44 = vpop.f32.mrf.mxu3  ;;  %v5123_v62 = vld [vmem:[#allocation3 + $0xd1] sm:$0xff] }
 0x488   : > { %5840 = vmatmul.msk.bf16.gmra.mxu2 %vm9389_vm13, %v9388_v24  ;;  %vm9408_vm13 = vmmov %vm9403_vm1 }
 0x489   : > { %v4326_v27 = vpop.f32.mrf.mxu1 }
 0x48a   : > { %v8275_v37 = vadd.f32 %v4326_v27, %v8111_v3  ;;  %v5174_v27 = vpack.c.bf16 %v5150_v23, %v5117_v11 }
 0x48b   : > { %5857 = vmatmul.msk.bf16.gmra.mxu3 %vm9390_vm5, %v4705_v33  ;;  %v8314_v33 = vld [vmem:[%s8609_s5] ss:$0 sm:$0xff]  ;;  %vm9409_vm5 = vmmov %vm9403_vm1 }
 0x48c   : > { %5882 = vmatmul.msk.bf16.gmra.mxu1 %vm9391_vm10, %v5172_v4  ;;  %vm9414_vm10 = vmmov %vm9403_vm1 }
 0x48e   : > { %5875 = vmatmul.msk.bf16.gmra.mxu0 %vm9392_vm7, %v4928_v47  ;;  %v5120_v47 = vld [vmem:[#allocation3 + $0xb9] sm:$0xff]  ;;  %vm9415_vm7 = vmmov %vm9403_vm1 }
 0x48f   : > { %v5152_v24 = vsel %vm6697_vm14, %v5120_v47, 0.0  ;;  %vm9405_vm14 = vmmov %vm9403_vm1  ;;  %v8354_v47 = vpop.f32.mrf.mxu3 }
 0x491   : > { %v4328_v45 = vpop.f32.mrf.mxu1 }
 0x492   : > { %v8283_v56 = vadd.f32 %v4328_v45, %v8121_v0 }
 0x498   : > { %5841 = vmatmul.msk.bf16.gmra.mxu2 %vm9326_vm3, %v4452_v57  ;;  %v5122_v57 = vld [vmem:[#allocation3 + $0xc9] sm:$0xff]  ;;  %vm9421_vm3 = vmmov %vm9403_vm1 }
 0x499   : > { %v4331_v6 = vpop.f32.mrf.mxu1 }
 0x49a   : > { %v8292_v0 = vadd.f32 %v4331_v6, %v8132_v9 }
 0x49b   : > { %5858 = vmatmul.msk.bf16.gmra.mxu3 %vm9397_vm12, %v4706_v61  ;;  %v5154_v61 = vsel %vm9200_vm9, %v5122_v57, 0.0  ;;  %vm9411_vm9 = vmmov %vm9403_vm1 }
 0x49c   : > { %5883 = vmatmul.msk.bf16.gmra.mxu1 %vm9398_vm15, %v5173_v38  ;;  %v8344_v38 = vpop.f32.mrf.mxu0 }
 0x4a1   : > { %v4333_v7 = vpop.f32.mrf.mxu1 }
 0x4a2   : > { %v8298_v13 = vadd.f32 %v4333_v7, %v8142_v18  ;;  %v9407_v7 = vld [vmem:[#allocation9_spill] sm:$0xff] }
 0x4a9   : > { %v4336_v52 = vpop.f32.mrf.mxu1 }
 0x4aa   : > { %v8303_v9 = vadd.f32 %v4336_v52, %v8153_v39  ;;  %v5119_v39 = vld [vmem:[#allocation3 + $0xb1] sm:$0xff] }
 0x4ac   : > { %5884 = vmatmul.msk.bf16.gmra.mxu1 %vm9401_vm8, %v5174_v27 }
 0x4b1   : > { %v4338_v12 = vpop.f32.mrf.mxu1 }
 0x4b2   : > { %v8307_v19 = vadd.f32 %v4338_v12, %v8163_v14  ;;  %v5175_v14 = vpack.c.bf16 %v5152_v24, %v5119_v39  ;;  %v9410_v24 = vld [vmem:[#allocation12_spill] sm:$0xff] }
 0x4b9   : > { %v5245_v4 = vpop.f32.mrf.mxu1 }
 0x4ba   : > { %v5325_v45 = vadd.f32 %v5245_v4, %v8175_v54 }
 0x4bc   : > { %v5361_v63 = vmul.f32 %v8314_v33, %v5325_v45  ;;  %5885 = vmatmul.msk.bf16.gmra.mxu1 %vm9403_vm1, %v5175_v14  ;;  %v8358_v45 = vpop.f32.mrf.mxu0 }
 0x4be   : > { %v5397_v32 = vadd.f32 %v8320_v5, %v5361_v63  ;;  %v8361_v63 = vpop.f32.mrf.mxu2 }
 0x4c0   : > { %v5429_v59 = vadd.f32 %v5397_v32, %v9404_v53  ;;  %v5124_v53 = vld [vmem:[#allocation3 + $0xd9] sm:$0xff] }
 0x4c1   : > { %v5247_v54 = vpop.f32.mrf.mxu1 }
 0x4c2   : > { %v5461_v46 = vmax.f32 %v5429_v59, 0.0  ;;  %v5326_v16 = vadd.f32 %v5247_v54, %v8183_v58  ;;  %v5121_v58 = vld [vmem:[#allocation3 + $0xc1] sm:$0xff]  ;;  %v8367_v54 = vpop.f32.mrf.mxu3 }
 0x4c3   : > { %v5176_v27 = vpack.c.bf16 %v5154_v61, %v5121_v58 }
 0x4c4   : > { %5493 = vst.msk [vmem:[%s8333_s18] sm:$0xff] %vm9405_vm14, %v5461_v46  ;;  %v5362_v21 = vmul.f32 %v8314_v33, %v5326_v16  ;;  %v5156_v16 = vsel %vm9215_vm6, %v5124_v53, 0.0  ;;  %vm9417_vm6 = vmmov %vm9403_vm1  ;;  %v9419_v46 = vld [vmem:[#allocation19_spill] sm:$0xff] }
 0x4c6   : > { %v5398_v6 = vadd.f32 %v8320_v5, %v5362_v21  ;;  %v9413_v21 = vld [vmem:[#allocation13_spill] sm:$0xff]  ;;  %v8379_v58 = vpop.f32.mrf.mxu2 }
 0x4c8   : > { %v5430_v48 = vadd.f32 %v5398_v6, %v9407_v7  ;;  %v5177_v7 = vpack.c.bf16 %v5156_v16, %v5123_v62 }
 0x4c9   : > { %v5250_v23 = vpop.f32.mrf.mxu1 }
 0x4ca   : > { %v5462_v52 = vmax.f32 %v5430_v48, 0.0  ;;  %v5327_v11 = vadd.f32 %v5250_v23, %v8195_v8  ;;  %v8373_v48 = vpop.f32.mrf.mxu0 }
 0x4cc   : > { %5494 = vst.msk [vmem:[%s8333_s18 + $0x8] sm:$0xff] %vm9408_vm13, %v5462_v52  ;;  %v5363_v12 = vmul.f32 %v8314_v33, %v5327_v11  ;;  %5886 = vmatmul.msk.bf16.gmra.mxu1 %vm9409_vm5, %v5176_v27  ;;  %v9416_v11 = vld [vmem:[#allocation18_spill] sm:$0xff] }
 0x4ce   : > { %v5399_v18 = vadd.f32 %v8320_v5, %v5363_v12  ;;  %v8383_v12 = vpop.f32.mrf.mxu3 }
 0x4d0   : > { %v5431_v4 = vadd.f32 %v5399_v18, %v9410_v24 }
 0x4d1   : > { %v5252_v39 = vpop.f32.mrf.mxu1 }
 0x4d2   : > { %v5463_v14 = vmax.f32 %v5431_v4, 0.0  ;;  %v5328_v8 = vadd.f32 %v5252_v39, %v8203_v51  ;;  %v5126_v39 = vld [vmem:[#allocation3 + $0xe9] sm:$0xff] }
 0x4d4   : > { %5495 = vst.msk [vmem:[%s8333_s18 + $0x10] sm:$0xff] %vm9411_vm9, %v5463_v14  ;;  %v5364_v32 = vmul.f32 %v8314_v33, %v5328_v8  ;;  %v8389_v14 = vpop.f32.mrf.mxu0 }
 0x4d6   : > { %v5400_v59 = vadd.f32 %v8320_v5, %v5364_v32  ;;  %v8392_v32 = vpop.f32.mrf.mxu2 }
 0x4d8   : > { %v5432_v57 = vadd.f32 %v5400_v59, %v9413_v21  ;;  %v5158_v59 = vsel %vm9229_vm0, %v5126_v39, 0.0  ;;  %vm9423_vm0 = vmmov %vm9403_vm1 }
 0x4d9   : > { %v5255_v6 = vpop.f32.mrf.mxu1  ;;  %vm9427_vm15 = vmmov %vm9423_vm0 }
 0x4da   : > { %v5464_v51 = vmax.f32 %v5432_v57, 0.0  ;;  %v5329_v61 = vadd.f32 %v5255_v6, %v8214_v26  ;;  %v5125_v57 = vld [vmem:[#allocation3 + $0xe1] sm:$0xff]  ;;  %vm9428_vm11 = vmmov %vm9423_vm0 }
 0x4db   : > { %v5178_v62 = vpack.c.bf16 %v5158_v59, %v5125_v57  ;;  %v5127_v57 = vld [vmem:[#allocation3 + $0xf1] sm:$0xff]  ;;  %vm9430_vm8 = vmmov %vm9423_vm0 }
 0x4dc   : > { %5496 = vst.msk [vmem:[%s8333_s18 + $0x18] sm:$0xff] %vm9414_vm10, %v5464_v51  ;;  %v5365_v23 = vmul.f32 %v8314_v33, %v5329_v61  ;;  %5887 = vmatmul.msk.bf16.gmra.mxu1 %vm9415_vm7, %v5177_v7  ;;  %v8398_v51 = vpop.f32.mrf.mxu3  ;;  %vm9434_vm14 = vmmov %vm9423_vm0 }
 0x4dd   : > { %vm9435_vm13 = vmmov %vm9423_vm0 }
 0x4de   : > { %v5401_v52 = vadd.f32 %v8320_v5, %v5365_v23  ;;  %v4603_v23 = vadd.f32 %v8325_v43, %v8096_v49  ;;  %v9424_v43 = vld [vmem:[#allocation80_spill] sm:$0xff]  ;;  %vm9437_vm5 = vmmov %vm9423_vm0 }
 0x4df   : > { %vm9425_vm12 = vnez %v9424_v43  ;;  %v5130_v43 = vld [vmem:[#allocation3 + $0x109] sm:$0xff]  ;;  %vm9439_vm9 = vmmov %vm9423_vm0 }
 0x4e0   : > { %v5433_v27 = vadd.f32 %v5401_v52, %v9416_v11  ;;  %v8407_v52 = vpop.f32.mrf.mxu0  ;;  %v9422_v11 = vld [vmem:[#allocation24_spill] sm:$0xff]  ;;  %vm9441_vm10 = vmmov %vm9423_vm0 }
 0x4e1   : > { %v5257_v18 = vpop.f32.mrf.mxu1  ;;  %vm9443_vm7 = vmmov %vm9423_vm0 }
 0x4e2   : > { %v5465_v24 = vmax.f32 %v5433_v27, 0.0  ;;  %v5330_v26 = vadd.f32 %v5257_v18, %v8224_v31  ;;  %v8410_v18 = vpop.f32.mrf.mxu2 }
 0x4e4   : > { %5497 = vst.msk [vmem:[%s8333_s18 + $0x20] sm:$0xff] %vm9417_vm6, %v5465_v24  ;;  %v5366_v4 = vmul.f32 %v8314_v33, %v5330_v26  ;;  %v8417_v53 = vpop.f32.mrf.mxu3  ;;  %vm9445_vm6 = vmmov %vm9423_vm0 }
 0x4e6   : > { %v5402_v8 = vadd.f32 %v8320_v5, %v5366_v4  ;;  %v4857_v4 = vadd.f32 %v8336_v44, %v4603_v23 }
 0x4e8   : > { %v5434_v16 = vadd.f32 %v5402_v8, %v9419_v46  ;;  %v5128_v8 = vld [vmem:[#allocation3 + $0xf9] sm:$0xff]  ;;  %v4604_v46 = vadd.f32 %v8347_v17, %v8109_v15  ;;  %v5079_v44 = vadd.f32 %v8344_v38, %v4857_v4  ;;  %v4605_v17 = vadd.f32 %v8361_v63, %v8117_v42 }
 0x4e9   : > { %v5260_v21 = vpop.f32.mrf.mxu1  ;;  %v5160_v59 = vsel %vm9425_vm12, %v5128_v8, 0.0  ;;  %v9431_v63 = vld [vmem:[#allocation83_spill] sm:$0xff]  ;;  %vm9453_vm12 = vmmov %vm9423_vm0 }
 0x4ea   : > { %v5466_v6 = vmax.f32 %v5434_v16, 0.0  ;;  %v5331_v31 = vadd.f32 %v5260_v21, %v8234_v28  ;;  %v9426_v16 = vld [vmem:[#allocation25_spill] sm:$0xff]  ;;  %v4858_v23 = vadd.f32 %v8354_v47, %v4604_v46  ;;  %vm9432_vm1 = vnez %v9431_v63 }
 0x4eb   : > { %v5162_v46 = vsel %vm9432_vm1, %v5130_v43, 0.0  ;;  %v9438_v43 = vld [vmem:[#allocation35_spill] sm:$0xff]  ;;  %vm9461_vm1 = vmmov %vm9423_vm0 }
 0x4ec   : > { %5498 = vst.msk [vmem:[%s8333_s18 + $0x28] sm:$0xff] %vm9420_vm2, %v5466_v6  ;;  %v5367_v61 = vmul.f32 %v8314_v33, %v5331_v31  ;;  %5888 = vmatmul.msk.bf16.gmra.mxu1 %vm9421_vm3, %v5178_v62  ;;  %v8426_v6 = vpop.f32.mrf.mxu0  ;;  %v8434_v38 = vpop.f32.mrf.mxu3  ;;  %vm9448_vm2 = vmmov %vm9423_vm0 }
 0x4ed   : > { %vm9450_vm3 = vmmov %vm9423_vm0 }
 0x4ee   : > { %v5403_v7 = vadd.f32 %v8320_v5, %v5367_v61  ;;  %v5179_v61 = vpack.c.bf16 %v5160_v59, %v5127_v57  ;;  %v5129_v57 = vld [vmem:[#allocation3 + $0x101] sm:$0xff] }
 0x4f0   : > { %v5435_v27 = vadd.f32 %v5403_v7, %v9422_v11  ;;  %v4550_v7 = vpop.f32.mrf.mxu2 }
 0x4f1   : > { %v5262_v28 = vpop.f32.mrf.mxu1 }
 0x4f2   : > { %v5467_v24 = vmax.f32 %v5435_v27, 0.0  ;;  %v5332_v26 = vadd.f32 %v5262_v28, %v8246_v30  ;;  %v9429_v27 = vld [vmem:[#allocation29_spill] sm:$0xff] }
 0x4f4   : > { %5499 = vst.msk [vmem:[%s8333_s18 + $0x30] sm:$0xff] %vm9423_vm0, %v5467_v24  ;;  %v5368_v39 = vmul.f32 %v8314_v33, %v5332_v26  ;;  %v5080_v24 = vadd.f32 %v8358_v45, %v4858_v23  ;;  %v8441_v8 = vpop.f32.mrf.mxu0  ;;  %v4606_v45 = vadd.f32 %v8379_v58, %v8130_v10 }
 0x4f6   : > { %v5404_v49 = vadd.f32 %v8320_v5, %v5368_v39  ;;  %v4859_v39 = vadd.f32 %v8367_v54, %v4605_v17  ;;  %v4860_v23 = vadd.f32 %v8383_v12, %v4606_v45  ;;  %v9436_v17 = vld [vmem:[#allocation34_spill] sm:$0xff] }
 0x4f8   : > { %v5436_v30 = vadd.f32 %v5404_v49, %v9426_v16  ;;  %v4552_v59 = vpop.f32.mrf.mxu2  ;;  %v9433_v16 = vld [vmem:[#allocation30_spill] sm:$0xff]  ;;  %v5081_v54 = vadd.f32 %v8373_v48, %v4859_v39  ;;  %v4607_v48 = vadd.f32 %v8392_v32, %v8138_v34  ;;  %v4608_v34 = vadd.f32 %v8410_v18, %v8151_v41 }
 0x4f9   : > { %v5265_v21 = vpop.f32.mrf.mxu1 }
 0x4fa   : > { %v5468_v31 = vmax.f32 %v5436_v30, 0.0  ;;  %v5333_v62 = vadd.f32 %v5265_v21, %v5079_v44  ;;  %v4806_v44 = vpop.f32.mrf.mxu3 }
 0x4fc   : > { %5500 = vst.msk [vmem:[%s8333_s18 + $0x38] sm:$0xff] %vm9427_vm15, %v5468_v31  ;;  %v5369_v11 = vmul.f32 %v8314_v33, %v5333_v62  ;;  %5889 = vmatmul.msk.bf16.gmra.mxu1 %vm9428_vm11, %v5179_v61  ;;  %v5180_v61 = vpack.c.bf16 %v5162_v46, %v5129_v57  ;;  %v5028_v10 = vpop.f32.mrf.mxu0  ;;  %vm9455_vm15 = vmmov %vm9423_vm0 }
 0x4fd   : > { %vm9457_vm11 = vmmov %vm9423_vm0 }
 0x4fe   : > { %v5405_v15 = vadd.f32 %v8320_v5, %v5369_v11 }
 0x500   : > { %v5437_v28 = vadd.f32 %v5405_v15, %v9429_v27  ;;  %v4555_v15 = vpop.f32.mrf.mxu2 }
 0x501   : > { %v5267_v26 = vpop.f32.mrf.mxu1 }
 0x502   : > { %v5469_v4 = vmax.f32 %v5437_v28, 0.0  ;;  %v5334_v47 = vadd.f32 %v5267_v26, %v5080_v24  ;;  %v5082_v28 = vadd.f32 %v8389_v14, %v4860_v23 }
 0x504   : > { %5501 = vst.msk [vmem:[%s8333_s18 + $0x40] sm:$0xff] %vm9430_vm8, %v5469_v4  ;;  %v5370_v49 = vmul.f32 %v8314_v33, %v5334_v47  ;;  %v4809_v4 = vpop.f32.mrf.mxu3  ;;  %v4861_v47 = vadd.f32 %v8398_v51, %v4607_v48  ;;  %v5031_v32 = vpop.f32.mrf.mxu0  ;;  %v4862_v51 = vadd.f32 %v8417_v53, %v4608_v34  ;;  %vm9459_vm8 = vmmov %vm9423_vm0 }
 0x506   : > { %v5406_v42 = vadd.f32 %v8320_v5, %v5370_v49  ;;  %v5083_v14 = vadd.f32 %v8407_v52, %v4861_v47  ;;  %v9442_v52 = vld [vmem:[#allocation40_spill] sm:$0xff] }
 0x508   : > { %v5438_v30 = vadd.f32 %v5406_v42, %v9433_v16  ;;  %v4557_v63 = vpop.f32.mrf.mxu2 }
 0x509   : > { %v5270_v21 = vpop.f32.mrf.mxu1 }
 0x50a   : > { %v5470_v31 = vmax.f32 %v5438_v30, 0.0  ;;  %v5335_v62 = vadd.f32 %v5270_v21, %v5081_v54  ;;  %v9440_v54 = vld [vmem:[#allocation58_spill] sm:$0xff]  ;;  %v4609_v21 = vadd.f32 %v4550_v7, %v8157_v60 }
 0x50c   : > { %5502 = vst.msk [vmem:[%s8333_s18 + $0x48] sm:$0xff] %vm9434_vm14, %v5470_v31  ;;  %v5371_v11 = vmul.f32 %v8314_v33, %v5335_v62  ;;  %5890 = vmatmul.msk.bf16.gmra.mxu1 %vm9435_vm13, %v5180_v61  ;;  %v4811_v41 = vpop.f32.mrf.mxu3  ;;  %v5084_v31 = vadd.f32 %v8426_v6, %v4862_v51  ;;  %v5033_v61 = vpop.f32.mrf.mxu0  ;;  %v4863_v48 = vadd.f32 %v8434_v38, %v4609_v21  ;;  %vm9463_vm14 = vmmov %vm9423_vm0 }
 0x50d   : > { %vm9465_vm13 = vmmov %vm9423_vm0 }
 0x50e   : > { %v5407_v58 = vadd.f32 %v8320_v5, %v5371_v11  ;;  %v5134_v11 = vld [vmem:[#allocation3 + $0x129] sm:$0xff] }
 0x50f   : > { %v5166_v60 = vsel %vm9296_vm4, %v5134_v11, 0.0  ;;  %vm9446_vm4 = vmmov %vm9423_vm0 }
 0x510   : > { %v5439_v27 = vadd.f32 %v5407_v58, %v9436_v17  ;;  %v4560_v58 = vpop.f32.mrf.mxu2 }
 0x511   : > { %v5272_v24 = vpop.f32.mrf.mxu1 }
 0x512   : > { %v5471_v26 = vmax.f32 %v5439_v27, 0.0  ;;  %v5336_v12 = vadd.f32 %v5272_v24, %v5082_v28  ;;  %v5133_v27 = vld [vmem:[#allocation3 + $0x121] sm:$0xff]  ;;  %v4610_v28 = vadd.f32 %v4552_v59, %v8173_v55  ;;  %v9444_v24 = vld [vmem:[#allocation7_spill] sm:$0xff]  ;;  %v4611_v59 = vadd.f32 %v4555_v15, %v8179_v35  ;;  %v9449_v35 = vld [vmem:[#allocation6_spill] sm:$0xff] }
 0x513   : > { %v5182_v47 = vpack.c.bf16 %v5166_v60, %v5133_v27  ;;  %v9451_v60 = vld [vmem:[#allocation10_spill] sm:$0xff] }
 0x514   : > { %5503 = vst.msk [vmem:[%s8333_s18 + $0x50] sm:$0xff] %vm9437_vm5, %v5471_v26  ;;  %v5372_v39 = vmul.f32 %v8314_v33, %v5336_v12  ;;  %v4814_v6 = vpop.f32.mrf.mxu3  ;;  %v5085_v12 = vadd.f32 %v8441_v8, %v4863_v48  ;;  %v4864_v34 = vadd.f32 %v4806_v44, %v4610_v28  ;;  %vm9467_vm5 = vmmov %vm9423_vm0 }
 0x516   : > { %v5408_v49 = vadd.f32 %v8320_v5, %v5372_v39 }
 0x518   : > { %v5440_v42 = vadd.f32 %v5408_v49, %v9438_v43  ;;  %v5036_v43 = vpop.f32.mrf.mxu0 }
 0x519   : > { %v5275_v46 = vpop.f32.mrf.mxu1 }
 0x51a   : > { %v5472_v45 = vmax.f32 %v5440_v42, 0.0  ;;  %v5337_v16 = vadd.f32 %v5275_v46, %v5083_v14  ;;  %v4562_v42 = vpop.f32.mrf.mxu2  ;;  %v9447_v14 = vld [vmem:[#allocation5_spill] sm:$0xff]  ;;  %v5086_v46 = vadd.f32 %v5028_v10, %v4864_v34 }
 0x51c   : > { %5504 = vst.msk [vmem:[%s8333_s18 + $0x58] sm:$0xff] %vm9439_vm9, %v5472_v45  ;;  %v5373_v30 = vmul.f32 %v8314_v33, %v5337_v16  ;;  %5891 = vmatmul.msk.bf16.gmra.mxu1 %vm9441_vm10, %v9440_v54  ;;  %v4816_v45 = vpop.f32.mrf.mxu3  ;;  %vm9469_vm9 = vmmov %vm9423_vm0 }
 0x51d   : > { %vm9471_vm10 = vmmov %vm9423_vm0 }
 0x51e   : > { %v5409_v18 = vadd.f32 %v8320_v5, %v5373_v30  ;;  %v4865_v30 = vadd.f32 %v4809_v4, %v4611_v59 }
 0x520   : > { %v5441_v57 = vadd.f32 %v5409_v18, %v9442_v52  ;;  %v5038_v18 = vpop.f32.mrf.mxu0 }
 0x521   : > { %v5277_v62 = vpop.f32.mrf.mxu1 }
 0x522   : > { %v5473_v53 = vmax.f32 %v5441_v57, 0.0  ;;  %v5338_v23 = vadd.f32 %v5277_v62, %v5084_v31  ;;  %v4565_v52 = vpop.f32.mrf.mxu2  ;;  %v4612_v57 = vadd.f32 %v4557_v63, %v8193_v1  ;;  %v5087_v31 = vadd.f32 %v5031_v32, %v4865_v30 }
 0x524   : > { %5505 = vst.msk [vmem:[%s8333_s18 + $0x60] sm:$0xff] %vm9443_vm7, %v5473_v53  ;;  %v5374_v17 = vmul.f32 %v8314_v33, %v5338_v23  ;;  %v4819_v23 = vpop.f32.mrf.mxu3  ;;  %v4866_v11 = vadd.f32 %v4811_v41, %v4612_v57  ;;  %vm9473_vm7 = vmmov %vm9423_vm0 }
 0x526   : > { %v5410_v7 = vadd.f32 %v8320_v5, %v5374_v17  ;;  %v4613_v17 = vadd.f32 %v4560_v58, %v8199_v40  ;;  %v5088_v63 = vadd.f32 %v5033_v61, %v4866_v11  ;;  %v9452_v40 = vld [vmem:[#allocation11_spill] sm:$0xff] }
 0x528   : > { %v5442_v26 = vadd.f32 %v5410_v7, %v9444_v24  ;;  %v5041_v27 = vpop.f32.mrf.mxu0 }
 0x529   : > { %v5280_v38 = vpop.f32.mrf.mxu1 }
 0x52a   : > { %v5474_v39 = vmax.f32 %v5442_v26, 0.0  ;;  %v5339_v49 = vadd.f32 %v5280_v38, %v5085_v12  ;;  %v4567_v7 = vpop.f32.mrf.mxu2  ;;  %v4867_v26 = vadd.f32 %v4814_v6, %v4613_v17  ;;  %v4614_v38 = vadd.f32 %v4562_v42, %v8212_v29  ;;  %v9454_v29 = vld [vmem:[#allocation14_spill] sm:$0xff] }
 0x52c   : > { %5506 = vst.msk [vmem:[%s8333_s18 + $0x68] sm:$0xff] %vm9445_vm6, %v5474_v39  ;;  %v5375_v3 = vmul.f32 %v8314_v33, %v5339_v49  ;;  %5892 = vmatmul.msk.bf16.gmra.mxu1 %vm9446_vm4, %v5182_v47  ;;  %v4821_v12 = vpop.f32.mrf.mxu3  ;;  %v5089_v39 = vadd.f32 %v5036_v43, %v4867_v26  ;;  %v4868_v59 = vadd.f32 %v4816_v45, %v4614_v38  ;;  %vm9475_vm6 = vmmov %vm9423_vm0 }
 0x52d   : > { %vm9477_vm4 = vmmov %vm9423_vm0 }
 0x52e   : > { %v5411_v55 = vadd.f32 %v8320_v5, %v5375_v3 }
 0x530   : > { %v5443_v8 = vadd.f32 %v5411_v55, %v9447_v14  ;;  %v5043_v61 = vpop.f32.mrf.mxu0 }
 0x531   : > { %v5282_v16 = vpop.f32.mrf.mxu1 }
 0x532   : > { %v5475_v51 = vmax.f32 %v5443_v8, 0.0  ;;  %v5340_v44 = vadd.f32 %v5282_v16, %v5086_v46  ;;  %v4570_v55 = vpop.f32.mrf.mxu2  ;;  %v4615_v46 = vadd.f32 %v4565_v52, %v8220_v50  ;;  %v5090_v16 = vadd.f32 %v5038_v18, %v4868_v59 }
 0x533   : > { %v4617_v17 = vadd.f32 %v4570_v55, %v8242_v36 }
 0x534   : > { %5507 = vst.msk [vmem:[%s8333_s18 + $0x70] sm:$0xff] %vm9448_vm2, %v5475_v51  ;;  %v5376_v54 = vmul.f32 %v8314_v33, %v5340_v44  ;;  %v4824_v8 = vpop.f32.mrf.mxu3  ;;  %v4869_v30 = vadd.f32 %v4819_v23, %v4615_v46  ;;  %vm9479_vm2 = vmmov %vm9423_vm0 }
 0x536   : > { %v5412_v21 = vadd.f32 %v8320_v5, %v5376_v54  ;;  %v5091_v52 = vadd.f32 %v5041_v27, %v4869_v30 }
 0x538   : > { %v5444_v15 = vadd.f32 %v5412_v21, %v9449_v35  ;;  %v5046_v54 = vpop.f32.mrf.mxu0  ;;  %v4616_v35 = vadd.f32 %v4567_v7, %v8232_v20  ;;  %v9458_v20 = vld [vmem:[#allocation20_spill] sm:$0xff] }
 0x539   : > { %v5285_v10 = vpop.f32.mrf.mxu1 }
 0x53a   : > { %v5476_v62 = vmax.f32 %v5444_v15, 0.0  ;;  %v5341_v53 = vadd.f32 %v5285_v10, %v5087_v31  ;;  %v4572_v21 = vpop.f32.mrf.mxu2  ;;  %v9456_v15 = vld [vmem:[#allocation16_spill] sm:$0xff] }
 0x53c   : > { %5508 = vst.msk [vmem:[%s8333_s18 + $0x78] sm:$0xff] %vm9450_vm3, %v5476_v62  ;;  %v5377_v4 = vmul.f32 %v8314_v33, %v5341_v53  ;;  %v4826_v31 = vpop.f32.mrf.mxu3  ;;  %v4870_v53 = vadd.f32 %v4821_v12, %v4616_v35  ;;  %v4618_v12 = vadd.f32 %v4572_v21, %v8252_v2  ;;  %vm9481_vm3 = vmmov %vm9423_vm0 }
 0x53e   : > { %v5413_v48 = vadd.f32 %v8320_v5, %v5377_v4 }
 0x540   : > { %v5445_v1 = vadd.f32 %v5413_v48, %v9451_v60  ;;  %v5048_v11 = vpop.f32.mrf.mxu0 }
 0x541   : > { %v5287_v32 = vpop.f32.mrf.mxu1 }
 0x542   : > { %v5477_v28 = vmax.f32 %v5445_v1, 0.0  ;;  %v5342_v24 = vadd.f32 %v5287_v32, %v5088_v63  ;;  %v4575_v48 = vpop.f32.mrf.mxu2  ;;  %v5092_v1 = vadd.f32 %v5043_v61, %v4870_v53  ;;  %v4872_v61 = vadd.f32 %v4826_v31, %v4618_v12  ;;  %v9466_v53 = vld [vmem:[#allocation31_spill] sm:$0xff] }
 0x543   : > { %v4619_v59 = vadd.f32 %v4575_v48, %v8259_v25  ;;  %v9464_v25 = vld [vmem:[#allocation27_spill] sm:$0xff] }
 0x544   : > { %5509 = vst.msk [vmem:[%s8333_s18 + $0x80] sm:$0xff] %vm9423_vm0, %v5477_v28  ;;  %v5378_v41 = vmul.f32 %v8314_v33, %v5342_v24  ;;  %v4829_v32 = vpop.f32.mrf.mxu3  ;;  %v4871_v28 = vadd.f32 %v4824_v8, %v4617_v17 }
 0x546   : > { %v5414_v47 = vadd.f32 %v8320_v5, %v5378_v41  ;;  %v5093_v38 = vadd.f32 %v5046_v54, %v4871_v28 }
 0x548   : > { %v5446_v58 = vadd.f32 %v5414_v47, %v9452_v40  ;;  %v5051_v41 = vpop.f32.mrf.mxu0  ;;  %v9460_v47 = vld [vmem:[#allocation21_spill] sm:$0xff] }
 0x549   : > { %v5290_v49 = vpop.f32.mrf.mxu1 }
 0x54a   : > { %v5478_v34 = vmax.f32 %v5446_v58, 0.0  ;;  %v5343_v3 = vadd.f32 %v5290_v49, %v5089_v39  ;;  %v4577_v40 = vpop.f32.mrf.mxu2 }
 0x54b   : > { %v4620_v54 = vadd.f32 %v4577_v40, %v8268_v22 }
 0x54c   : > { %5510 = vst.msk [vmem:[%s8333_s18 + $0x88] sm:$0xff] %vm9453_vm12, %v5478_v34  ;;  %v5379_v6 = vmul.f32 %v8314_v33, %v5343_v3  ;;  %v4831_v3 = vpop.f32.mrf.mxu3 }
 0x54e   : > { %v5415_v14 = vadd.f32 %v8320_v5, %v5379_v6  ;;  %v9462_v6 = vld [vmem:[#allocation26_spill] sm:$0xff] }
 0x550   : > { %v5447_v42 = vadd.f32 %v5415_v14, %v9454_v29  ;;  %v5094_v14 = vadd.f32 %v5048_v11, %v4872_v61  ;;  %v5053_v46 = vpop.f32.mrf.mxu0 }
 0x551   : > { %v5292_v43 = vpop.f32.mrf.mxu1 }
 0x552   : > { %v5479_v51 = vmax.f32 %v5447_v42, 0.0  ;;  %v5344_v44 = vadd.f32 %v5292_v43, %v5090_v16  ;;  %v4580_v16 = vpop.f32.mrf.mxu2  ;;  %v4873_v43 = vadd.f32 %v4829_v32, %v4619_v59 }
 0x554   : > { %5511 = vst.msk [vmem:[%s8333_s18 + $0x90] sm:$0xff] %vm9455_vm15, %v5479_v51  ;;  %v5380_v45 = vmul.f32 %v8314_v33, %v5344_v44  ;;  %v4834_v30 = vpop.f32.mrf.mxu3  ;;  %v5095_v21 = vadd.f32 %v5051_v41, %v4873_v43 }
 0x556   : > { %v5416_v57 = vadd.f32 %v8320_v5, %v5380_v45 }
 0x558   : > { %v5448_v50 = vadd.f32 %v5416_v57, %v9456_v15 }
 0x559   : > { %v5295_v18 = vpop.f32.mrf.mxu1 }
 0x55a   : > { %v5480_v10 = vmax.f32 %v5448_v50, 0.0  ;;  %v5345_v62 = vadd.f32 %v5295_v18, %v5091_v52  ;;  %v5056_v50 = vpop.f32.mrf.mxu0  ;;  %v4874_v52 = vadd.f32 %v4831_v3, %v4620_v54  ;;  %v4582_v18 = vpop.f32.mrf.mxu2 }
 0x55c   : > { %5512 = vst.msk [vmem:[%s8333_s18 + $0x98] sm:$0xff] %vm9457_vm11, %v5480_v10  ;;  %v5381_v23 = vmul.f32 %v8314_v33, %v5345_v62  ;;  %v4621_v62 = vadd.f32 %v4580_v16, %v8275_v37  ;;  %v4836_v11 = vpop.f32.mrf.mxu3  ;;  %v9468_v37 = vld [vmem:[#allocation32_spill] sm:$0xff] }
 0x55e   : > { %v5417_v4 = vadd.f32 %v8320_v5, %v5381_v23  ;;  %v5096_v23 = vadd.f32 %v5053_v46, %v4874_v52  ;;  %v9472_v46 = vld [vmem:[#allocation37_spill] sm:$0xff] }
 0x560   : > { %v5449_v60 = vadd.f32 %v5417_v4, %v9458_v20  ;;  %v4875_v20 = vadd.f32 %v4834_v30, %v4621_v62 }
 0x561   : > { %v5297_v27 = vpop.f32.mrf.mxu1 }
 0x562   : > { %v5481_v63 = vmax.f32 %v5449_v60, 0.0  ;;  %v5346_v7 = vadd.f32 %v5297_v27, %v5092_v1  ;;  %v5058_v1 = vpop.f32.mrf.mxu0  ;;  %v5097_v28 = vadd.f32 %v5056_v50, %v4875_v20 }
 0x564   : > { %5513 = vst.msk [vmem:[%s8333_s18 + $0xa0] sm:$0xff] %vm9459_vm8, %v5481_v63  ;;  %v5382_v24 = vmul.f32 %v8314_v33, %v5346_v7  ;;  %v4585_v63 = vpop.f32.mrf.mxu2  ;;  %v4622_v7 = vadd.f32 %v4582_v18, %v8283_v56  ;;  %v4839_v12 = vpop.f32.mrf.mxu3 }
 0x566   : > { %v5418_v26 = vadd.f32 %v8320_v5, %v5382_v24 }
 0x568   : > { %v5450_v36 = vadd.f32 %v5418_v26, %v9460_v47  ;;  %v4876_v47 = vadd.f32 %v4836_v11, %v4622_v7 }
 0x569   : > { %v5300_v58 = vpop.f32.mrf.mxu1 }
 0x56a   : > { %v5482_v39 = vmax.f32 %v5450_v36, 0.0  ;;  %v5347_v49 = vadd.f32 %v5300_v58, %v5093_v38  ;;  %v5061_v40 = vpop.f32.mrf.mxu0  ;;  %v4623_v58 = vadd.f32 %v4585_v63, %v8292_v0 }
 0x56c   : > { %5514 = vst.msk [vmem:[%s8333_s18 + $0xa8] sm:$0xff] %vm9461_vm1, %v5482_v39  ;;  %v5383_v34 = vmul.f32 %v8314_v33, %v5347_v49  ;;  %v9470_v39 = vld [vmem:[#allocation36_spill] sm:$0xff]  ;;  %v5098_v49 = vadd.f32 %v5058_v1, %v4876_v47  ;;  %v4587_v61 = vpop.f32.mrf.mxu2  ;;  %v4877_v59 = vadd.f32 %v4839_v12, %v4623_v58  ;;  %v9480_v12 = vld [vmem:[#allocation85_spill] sm:$0xff] }
 0x56e   : > { %v5419_v55 = vadd.f32 %v8320_v5, %v5383_v34 }
 0x570   : > { %v5451_v2 = vadd.f32 %v5419_v55, %v9462_v6 }
 0x571   : > { %v5302_v8 = vpop.f32.mrf.mxu1 }
 0x572   : > { %v5483_v29 = vmax.f32 %v5451_v2, 0.0  ;;  %v5348_v42 = vadd.f32 %v5302_v8, %v5094_v14  ;;  %v4841_v2 = vpop.f32.mrf.mxu3  ;;  %v4624_v8 = vadd.f32 %v4587_v61, %v8298_v13  ;;  %v9474_v13 = vld [vmem:[#allocation41_spill] sm:$0xff] }
 0x574   : > { %5515 = vst.msk [vmem:[%s8333_s18 + $0xb0] sm:$0xff] %vm9463_vm14, %v5483_v29  ;;  %v5384_v51 = vmul.f32 %v8314_v33, %v5348_v42  ;;  %v5099_v29 = vadd.f32 %v5061_v40, %v4877_v59  ;;  %v4878_v30 = vadd.f32 %v4841_v2, %v4624_v8 }
 0x576   : > { %v5420_v44 = vadd.f32 %v8320_v5, %v5384_v51  ;;  %v5063_v51 = vpop.f32.mrf.mxu0 }
 0x578   : > { %v5452_v45 = vadd.f32 %v5420_v44, %v9464_v25  ;;  %v4590_v44 = vpop.f32.mrf.mxu2 }
 0x579   : > { %v5305_v57 = vpop.f32.mrf.mxu1 }
 0x57a   : > { %v5484_v35 = vmax.f32 %v5452_v45, 0.0  ;;  %v5349_v15 = vadd.f32 %v5305_v57, %v5095_v21  ;;  %v4844_v45 = vpop.f32.mrf.mxu3  ;;  %v4625_v21 = vadd.f32 %v4590_v44, %v8303_v9  ;;  %v9476_v9 = vld [vmem:[#allocation42_spill] sm:$0xff] }
 0x57c   : > { %5516 = vst.msk [vmem:[%s8333_s18 + $0xb8] sm:$0xff] %vm9465_vm13, %v5484_v35  ;;  %v5385_v31 = vmul.f32 %v8314_v33, %v5349_v15  ;;  %v5100_v35 = vadd.f32 %v5063_v51, %v4878_v30  ;;  %v4879_v18 = vadd.f32 %v4844_v45, %v4625_v21 }
 0x57e   : > { %v5421_v10 = vadd.f32 %v8320_v5, %v5385_v31  ;;  %v5066_v31 = vpop.f32.mrf.mxu0 }
 0x580   : > { %v5453_v22 = vadd.f32 %v5421_v10, %v9466_v53  ;;  %v4592_v62 = vpop.f32.mrf.mxu2 }
 0x581   : > { %v5307_v4 = vpop.f32.mrf.mxu1 }
 0x582   : > { %v5485_v48 = vmax.f32 %v5453_v22, 0.0  ;;  %v5350_v17 = vadd.f32 %v5307_v4, %v5096_v23  ;;  %v5101_v22 = vadd.f32 %v5066_v31, %v4879_v18  ;;  %v4626_v23 = vadd.f32 %v4592_v62, %v8307_v19  ;;  %v4846_v4 = vpop.f32.mrf.mxu3 }
 0x584   : > { %5517 = vst.msk [vmem:[%s8333_s18 + $0xc0] sm:$0xff] %vm9467_vm5, %v5485_v48  ;;  %v5386_v60 = vmul.f32 %v8314_v33, %v5350_v17 }
 0x586   : > { %v5422_v27 = vadd.f32 %v8320_v5, %v5386_v60  ;;  %v4880_v60 = vadd.f32 %v4846_v4, %v4626_v23 }
 0x588   : > { %v5454_v32 = vadd.f32 %v5422_v27, %v9468_v37  ;;  %v5068_v27 = vpop.f32.mrf.mxu0  ;;  %v9478_v37 = vld [vmem:[#allocation84_spill] sm:$0xff] }
 0x589   : > { %v5310_v24 = vpop.f32.mrf.mxu1  ;;  %v5102_v7 = vadd.f32 %v5068_v27, %v4880_v60 }
 0x58a   : > { %v5486_v26 = vmax.f32 %v5454_v32, 0.0  ;;  %v5351_v41 = vadd.f32 %v5310_v24, %v5097_v28 }
 0x58c   : > { %5518 = vst.msk [vmem:[%s8333_s18 + $0xc8] sm:$0xff] %vm9469_vm9, %v5486_v26  ;;  %v5387_v36 = vmul.f32 %v8314_v33, %v5351_v41 }
 0x58e   : > { %v5423_v38 = vadd.f32 %v8320_v5, %v5387_v36 }
 0x590   : > { %v5455_v56 = vadd.f32 %v5423_v38, %v9470_v39 }
 0x591   : > { %v5312_v34 = vpop.f32.mrf.mxu1 }
 0x592   : > { %v5487_v3 = vmax.f32 %v5455_v56, 0.0  ;;  %v5352_v55 = vadd.f32 %v5312_v34, %v5098_v49 }
 0x594   : > { %5519 = vst.msk [vmem:[%s8333_s18 + $0xd0] sm:$0xff] %vm9471_vm10, %v5487_v3  ;;  %v5388_v6 = vmul.f32 %v8314_v33, %v5352_v55 }
 0x596   : > { %v5424_v14 = vadd.f32 %v8320_v5, %v5388_v6 }
 0x598   : > { %v5456_v0 = vadd.f32 %v5424_v14, %v9472_v46 }
 0x599   : > { %v5315_v42 = vpop.f32.mrf.mxu1 }
 0x59a   : > { %v5488_v16 = vmax.f32 %v5456_v0, 0.0  ;;  %v5353_v43 = vadd.f32 %v5315_v42, %v5099_v29 }
 0x59c   : > { %5520 = vst.msk [vmem:[%s8333_s18 + $0xd8] sm:$0xff] %vm9473_vm7, %v5488_v16  ;;  %v5389_v54 = vmul.f32 %v8314_v33, %v5353_v43 }
 0x59e   : > { %v5425_v25 = vadd.f32 %v8320_v5, %v5389_v54 }
 0x5a0   : > { %v5457_v57 = vadd.f32 %v5425_v25, %v9474_v13 }
 0x5a1   : > { %v5317_v15 = vpop.f32.mrf.mxu1 }
 0x5a2   : > { %v5489_v50 = vmax.f32 %v5457_v57, 0.0  ;;  %v5354_v52 = vadd.f32 %v5317_v15, %v5100_v35 }
 0x5a4   : > { %5521 = vst.msk [vmem:[%s8333_s18 + $0xe0] sm:$0xff] %vm9475_vm6, %v5489_v50  ;;  %v5390_v10 = vmul.f32 %v8314_v33, %v5354_v52 }
 0x5a6   : > { %v5426_v53 = vadd.f32 %v8320_v5, %v5390_v10 }
 0x5a8   : > { %v5458_v11 = vadd.f32 %v5426_v53, %v9476_v9 }
 0x5a9   : > { %v5320_v48 = vpop.f32.mrf.mxu1 }
 0x5aa   : > { %v5490_v17 = vmax.f32 %v5458_v11, 0.0  ;;  %v5355_v20 = vadd.f32 %v5320_v48, %v5101_v22 }
 0x5ac   : > { %5522 = vst.msk [vmem:[%s8333_s18 + $0xe8] sm:$0xff] %vm9477_vm4, %v5490_v17  ;;  %v5391_v1 = vmul.f32 %v8314_v33, %v5355_v20 }
 0x5ae   : > { %v5427_v63 = vadd.f32 %v8320_v5, %v5391_v1 }
 0x5b0   : > { %v5459_v32 = vadd.f32 %v5427_v63, %v9478_v37 }
 0x5b1   : > { %v5322_v19 = vpop.f32.mrf.mxu1 }
 0x5b2   : > { %v5491_v28 = vmax.f32 %v5459_v32, 0.0  ;;  %v5356_v24 = vadd.f32 %v5322_v19, %v5102_v7 }
 0x5b4   : > { %5523 = vst.msk [vmem:[%s8333_s18 + $0xf0] sm:$0xff] %vm9479_vm2, %v5491_v28  ;;  %v5392_v26 = vmul.f32 %v8314_v33, %v5356_v24 }
 0x5b6   : > { %v5428_v41 = vadd.f32 %v8320_v5, %v5392_v26 }
 0x5b8   : > { %v5460_v47 = vadd.f32 %v5428_v41, %v9480_v12 }
 0x5ba   : > { %v5492_v36 = vmax.f32 %v5460_v47, 0.0 }
 0x5bc   : > { %5524 = vst.msk [vmem:[%s8333_s18 + $0xf8] sm:$0xff] %vm9481_vm3, %v5492_v36 }
 0x5bd PF: > { %s17_s24 = sadd.s32 1, %s5928_s24  }
 0x5be   : > { %p14_p4 = scmp.ge.s32.totalorder %s17_s24, 4  }
 0x5c0   :  { %16 = sbr.rel (!%p14_p4) target bundleno = 1 (0x1), region = 94 }

</bundles_post_ra>
